<compile_context>
chip_gen: v7x
topology: tpu7x:2x2x1
jax: 0.10.0
libtpu: 0.0.40
codegen_flags: <defaults>
</compile_context>

<pallas_src>
import functools

import jax
import jax.numpy as jnp
from jax.experimental import pallas as pl
from jax.experimental.pallas import tpu as pltpu


# ------------------------------- math helpers -------------------------------
def _sigmoid(x):
    # stable, EUP-friendly sigmoid
    return 0.5 * (jnp.tanh(0.5 * x) + 1.0)


def _round_up(x, m):
    return ((x + m - 1) // m) * m


# --------------------------------- kernel -----------------------------------
def pointer_decoder_kernel(emb_ref, ctx_ref, mask_ref, onehot_ref, pre2_ref,
                           wcat0_ref, b0_ref, wcat1_ref, b1_ref,
                           wlo1_ref, wlo3_ref, wout_ref, bout_ref,
                           wpg_ref, bpg_ref,
                           dist_ref, attn_ref,
                           h_scr, c_scr):
    t_blk = pl.program_id(1)              # time-block index (sequential axis)
    K = emb_ref.shape[0]                  # decode steps per grid iteration
    H = h_scr.shape[2]

    @pl.when(t_blk == 0)
    def _():
        # decoder_type == 2  ->  init_hidden_with_user returns zeros
        h_scr[...] = jnp.zeros_like(h_scr)
        c_scr[...] = jnp.zeros_like(c_scr)

    # ---- hoist all loop-invariant loads (read once per grid iteration) ----
    ctx = ctx_ref[...]                    # (BT, S_pad, H)
    mask = mask_ref[...]                  # (1, 1, S_pad) additive (-1e9 on padding)
    onehot = onehot_ref[...]              # (BT, S_pad, V_pad) pointer scatter matrix
    pre2 = pre2_ref[...]                  # (BT, H) precomputed mix2@w_lo_mid.T + b_lo
    wcat0 = wcat0_ref[...]                # (E+H, 4H)
    b0 = b0_ref[...]                      # (1, 4H)
    wcat1 = wcat1_ref[...]                # (2H, 4H)
    b1 = b1_ref[...]                      # (1, 4H)
    wlo1 = wlo1_ref[...]                  # (H, H)   w_lo[:, :H].T
    wlo3 = wlo3_ref[...]                  # (H, H)   w_lo[:, 2H:].T
    wout = wout_ref[...]                  # (H, V_pad)
    bout = bout_ref[...]                  # (1, V_pad) (-1e9 on vocab padding)
    wpg = wpg_ref[...]                    # (1, H)
    bpg = bpg_ref[0, 0]                   # scalar from SMEM

    h0 = h_scr[0]
    c0 = c_scr[0]
    h1 = h_scr[1]
    c1 = c_scr[1]

    # TODO(synk): nn.Dropout treated as eval-mode identity (no dropout applied).
    for k in range(K):  # trace-time unrolled; static indices for loads/stores
        x = emb_ref[k]                                            # (BT, E)

        # ---- fused 2-layer LSTM cell (PyTorch gate order i, f, g, o) ----
        gates0 = jnp.dot(jnp.concatenate([x, h0], axis=-1), wcat0,
                         preferred_element_type=jnp.float32) + b0
        i0 = _sigmoid(gates0[:, 0:H])
        f0 = _sigmoid(gates0[:, H:2 * H])
        g0 = jnp.tanh(gates0[:, 2 * H:3 * H])
        o0 = _sigmoid(gates0[:, 3 * H:4 * H])
        c0 = f0 * c0 + i0 * g0
        h0 = o0 * jnp.tanh(c0)

        gates1 = jnp.dot(jnp.concatenate([h0, h1], axis=-1), wcat1,
                         preferred_element_type=jnp.float32) + b1
        i1 = _sigmoid(gates1[:, 0:H])
        f1 = _sigmoid(gates1[:, H:2 * H])
        g1 = jnp.tanh(gates1[:, 2 * H:3 * H])
        o1 = _sigmoid(gates1[:, 3 * H:4 * H])
        c1 = f1 * c1 + i1 * g1
        h1 = o1 * jnp.tanh(c1)

        out2d = h1                                                # (BT, H)

        # ---- Attention2 content branch (personalized branch precomputed) ----
        q3 = out2d[:, None, :]                                    # (BT, 1, H)
        sc = jnp.einsum('bqh,bsh->bqs', q3, ctx,
                        preferred_element_type=jnp.float32) + mask  # (BT,1,S_pad)
        m = jnp.max(sc, axis=-1, keepdims=True)
        e = jnp.exp(sc - m)
        attn3 = e * pl.reciprocal(jnp.sum(e, axis=-1, keepdims=True), approx=True)
        mix1 = jnp.einsum('bqs,bsh->bqh', attn3, ctx,
                          preferred_element_type=jnp.float32)[:, 0, :]  # (BT, H)

        att_out = jnp.tanh(
            jnp.dot(mix1, wlo1, preferred_element_type=jnp.float32)
            + jnp.dot(out2d, wlo3, preferred_element_type=jnp.float32)
            + pre2)                                               # (BT, H)

        # ---- vocab distribution + pointer mixture ----
        logits_v = jnp.dot(att_out, wout,
                           preferred_element_type=jnp.float32) + bout   # (BT, V_pad)
        mv = jnp.max(logits_v, axis=-1, keepdims=True)
        ev = jnp.exp(logits_v - mv)
        pred = ev * pl.reciprocal(jnp.sum(ev, axis=-1, keepdims=True), approx=True)

        p_gen = _sigmoid(jnp.sum(att_out * wpg, axis=-1, keepdims=True) + bpg)  # (BT,1)

        attn_w3 = (1.0 - p_gen)[:, :, None] * attn3               # (BT, 1, S_pad)
        contrib = jnp.einsum('bqs,bsv->bqv', attn_w3, onehot,
                             preferred_element_type=jnp.float32)[:, 0, :]  # (BT,V_pad)

        dist_ref[k] = p_gen * pred + contrib                      # sums to 1 over V
        attn_ref[k] = attn3[:, 0, :]

    # carry LSTM state to the next time block
    h_scr[0] = h0
    c_scr[0] = c0
    h_scr[1] = h1
    c_scr[1] = c1


# --------------------------------- wrapper ----------------------------------
@functools.partial(jax.jit, static_argnames=('steps_per_block',))
def pointer_decoder_forward(params, encoder_outputs, encoder_input_ids,
                            target_ids, user_embedding, *, steps_per_block=4):
    B, S, H = encoder_outputs.shape
    T = target_ids.shape[1]
    steps = T - 1
    E = params['embedding'].shape[1]
    V = params['w_out'].shape[0]

    K = max(1, min(steps_per_block, steps))
    nblocks = pl.cdiv(steps, K)
    steps_pad = nblocks * K
    S_pad = _round_up(S, 128)         # lane-dense attention output
    V_pad = _round_up(V, 128)         # lane-dense distribution output
    BT = B                            # batch tile; set BT < B (mult. of 8) to split on v7x

    f32 = jnp.float32

    # ---- glue / time-invariant precomputation (runs once, outside the kernel) ----
    # teacher-forcing inputs, time-major, padded to a multiple of K steps
    emb = params['embedding'][target_ids[:, :steps]]              # (B, steps, E)
    emb = jnp.transpose(emb, (1, 0, 2))                           # (steps, B, E)
    emb = jnp.pad(emb, ((0, steps_pad - steps), (0, 0), (0, 0)))

    # encoder context padded along S; additive mask keeps padded keys at -1e9
    ctx = jnp.pad(encoder_outputs, ((0, 0), (0, S_pad - S), (0, 0))).astype(f32)
    mask = jnp.where(jnp.arange(S_pad) < S, 0.0, -1e9).astype(f32).reshape(1, 1, S_pad)

    # personalized attention branch (time-invariant) folded into a single term
    user_temp = user_embedding @ params['w_tr'].T + params['b_tr']          # (B, H)
    sc2 = jnp.einsum('bh,bsh->bs', user_temp, encoder_outputs)
    attn2 = jax.nn.softmax(sc2, axis=-1)
    mix2 = jnp.einsum('bs,bsh->bh', attn2, encoder_outputs)
    pre2 = (mix2 @ params['w_lo'][:, H:2 * H].T + params['b_lo']).astype(f32)  # (B, H)

    # fused + pre-transposed LSTM weights
    wcat0 = jnp.concatenate([params['w_ih0'], params['w_hh0']], axis=1).T    # (E+H, 4H)
    b0 = (params['b_ih0'] + params['b_hh0']).reshape(1, 4 * H)
    wcat1 = jnp.concatenate([params['w_ih1'], params['w_hh1']], axis=1).T    # (2H, 4H)
    b1 = (params['b_ih1'] + params['b_hh1']).reshape(1, 4 * H)

    # linear_out split by input slice (mix2 slice already folded into pre2)
    wlo1 = params['w_lo'][:, :H].T                                           # (H, H)
    wlo3 = params['w_lo'][:, 2 * H:].T                                       # (H, H)

    # vocab projection, pre-transposed and padded (pad bias = -1e9 -> softmax weight 0)
    # TODO(synk): for realistic vocab sizes, w_out / onehot should be V-tiled (bf16,
    # HBM-resident) instead of kept fully resident in VMEM; fine at demo shapes.
    wout = jnp.zeros((H, V_pad), f32).at[:, :V].set(params['w_out'].T)
    bout = jnp.full((1, V_pad), -1e9, f32).at[0, :V].set(params['b_out'])

    # pointer scatter matrix (one-hot of src), built once; padded S rows are zero
    onehot = jax.nn.one_hot(encoder_input_ids.astype(jnp.int32), V_pad, dtype=f32)
    onehot = jnp.pad(onehot, ((0, 0), (0, S_pad - S), (0, 0)))               # (B,S_pad,V_pad)

    wpg = params['w_pg'].reshape(1, H).astype(f32)
    bpg = params['b_pg'].reshape(1, 1).astype(f32)                           # scalar -> SMEM

    grid = (B // BT, nblocks)

    def w_full(shape):
        return pl.BlockSpec(shape, lambda b, g, _n=len(shape): (0,) * _n)

    in_specs = [
        pl.BlockSpec((K, BT, E), lambda b, g: (g, b, 0)),          # embedded step inputs
        pl.BlockSpec((BT, S_pad, H), lambda b, g: (b, 0, 0)),      # encoder context
        w_full((1, 1, S_pad)),                                     # key padding mask
        pl.BlockSpec((BT, S_pad, V_pad), lambda b, g: (b, 0, 0)),  # src one-hot
        pl.BlockSpec((BT, H), lambda b, g: (b, 0)),                # pre2 (user branch)
        w_full((E + H, 4 * H)), w_full((1, 4 * H)),                # LSTM layer 0
        w_full((2 * H, 4 * H)), w_full((1, 4 * H)),                # LSTM layer 1
        w_full((H, H)), w_full((H, H)),                            # linear_out slices
        w_full((H, V_pad)), w_full((1, V_pad)),                    # out projection
        w_full((1, H)),                                            # p_gen weight
        pl.BlockSpec(memory_space=pltpu.MemorySpace.SMEM),         # p_gen bias (scalar)
    ]
    out_specs = [
        pl.BlockSpec((K, BT, V_pad), lambda b, g: (g, b, 0)),
        pl.BlockSpec((K, BT, S_pad), lambda b, g: (g, b, 0)),
    ]
    out_shape = [
        jax.ShapeDtypeStruct((steps_pad, B, V_pad), f32),
        jax.ShapeDtypeStruct((steps_pad, B, S_pad), f32),
    ]

    dist, attn = pl.pallas_call(
        pointer_decoder_kernel,
        grid=grid,
        in_specs=in_specs,
        out_specs=out_specs,
        out_shape=out_shape,
        scratch_shapes=[pltpu.VMEM((2, BT, H), f32),   # LSTM h state
                        pltpu.VMEM((2, BT, H), f32)],  # LSTM c state
        compiler_params=pltpu.CompilerParams(
            dimension_semantics=("parallel", "arbitrary"),   # batch || , time sequential
            vmem_limit_bytes=32 * 1024 * 1024),
    )(emb, ctx, mask, onehot, pre2,
      wcat0, b0, wcat1, b1,
      wlo1, wlo3, wout, bout, wpg, bpg)

    # strip padding, go back to (B, T-1, ...) layout; log / final softmax once here
    dist = jnp.transpose(dist[:steps, :, :V], (1, 0, 2))           # (B, steps, V)
    attn = jnp.transpose(attn[:steps, :, :S], (1, 0, 2))           # (B, steps, S)
    logits = jnp.log(dist)                                         # matches torch.log(...)
    final = jax.nn.softmax(logits, axis=-1)
    return {'logits': logits, 'attention_weights': attn, 'final_dists': final}


# TODO(synk): the free-running decode branch (target_ids=None: argmax feedback +
# EOS early stop) of PointerDecoder.forward is not implemented; only the
# teacher-forcing path is covered by this kernel.


# ------------------------- pure-JAX reference (check) ------------------------
def reference_forward(params, encoder_outputs, encoder_input_ids,
                      target_ids, user_embedding):
    B, S, H = encoder_outputs.shape
    V = params['w_out'].shape[0]
    T = target_ids.shape[1]
    h = jnp.zeros((2, B, H), jnp.float32)
    c = jnp.zeros((2, B, H), jnp.float32)
    user_temp = user_embedding @ params['w_tr'].T + params['b_tr']

    def cell(x, h, c, wih, whh, bih, bhh):
        gates = x @ wih.T + bih + h @ whh.T + bhh
        i = jax.nn.sigmoid(gates[:, :H]); f = jax.nn.sigmoid(gates[:, H:2 * H])
        g = jnp.tanh(gates[:, 2 * H:3 * H]); o = jax.nn.sigmoid(gates[:, 3 * H:])
        c_new = f * c + i * g
        return o * jnp.tanh(c_new), c_new

    logits_all, attn_all, final_all = [], [], []
    for t in range(T - 1):
        x = params['embedding'][target_ids[:, t]]
        h0, c0 = cell(x, h[0], c[0], params['w_ih0'], params['w_hh0'],
                      params['b_ih0'], params['b_hh0'])
        h1, c1 = cell(h0, h[1], c[1], params['w_ih1'], params['w_hh1'],
                      params['b_ih1'], params['b_hh1'])
        h = jnp.stack([h0, h1]); c = jnp.stack([c0, c1])
        out = h1
        attn1 = jax.nn.softmax(jnp.einsum('bh,bsh->bs', out, encoder_outputs), axis=-1)
        mix1 = jnp.einsum('bs,bsh->bh', attn1, encoder_outputs)
        attn2 = jax.nn.softmax(jnp.einsum('bh,bsh->bs', user_temp, encoder_outputs), axis=-1)
        mix2 = jnp.einsum('bs,bsh->bh', attn2, encoder_outputs)
        combined = jnp.concatenate([mix1, mix2, out], axis=-1)
        att_out = jnp.tanh(combined @ params['w_lo'].T + params['b_lo'])
        pred = jax.nn.softmax(att_out @ params['w_out'].T + params['b_out'], axis=-1)
        p_gen = jax.nn.sigmoid(att_out @ params['w_pg'].T + params['b_pg'])
        vocab_dist = p_gen * pred
        attn_w = (1.0 - p_gen) * attn1
        onehot = jax.nn.one_hot(encoder_input_ids, V, dtype=jnp.float32)
        contrib = jnp.einsum('bs,bsv->bv', attn_w, onehot)
        logit = jnp.log(vocab_dist + contrib)
        logits_all.append(logit)
        attn_all.append(attn1)
        final_all.append(jax.nn.softmax(logit, axis=-1))
    return {
        'logits': jnp.stack(logits_all, 1),
        'attention_weights': jnp.stack(attn_all, 1),
        'final_dists': jnp.stack(final_all, 1),
    }


# ------------------------------- param init ---------------------------------
def init_params(key, vocab_size, embedding_dim, hidden_dim, user_size):
    ks = jax.random.split(key, 16)
    n = lambda k, shape: 0.1 * jax.random.normal(k, shape, dtype=jnp.float32)
    H, E, V, U = hidden_dim, embedding_dim, vocab_size, user_size
    emb = n(ks[0], (V, E)).at[0].set(0.0)   # padding_idx=0 -> zero row
    return {
        'embedding': emb,
        'w_ih0': n(ks[1], (4 * H, E)), 'w_hh0': n(ks[2], (4 * H, H)),
        'b_ih0': n(ks[3], (4 * H,)),   'b_hh0': n(ks[4], (4 * H,)),
        'w_ih1': n(ks[5], (4 * H, H)), 'w_hh1': n(ks[6], (4 * H, H)),
        'b_ih1': n(ks[7], (4 * H,)),   'b_hh1': n(ks[8], (4 * H,)),
        'w_tr':  n(ks[9], (H, U)),     'b_tr':  n(ks[10], (H,)),        # transform
        'w_lo':  n(ks[11], (H, 3 * H)), 'b_lo': n(ks[12], (H,)),        # linear_out
        'w_out': n(ks[13], (V, H)),    'b_out': n(ks[14], (V,)),        # out
        'w_pg':  n(ks[15], (1, H)),    'b_pg':  jnp.zeros((1,), jnp.float32),
    }


# ----------------------------------- main ------------------------------------
if __name__ == "__main__":
    B, S, H, E, U, V, T = 2, 8, 32, 16, 8, 64, 6

    key = jax.random.PRNGKey(0)
    kp, k1, k2, k3, k4 = jax.random.split(key, 5)
    params = init_params(kp, V, E, H, U)

    encoder_outputs = jax.random.normal(k1, (B, S, H), dtype=jnp.float32)
    encoder_input_ids = jax.random.randint(k2, (B, S), 1, V).astype(jnp.int32)
    target_ids = jax.random.randint(k3, (B, T), 1, V).astype(jnp.int32)
    user_embedding = jax.random.normal(k4, (B, U), dtype=jnp.float32)

    out = pointer_decoder_forward(params, encoder_outputs, encoder_input_ids,
                                  target_ids, user_embedding)
    jax.block_until_ready(out)

    ref = reference_forward(params, encoder_outputs, encoder_input_ids,
                            target_ids, user_embedding)
    for k in ('logits', 'attention_weights', 'final_dists'):
        assert out[k].shape == ref[k].shape, (k, out[k].shape, ref[k].shape)
        assert jnp.allclose(out[k], ref[k], atol=5e-3, rtol=5e-3), k

    print("KERNEL_OK")
</pallas_src>

<mosaic_0001>
module attributes {stable_mosaic.version = 11 : i64} {
  func.func @pointer_decoder_kernel(%arg0: i32, %arg1: i32, %arg2: memref<4x2x16xf32, #tpu.memory_space<vmem>>, %arg3: memref<2x128x32xf32, #tpu.memory_space<vmem>>, %arg4: memref<1x1x128xf32, #tpu.memory_space<vmem>>, %arg5: memref<2x128x128xf32, #tpu.memory_space<vmem>>, %arg6: memref<2x32xf32, #tpu.memory_space<vmem>>, %arg7: memref<48x128xf32, #tpu.memory_space<vmem>>, %arg8: memref<1x128xf32, #tpu.memory_space<vmem>>, %arg9: memref<64x128xf32, #tpu.memory_space<vmem>>, %arg10: memref<1x128xf32, #tpu.memory_space<vmem>>, %arg11: memref<32x32xf32, #tpu.memory_space<vmem>>, %arg12: memref<32x32xf32, #tpu.memory_space<vmem>>, %arg13: memref<32x128xf32, #tpu.memory_space<vmem>>, %arg14: memref<1x128xf32, #tpu.memory_space<vmem>>, %arg15: memref<1x32xf32, #tpu.memory_space<vmem>>, %arg16: memref<1x1xf32, #tpu.memory_space<smem>>, %arg17: memref<4x2x128xf32, #tpu.memory_space<vmem>>, %arg18: memref<4x2x128xf32, #tpu.memory_space<vmem>>, %arg19: memref<2x2x32xf32, #tpu.memory_space<vmem>>, %arg20: memref<2x2x32xf32, #tpu.memory_space<vmem>>) attributes {dimension_semantics = [#tpu.dimension_semantics<parallel>, #tpu.dimension_semantics<arbitrary>], iteration_bounds = array<i64: 1, 2>, scalar_prefetch = 0 : i64, scratch_operands = 2 : i64, tpu.core_type = #tpu.core_type<tc>, window_params = [{transform_indices = @transform_0, window_bounds = array<i64: 4, 2, 16>}, {transform_indices = @transform_1, window_bounds = array<i64: 2, 128, 32>}, {pipeline_mode = #tpu.pipeline_mode<synchronous>, transform_indices = @transform_2, window_bounds = array<i64: 1, 1, 128>}, {transform_indices = @transform_3, window_bounds = array<i64: 2, 128, 128>}, {transform_indices = @transform_4, window_bounds = array<i64: 2, 32>}, {pipeline_mode = #tpu.pipeline_mode<synchronous>, transform_indices = @transform_5, window_bounds = array<i64: 48, 128>}, {pipeline_mode = #tpu.pipeline_mode<synchronous>, transform_indices = @transform_6, window_bounds = array<i64: 1, 128>}, {pipeline_mode = #tpu.pipeline_mode<synchronous>, transform_indices = @transform_7, window_bounds = array<i64: 64, 128>}, {pipeline_mode = #tpu.pipeline_mode<synchronous>, transform_indices = @transform_8, window_bounds = array<i64: 1, 128>}, {pipeline_mode = #tpu.pipeline_mode<synchronous>, transform_indices = @transform_9, window_bounds = array<i64: 32, 32>}, {pipeline_mode = #tpu.pipeline_mode<synchronous>, transform_indices = @transform_10, window_bounds = array<i64: 32, 32>}, {pipeline_mode = #tpu.pipeline_mode<synchronous>, transform_indices = @transform_11, window_bounds = array<i64: 32, 128>}, {pipeline_mode = #tpu.pipeline_mode<synchronous>, transform_indices = @transform_12, window_bounds = array<i64: 1, 128>}, {pipeline_mode = #tpu.pipeline_mode<synchronous>, transform_indices = @transform_13, window_bounds = array<i64: 1, 32>}, {transform_indices = @transform_14, window_bounds = array<i64: 1, 1>}, {transform_indices = @transform_15, window_bounds = array<i64: 4, 2, 128>}, {transform_indices = @transform_16, window_bounds = array<i64: 4, 2, 128>}]} {
    %c0_i32 = arith.constant 0 : i32
    %0 = arith.cmpi eq, %arg1, %c0_i32 : i32
    %1 = arith.extui %0 : i1 to i32
    %c0_i32_0 = arith.constant 0 : i32
    %2 = arith.cmpi ne, %1, %c0_i32_0 : i32
    scf.if %2 {
      %cst_227 = arith.constant 0.000000e+00 : f32
      %581 = vector.broadcast %cst_227 : f32 to vector<2x2x32xf32>
      %c0_228 = arith.constant 0 : index
      %c0_229 = arith.constant 0 : index
      %c0_230 = arith.constant 0 : index
      %582 = vector.load %arg19[%c0_228, %c0_229, %c0_230] : memref<2x2x32xf32, #tpu.memory_space<vmem>>, vector<2x2x32xf32>
      tpu.vector_store %arg19[%c0_228, %c0_229, %c0_230], %581 {strides = array<i32>} : memref<2x2x32xf32, #tpu.memory_space<vmem>>, vector<2x2x32xf32>,
      %cst_231 = arith.constant 0.000000e+00 : f32
      %583 = vector.broadcast %cst_231 : f32 to vector<2x2x32xf32>
      %c0_232 = arith.constant 0 : index
      %c0_233 = arith.constant 0 : index
      %c0_234 = arith.constant 0 : index
      %584 = vector.load %arg20[%c0_232, %c0_233, %c0_234] : memref<2x2x32xf32, #tpu.memory_space<vmem>>, vector<2x2x32xf32>
      tpu.vector_store %arg20[%c0_232, %c0_233, %c0_234], %583 {strides = array<i32>} : memref<2x2x32xf32, #tpu.memory_space<vmem>>, vector<2x2x32xf32>,
    } else {
    }
    %c0 = arith.constant 0 : index
    %c0_1 = arith.constant 0 : index
    %c0_2 = arith.constant 0 : index
    %3 = vector.load %arg3[%c0, %c0_1, %c0_2] : memref<2x128x32xf32, #tpu.memory_space<vmem>>, vector<2x128x32xf32>
    %c0_3 = arith.constant 0 : index
    %c0_4 = arith.constant 0 : index
    %c0_5 = arith.constant 0 : index
    %4 = vector.load %arg4[%c0_3, %c0_4, %c0_5] : memref<1x1x128xf32, #tpu.memory_space<vmem>>, vector<1x1x128xf32>
    %c0_6 = arith.constant 0 : index
    %c0_7 = arith.constant 0 : index
    %c0_8 = arith.constant 0 : index
    %5 = vector.load %arg5[%c0_6, %c0_7, %c0_8] : memref<2x128x128xf32, #tpu.memory_space<vmem>>, vector<2x128x128xf32>
    %c0_9 = arith.constant 0 : index
    %c0_10 = arith.constant 0 : index
    %6 = vector.load %arg6[%c0_9, %c0_10] : memref<2x32xf32, #tpu.memory_space<vmem>>, vector<2x32xf32>
    %c0_11 = arith.constant 0 : index
    %c0_12 = arith.constant 0 : index
    %7 = vector.load %arg7[%c0_11, %c0_12] : memref<48x128xf32, #tpu.memory_space<vmem>>, vector<48x128xf32>
    %c0_13 = arith.constant 0 : index
    %c0_14 = arith.constant 0 : index
    %8 = vector.load %arg8[%c0_13, %c0_14] : memref<1x128xf32, #tpu.memory_space<vmem>>, vector<1x128xf32>
    %c0_15 = arith.constant 0 : index
    %c0_16 = arith.constant 0 : index
    %9 = vector.load %arg9[%c0_15, %c0_16] : memref<64x128xf32, #tpu.memory_space<vmem>>, vector<64x128xf32>
    %c0_17 = arith.constant 0 : index
    %c0_18 = arith.constant 0 : index
    %10 = vector.load %arg10[%c0_17, %c0_18] : memref<1x128xf32, #tpu.memory_space<vmem>>, vector<1x128xf32>
    %c0_19 = arith.constant 0 : index
    %c0_20 = arith.constant 0 : index
    %11 = vector.load %arg11[%c0_19, %c0_20] : memref<32x32xf32, #tpu.memory_space<vmem>>, vector<32x32xf32>
    %c0_21 = arith.constant 0 : index
    %c0_22 = arith.constant 0 : index
    %12 = vector.load %arg12[%c0_21, %c0_22] : memref<32x32xf32, #tpu.memory_space<vmem>>, vector<32x32xf32>
    %c0_23 = arith.constant 0 : index
    %c0_24 = arith.constant 0 : index
    %13 = vector.load %arg13[%c0_23, %c0_24] : memref<32x128xf32, #tpu.memory_space<vmem>>, vector<32x128xf32>
    %c0_25 = arith.constant 0 : index
    %c0_26 = arith.constant 0 : index
    %14 = vector.load %arg14[%c0_25, %c0_26] : memref<1x128xf32, #tpu.memory_space<vmem>>, vector<1x128xf32>
    %c0_27 = arith.constant 0 : index
    %c0_28 = arith.constant 0 : index
    %15 = vector.load %arg15[%c0_27, %c0_28] : memref<1x32xf32, #tpu.memory_space<vmem>>, vector<1x32xf32>
    %c0_29 = arith.constant 0 : index
    %c0_30 = arith.constant 0 : index
    %16 = memref.load %arg16[%c0_29, %c0_30] : memref<1x1xf32, #tpu.memory_space<smem>>
    %c0_31 = arith.constant 0 : index
    %c0_32 = arith.constant 0 : index
    %c0_33 = arith.constant 0 : index
    %17 = vector.load %arg19[%c0_31, %c0_32, %c0_33] : memref<2x2x32xf32, #tpu.memory_space<vmem>>, vector<1x2x32xf32>
    %18 = vector.shape_cast %17 : vector<1x2x32xf32> to vector<2x32xf32>
    %c0_34 = arith.constant 0 : index
    %c0_35 = arith.constant 0 : index
    %c0_36 = arith.constant 0 : index
    %19 = vector.load %arg20[%c0_34, %c0_35, %c0_36] : memref<2x2x32xf32, #tpu.memory_space<vmem>>, vector<1x2x32xf32>
    %20 = vector.shape_cast %19 : vector<1x2x32xf32> to vector<2x32xf32>
    %c1 = arith.constant 1 : index
    %c0_37 = arith.constant 0 : index
    %c0_38 = arith.constant 0 : index
    %21 = vector.load %arg19[%c1, %c0_37, %c0_38] : memref<2x2x32xf32, #tpu.memory_space<vmem>>, vector<1x2x32xf32>
    %22 = vector.shape_cast %21 : vector<1x2x32xf32> to vector<2x32xf32>
    %c1_39 = arith.constant 1 : index
    %c0_40 = arith.constant 0 : index
    %c0_41 = arith.constant 0 : index
    %23 = vector.load %arg20[%c1_39, %c0_40, %c0_41] : memref<2x2x32xf32, #tpu.memory_space<vmem>>, vector<1x2x32xf32>
    %24 = vector.shape_cast %23 : vector<1x2x32xf32> to vector<2x32xf32>
    %c0_42 = arith.constant 0 : index
    %c0_43 = arith.constant 0 : index
    %c0_44 = arith.constant 0 : index
    %25 = vector.load %arg2[%c0_42, %c0_43, %c0_44] : memref<4x2x16xf32, #tpu.memory_space<vmem>>, vector<1x2x16xf32>
    %26 = vector.shape_cast %25 : vector<1x2x16xf32> to vector<2x16xf32>
    %27 = tpu.concatenate %26, %18 in 1 : vector<2x16xf32>, vector<2x32xf32> -> vector<2x48xf32>
    %cst = arith.constant dense<0.000000e+00> : vector<2x128xf32>
    %28 = tpu.matmul %27, %7, %cst {dimension_numbers = #tpu.dot_dimension_numbers<[1], [0], [0], [1], [0, 0, 1, 1], [], []>} : vector<2x48xf32>, vector<48x128xf32>, vector<2x128xf32> -> vector<2x128xf32>
    %29 = vector.broadcast %8 : vector<1x128xf32> to vector<2x128xf32>
    %30 = arith.addf %28, %29 : vector<2x128xf32>
    %31 = vector.extract_strided_slice %30 {offsets = [0, 0], sizes = [2, 32], strides = [1, 1]} : vector<2x128xf32> to vector<2x32xf32>
    %cst_45 = arith.constant 5.000000e-01 : f32
    %32 = vector.broadcast %cst_45 : f32 to vector<2x32xf32>
    %33 = arith.mulf %32, %31 : vector<2x32xf32>
    %34 = math.tanh %33 : vector<2x32xf32>
    %cst_46 = arith.constant 1.000000e+00 : f32
    %35 = vector.broadcast %cst_46 : f32 to vector<2x32xf32>
    %36 = arith.addf %34, %35 : vector<2x32xf32>
    %cst_47 = arith.constant 5.000000e-01 : f32
    %37 = vector.broadcast %cst_47 : f32 to vector<2x32xf32>
    %38 = arith.mulf %37, %36 : vector<2x32xf32>
    %39 = vector.extract_strided_slice %30 {offsets = [0, 32], sizes = [2, 32], strides = [1, 1]} : vector<2x128xf32> to vector<2x32xf32>
    %cst_48 = arith.constant 5.000000e-01 : f32
    %40 = vector.broadcast %cst_48 : f32 to vector<2x32xf32>
    %41 = arith.mulf %40, %39 : vector<2x32xf32>
    %42 = math.tanh %41 : vector<2x32xf32>
    %cst_49 = arith.constant 1.000000e+00 : f32
    %43 = vector.broadcast %cst_49 : f32 to vector<2x32xf32>
    %44 = arith.addf %42, %43 : vector<2x32xf32>
    %cst_50 = arith.constant 5.000000e-01 : f32
    %45 = vector.broadcast %cst_50 : f32 to vector<2x32xf32>
    %46 = arith.mulf %45, %44 : vector<2x32xf32>
    %47 = vector.extract_strided_slice %30 {offsets = [0, 64], sizes = [2, 32], strides = [1, 1]} : vector<2x128xf32> to vector<2x32xf32>
    %48 = math.tanh %47 : vector<2x32xf32>
    %49 = vector.extract_strided_slice %30 {offsets = [0, 96], sizes = [2, 32], strides = [1, 1]} : vector<2x128xf32> to vector<2x32xf32>
    %cst_51 = arith.constant 5.000000e-01 : f32
    %50 = vector.broadcast %cst_51 : f32 to vector<2x32xf32>
    %51 = arith.mulf %50, %49 : vector<2x32xf32>
    %52 = math.tanh %51 : vector<2x32xf32>
    %cst_52 = arith.constant 1.000000e+00 : f32
    %53 = vector.broadcast %cst_52 : f32 to vector<2x32xf32>
    %54 = arith.addf %52, %53 : vector<2x32xf32>
    %cst_53 = arith.constant 5.000000e-01 : f32
    %55 = vector.broadcast %cst_53 : f32 to vector<2x32xf32>
    %56 = arith.mulf %55, %54 : vector<2x32xf32>
    %57 = arith.mulf %46, %20 : vector<2x32xf32>
    %58 = arith.mulf %38, %48 : vector<2x32xf32>
    %59 = arith.addf %57, %58 : vector<2x32xf32>
    %60 = math.tanh %59 : vector<2x32xf32>
    %61 = arith.mulf %56, %60 : vector<2x32xf32>
    %62 = tpu.concatenate %61, %22 in 1 : vector<2x32xf32>, vector<2x32xf32> -> vector<2x64xf32>
    %cst_54 = arith.constant dense<0.000000e+00> : vector<2x128xf32>
    %63 = tpu.matmul %62, %9, %cst_54 {dimension_numbers = #tpu.dot_dimension_numbers<[1], [0], [0], [1], [0, 0, 1, 1], [], []>} : vector<2x64xf32>, vector<64x128xf32>, vector<2x128xf32> -> vector<2x128xf32>
    %64 = vector.broadcast %10 : vector<1x128xf32> to vector<2x128xf32>
    %65 = arith.addf %63, %64 : vector<2x128xf32>
    %66 = vector.extract_strided_slice %65 {offsets = [0, 0], sizes = [2, 32], strides = [1, 1]} : vector<2x128xf32> to vector<2x32xf32>
    %cst_55 = arith.constant 5.000000e-01 : f32
    %67 = vector.broadcast %cst_55 : f32 to vector<2x32xf32>
    %68 = arith.mulf %67, %66 : vector<2x32xf32>
    %69 = math.tanh %68 : vector<2x32xf32>
    %cst_56 = arith.constant 1.000000e+00 : f32
    %70 = vector.broadcast %cst_56 : f32 to vector<2x32xf32>
    %71 = arith.addf %69, %70 : vector<2x32xf32>
    %cst_57 = arith.constant 5.000000e-01 : f32
    %72 = vector.broadcast %cst_57 : f32 to vector<2x32xf32>
    %73 = arith.mulf %72, %71 : vector<2x32xf32>
    %74 = vector.extract_strided_slice %65 {offsets = [0, 32], sizes = [2, 32], strides = [1, 1]} : vector<2x128xf32> to vector<2x32xf32>
    %cst_58 = arith.constant 5.000000e-01 : f32
    %75 = vector.broadcast %cst_58 : f32 to vector<2x32xf32>
    %76 = arith.mulf %75, %74 : vector<2x32xf32>
    %77 = math.tanh %76 : vector<2x32xf32>
    %cst_59 = arith.constant 1.000000e+00 : f32
    %78 = vector.broadcast %cst_59 : f32 to vector<2x32xf32>
    %79 = arith.addf %77, %78 : vector<2x32xf32>
    %cst_60 = arith.constant 5.000000e-01 : f32
    %80 = vector.broadcast %cst_60 : f32 to vector<2x32xf32>
    %81 = arith.mulf %80, %79 : vector<2x32xf32>
    %82 = vector.extract_strided_slice %65 {offsets = [0, 64], sizes = [2, 32], strides = [1, 1]} : vector<2x128xf32> to vector<2x32xf32>
    %83 = math.tanh %82 : vector<2x32xf32>
    %84 = vector.extract_strided_slice %65 {offsets = [0, 96], sizes = [2, 32], strides = [1, 1]} : vector<2x128xf32> to vector<2x32xf32>
    %cst_61 = arith.constant 5.000000e-01 : f32
    %85 = vector.broadcast %cst_61 : f32 to vector<2x32xf32>
    %86 = arith.mulf %85, %84 : vector<2x32xf32>
    %87 = math.tanh %86 : vector<2x32xf32>
    %cst_62 = arith.constant 1.000000e+00 : f32
    %88 = vector.broadcast %cst_62 : f32 to vector<2x32xf32>
    %89 = arith.addf %87, %88 : vector<2x32xf32>
    %cst_63 = arith.constant 5.000000e-01 : f32
    %90 = vector.broadcast %cst_63 : f32 to vector<2x32xf32>
    %91 = arith.mulf %90, %89 : vector<2x32xf32>
    %92 = arith.mulf %81, %24 : vector<2x32xf32>
    %93 = arith.mulf %73, %83 : vector<2x32xf32>
    %94 = arith.addf %92, %93 : vector<2x32xf32>
    %95 = math.tanh %94 : vector<2x32xf32>
    %96 = arith.mulf %91, %95 : vector<2x32xf32>
    %97 = vector.shape_cast %96 : vector<2x32xf32> to vector<2x1x32xf32>
    "tpu.trace_start"() <{level = 10 : i32, message = "bqh,bsh->bqs"}> : () -> ()
    %cst_64 = arith.constant dense<0.000000e+00> : vector<2x1x128xf32>
    %98 = tpu.matmul %97, %3, %cst_64 {dimension_numbers = #tpu.dot_dimension_numbers<[2], [2], [1], [1], [0, 0, 0, 1, 1, 1], [0], [0]>} : vector<2x1x32xf32>, vector<2x128x32xf32>, vector<2x1x128xf32> -> vector<2x1x128xf32>
    "tpu.trace_stop"() : () -> ()
    %99 = vector.broadcast %4 : vector<1x1x128xf32> to vector<2x1x128xf32>
    %100 = arith.addf %98, %99 : vector<2x1x128xf32>
    %cst_65 = arith.constant dense<0xFF800000> : vector<2x1xf32>
    %101 = vector.multi_reduction <maximumf>, %100, %cst_65 [2] : vector<2x1x128xf32> to vector<2x1xf32>
    %102 = vector.shape_cast %101 : vector<2x1xf32> to vector<2x1x1xf32>
    %103 = vector.broadcast %102 : vector<2x1x1xf32> to vector<2x1x128xf32>
    %104 = arith.subf %100, %103 : vector<2x1x128xf32>
    %105 = math.exp %104 : vector<2x1x128xf32>
    %cst_66 = arith.constant dense<0.000000e+00> : vector<2x1xf32>
    %106 = vector.multi_reduction <add>, %105, %cst_66 [2] : vector<2x1x128xf32> to vector<2x1xf32>
    %107 = vector.shape_cast %106 : vector<2x1xf32> to vector<2x1x1xf32>
    %108 = tpu.reciprocal %107 {approx = true} : vector<2x1x1xf32> -> vector<2x1x1xf32>
    %109 = vector.broadcast %108 : vector<2x1x1xf32> to vector<2x1x128xf32>
    %110 = arith.mulf %105, %109 : vector<2x1x128xf32>
    "tpu.trace_start"() <{level = 10 : i32, message = "bqs,bsh->bqh"}> : () -> ()
    %cst_67 = arith.constant dense<0.000000e+00> : vector<2x1x32xf32>
    %111 = tpu.matmul %110, %3, %cst_67 {dimension_numbers = #tpu.dot_dimension_numbers<[2], [1], [1], [2], [0, 0, 0, 1, 1, 2], [0], [0]>} : vector<2x1x128xf32>, vector<2x128x32xf32>, vector<2x1x32xf32> -> vector<2x1x32xf32>
    "tpu.trace_stop"() : () -> ()
    %112 = vector.shape_cast %111 : vector<2x1x32xf32> to vector<2x32xf32>
    %cst_68 = arith.constant dense<0.000000e+00> : vector<2x32xf32>
    %113 = tpu.matmul %112, %11, %cst_68 {dimension_numbers = #tpu.dot_dimension_numbers<[1], [0], [0], [1], [0, 0, 1, 1], [], []>} : vector<2x32xf32>, vector<32x32xf32>, vector<2x32xf32> -> vector<2x32xf32>
    %cst_69 = arith.constant dense<0.000000e+00> : vector<2x32xf32>
    %114 = tpu.matmul %96, %12, %cst_69 {dimension_numbers = #tpu.dot_dimension_numbers<[1], [0], [0], [1], [0, 0, 1, 1], [], []>} : vector<2x32xf32>, vector<32x32xf32>, vector<2x32xf32> -> vector<2x32xf32>
    %115 = arith.addf %113, %114 : vector<2x32xf32>
    %116 = arith.addf %115, %6 : vector<2x32xf32>
    %117 = math.tanh %116 : vector<2x32xf32>
    %cst_70 = arith.constant dense<0.000000e+00> : vector<2x128xf32>
    %118 = tpu.matmul %117, %13, %cst_70 {dimension_numbers = #tpu.dot_dimension_numbers<[1], [0], [0], [1], [0, 0, 1, 1], [], []>} : vector<2x32xf32>, vector<32x128xf32>, vector<2x128xf32> -> vector<2x128xf32>
    %119 = vector.broadcast %14 : vector<1x128xf32> to vector<2x128xf32>
    %120 = arith.addf %118, %119 : vector<2x128xf32>
    %cst_71 = arith.constant dense<0xFF800000> : vector<2xf32>
    %121 = vector.multi_reduction <maximumf>, %120, %cst_71 [1] : vector<2x128xf32> to vector<2xf32>
    %122 = vector.shape_cast %121 : vector<2xf32> to vector<2x1xf32>
    %123 = vector.broadcast %122 : vector<2x1xf32> to vector<2x128xf32>
    %124 = arith.subf %120, %123 : vector<2x128xf32>
    %125 = math.exp %124 : vector<2x128xf32>
    %cst_72 = arith.constant dense<0.000000e+00> : vector<2xf32>
    %126 = vector.multi_reduction <add>, %125, %cst_72 [1] : vector<2x128xf32> to vector<2xf32>
    %127 = vector.shape_cast %126 : vector<2xf32> to vector<2x1xf32>
    %128 = tpu.reciprocal %127 {approx = true} : vector<2x1xf32> -> vector<2x1xf32>
    %129 = vector.broadcast %128 : vector<2x1xf32> to vector<2x128xf32>
    %130 = arith.mulf %125, %129 : vector<2x128xf32>
    %131 = vector.broadcast %15 : vector<1x32xf32> to vector<2x32xf32>
    %132 = arith.mulf %117, %131 : vector<2x32xf32>
    %cst_73 = arith.constant dense<0.000000e+00> : vector<2xf32>
    %133 = vector.multi_reduction <add>, %132, %cst_73 [1] : vector<2x32xf32> to vector<2xf32>
    %134 = vector.shape_cast %133 : vector<2xf32> to vector<2x1xf32>
    %135 = vector.broadcast %16 : f32 to vector<2x1xf32>
    %136 = arith.addf %134, %135 : vector<2x1xf32>
    %cst_74 = arith.constant 5.000000e-01 : f32
    %137 = vector.broadcast %cst_74 : f32 to vector<2x1xf32>
    %138 = arith.mulf %137, %136 : vector<2x1xf32>
    %139 = math.tanh %138 : vector<2x1xf32>
    %cst_75 = arith.constant 1.000000e+00 : f32
    %140 = vector.broadcast %cst_75 : f32 to vector<2x1xf32>
    %141 = arith.addf %139, %140 : vector<2x1xf32>
    %cst_76 = arith.constant 5.000000e-01 : f32
    %142 = vector.broadcast %cst_76 : f32 to vector<2x1xf32>
    %143 = arith.mulf %142, %141 : vector<2x1xf32>
    %cst_77 = arith.constant 1.000000e+00 : f32
    %144 = vector.broadcast %cst_77 : f32 to vector<2x1xf32>
    %145 = arith.subf %144, %143 : vector<2x1xf32>
    %146 = vector.shape_cast %145 : vector<2x1xf32> to vector<2x1x1xf32>
    %147 = vector.broadcast %146 : vector<2x1x1xf32> to vector<2x1x128xf32>
    %148 = arith.mulf %147, %110 : vector<2x1x128xf32>
    "tpu.trace_start"() <{level = 10 : i32, message = "bqs,bsv->bqv"}> : () -> ()
    %cst_78 = arith.constant dense<0.000000e+00> : vector<2x1x128xf32>
    %149 = tpu.matmul %148, %5, %cst_78 {dimension_numbers = #tpu.dot_dimension_numbers<[2], [1], [1], [2], [0, 0, 0, 1, 1, 2], [0], [0]>} : vector<2x1x128xf32>, vector<2x128x128xf32>, vector<2x1x128xf32> -> vector<2x1x128xf32>
    "tpu.trace_stop"() : () -> ()
    %150 = vector.shape_cast %149 : vector<2x1x128xf32> to vector<2x128xf32>
    %151 = vector.broadcast %143 : vector<2x1xf32> to vector<2x128xf32>
    %152 = arith.mulf %151, %130 : vector<2x128xf32>
    %153 = arith.addf %152, %150 : vector<2x128xf32>
    %c0_79 = arith.constant 0 : index
    %c0_80 = arith.constant 0 : index
    %c0_81 = arith.constant 0 : index
    %154 = vector.load %arg17[%c0_79, %c0_80, %c0_81] : memref<4x2x128xf32, #tpu.memory_space<vmem>>, vector<1x2x128xf32>
    %155 = vector.shape_cast %154 : vector<1x2x128xf32> to vector<2x128xf32>
    %156 = vector.shape_cast %153 : vector<2x128xf32> to vector<1x2x128xf32>
    tpu.vector_store %arg17[%c0_79, %c0_80, %c0_81], %156 {strides = array<i32>} : memref<4x2x128xf32, #tpu.memory_space<vmem>>, vector<1x2x128xf32>,
    %157 = vector.shape_cast %110 : vector<2x1x128xf32> to vector<2x128xf32>
    %c0_82 = arith.constant 0 : index
    %c0_83 = arith.constant 0 : index
    %c0_84 = arith.constant 0 : index
    %158 = vector.load %arg18[%c0_82, %c0_83, %c0_84] : memref<4x2x128xf32, #tpu.memory_space<vmem>>, vector<1x2x128xf32>
    %159 = vector.shape_cast %158 : vector<1x2x128xf32> to vector<2x128xf32>
    %160 = vector.shape_cast %157 : vector<2x128xf32> to vector<1x2x128xf32>
    tpu.vector_store %arg18[%c0_82, %c0_83, %c0_84], %160 {strides = array<i32>} : memref<4x2x128xf32, #tpu.memory_space<vmem>>, vector<1x2x128xf32>,
    %c1_85 = arith.constant 1 : index
    %c0_86 = arith.constant 0 : index
    %c0_87 = arith.constant 0 : index
    %161 = vector.load %arg2[%c1_85, %c0_86, %c0_87] : memref<4x2x16xf32, #tpu.memory_space<vmem>>, vector<1x2x16xf32>
    %162 = vector.shape_cast %161 : vector<1x2x16xf32> to vector<2x16xf32>
    %163 = tpu.concatenate %162, %61 in 1 : vector<2x16xf32>, vector<2x32xf32> -> vector<2x48xf32>
    %cst_88 = arith.constant dense<0.000000e+00> : vector<2x128xf32>
    %164 = tpu.matmul %163, %7, %cst_88 {dimension_numbers = #tpu.dot_dimension_numbers<[1], [0], [0], [1], [0, 0, 1, 1], [], []>} : vector<2x48xf32>, vector<48x128xf32>, vector<2x128xf32> -> vector<2x128xf32>
    %165 = vector.broadcast %8 : vector<1x128xf32> to vector<2x128xf32>
    %166 = arith.addf %164, %165 : vector<2x128xf32>
    %167 = vector.extract_strided_slice %166 {offsets = [0, 0], sizes = [2, 32], strides = [1, 1]} : vector<2x128xf32> to vector<2x32xf32>
    %cst_89 = arith.constant 5.000000e-01 : f32
    %168 = vector.broadcast %cst_89 : f32 to vector<2x32xf32>
    %169 = arith.mulf %168, %167 : vector<2x32xf32>
    %170 = math.tanh %169 : vector<2x32xf32>
    %cst_90 = arith.constant 1.000000e+00 : f32
    %171 = vector.broadcast %cst_90 : f32 to vector<2x32xf32>
    %172 = arith.addf %170, %171 : vector<2x32xf32>
    %cst_91 = arith.constant 5.000000e-01 : f32
    %173 = vector.broadcast %cst_91 : f32 to vector<2x32xf32>
    %174 = arith.mulf %173, %172 : vector<2x32xf32>
    %175 = vector.extract_strided_slice %166 {offsets = [0, 32], sizes = [2, 32], strides = [1, 1]} : vector<2x128xf32> to vector<2x32xf32>
    %cst_92 = arith.constant 5.000000e-01 : f32
    %176 = vector.broadcast %cst_92 : f32 to vector<2x32xf32>
    %177 = arith.mulf %176, %175 : vector<2x32xf32>
    %178 = math.tanh %177 : vector<2x32xf32>
    %cst_93 = arith.constant 1.000000e+00 : f32
    %179 = vector.broadcast %cst_93 : f32 to vector<2x32xf32>
    %180 = arith.addf %178, %179 : vector<2x32xf32>
    %cst_94 = arith.constant 5.000000e-01 : f32
    %181 = vector.broadcast %cst_94 : f32 to vector<2x32xf32>
    %182 = arith.mulf %181, %180 : vector<2x32xf32>
    %183 = vector.extract_strided_slice %166 {offsets = [0, 64], sizes = [2, 32], strides = [1, 1]} : vector<2x128xf32> to vector<2x32xf32>
    %184 = math.tanh %183 : vector<2x32xf32>
    %185 = vector.extract_strided_slice %166 {offsets = [0, 96], sizes = [2, 32], strides = [1, 1]} : vector<2x128xf32> to vector<2x32xf32>
    %cst_95 = arith.constant 5.000000e-01 : f32
    %186 = vector.broadcast %cst_95 : f32 to vector<2x32xf32>
    %187 = arith.mulf %186, %185 : vector<2x32xf32>
    %188 = math.tanh %187 : vector<2x32xf32>
    %cst_96 = arith.constant 1.000000e+00 : f32
    %189 = vector.broadcast %cst_96 : f32 to vector<2x32xf32>
    %190 = arith.addf %188, %189 : vector<2x32xf32>
    %cst_97 = arith.constant 5.000000e-01 : f32
    %191 = vector.broadcast %cst_97 : f32 to vector<2x32xf32>
    %192 = arith.mulf %191, %190 : vector<2x32xf32>
    %193 = arith.mulf %182, %59 : vector<2x32xf32>
    %194 = arith.mulf %174, %184 : vector<2x32xf32>
    %195 = arith.addf %193, %194 : vector<2x32xf32>
    %196 = math.tanh %195 : vector<2x32xf32>
    %197 = arith.mulf %192, %196 : vector<2x32xf32>
    %198 = tpu.concatenate %197, %96 in 1 : vector<2x32xf32>, vector<2x32xf32> -> vector<2x64xf32>
    %cst_98 = arith.constant dense<0.000000e+00> : vector<2x128xf32>
    %199 = tpu.matmul %198, %9, %cst_98 {dimension_numbers = #tpu.dot_dimension_numbers<[1], [0], [0], [1], [0, 0, 1, 1], [], []>} : vector<2x64xf32>, vector<64x128xf32>, vector<2x128xf32> -> vector<2x128xf32>
    %200 = vector.broadcast %10 : vector<1x128xf32> to vector<2x128xf32>
    %201 = arith.addf %199, %200 : vector<2x128xf32>
    %202 = vector.extract_strided_slice %201 {offsets = [0, 0], sizes = [2, 32], strides = [1, 1]} : vector<2x128xf32> to vector<2x32xf32>
    %cst_99 = arith.constant 5.000000e-01 : f32
    %203 = vector.broadcast %cst_99 : f32 to vector<2x32xf32>
    %204 = arith.mulf %203, %202 : vector<2x32xf32>
    %205 = math.tanh %204 : vector<2x32xf32>
    %cst_100 = arith.constant 1.000000e+00 : f32
    %206 = vector.broadcast %cst_100 : f32 to vector<2x32xf32>
    %207 = arith.addf %205, %206 : vector<2x32xf32>
    %cst_101 = arith.constant 5.000000e-01 : f32
    %208 = vector.broadcast %cst_101 : f32 to vector<2x32xf32>
    %209 = arith.mulf %208, %207 : vector<2x32xf32>
    %210 = vector.extract_strided_slice %201 {offsets = [0, 32], sizes = [2, 32], strides = [1, 1]} : vector<2x128xf32> to vector<2x32xf32>
    %cst_102 = arith.constant 5.000000e-01 : f32
    %211 = vector.broadcast %cst_102 : f32 to vector<2x32xf32>
    %212 = arith.mulf %211, %210 : vector<2x32xf32>
    %213 = math.tanh %212 : vector<2x32xf32>
    %cst_103 = arith.constant 1.000000e+00 : f32
    %214 = vector.broadcast %cst_103 : f32 to vector<2x32xf32>
    %215 = arith.addf %213, %214 : vector<2x32xf32>
    %cst_104 = arith.constant 5.000000e-01 : f32
    %216 = vector.broadcast %cst_104 : f32 to vector<2x32xf32>
    %217 = arith.mulf %216, %215 : vector<2x32xf32>
    %218 = vector.extract_strided_slice %201 {offsets = [0, 64], sizes = [2, 32], strides = [1, 1]} : vector<2x128xf32> to vector<2x32xf32>
    %219 = math.tanh %218 : vector<2x32xf32>
    %220 = vector.extract_strided_slice %201 {offsets = [0, 96], sizes = [2, 32], strides = [1, 1]} : vector<2x128xf32> to vector<2x32xf32>
    %cst_105 = arith.constant 5.000000e-01 : f32
    %221 = vector.broadcast %cst_105 : f32 to vector<2x32xf32>
    %222 = arith.mulf %221, %220 : vector<2x32xf32>
    %223 = math.tanh %222 : vector<2x32xf32>
    %cst_106 = arith.constant 1.000000e+00 : f32
    %224 = vector.broadcast %cst_106 : f32 to vector<2x32xf32>
    %225 = arith.addf %223, %224 : vector<2x32xf32>
    %cst_107 = arith.constant 5.000000e-01 : f32
    %226 = vector.broadcast %cst_107 : f32 to vector<2x32xf32>
    %227 = arith.mulf %226, %225 : vector<2x32xf32>
    %228 = arith.mulf %217, %94 : vector<2x32xf32>
    %229 = arith.mulf %209, %219 : vector<2x32xf32>
    %230 = arith.addf %228, %229 : vector<2x32xf32>
    %231 = math.tanh %230 : vector<2x32xf32>
    %232 = arith.mulf %227, %231 : vector<2x32xf32>
    %233 = vector.shape_cast %232 : vector<2x32xf32> to vector<2x1x32xf32>
    "tpu.trace_start"() <{level = 10 : i32, message = "bqh,bsh->bqs"}> : () -> ()
    %cst_108 = arith.constant dense<0.000000e+00> : vector<2x1x128xf32>
    %234 = tpu.matmul %233, %3, %cst_108 {dimension_numbers = #tpu.dot_dimension_numbers<[2], [2], [1], [1], [0, 0, 0, 1, 1, 1], [0], [0]>} : vector<2x1x32xf32>, vector<2x128x32xf32>, vector<2x1x128xf32> -> vector<2x1x128xf32>
    "tpu.trace_stop"() : () -> ()
    %235 = vector.broadcast %4 : vector<1x1x128xf32> to vector<2x1x128xf32>
    %236 = arith.addf %234, %235 : vector<2x1x128xf32>
    %cst_109 = arith.constant dense<0xFF800000> : vector<2x1xf32>
    %237 = vector.multi_reduction <maximumf>, %236, %cst_109 [2] : vector<2x1x128xf32> to vector<2x1xf32>
    %238 = vector.shape_cast %237 : vector<2x1xf32> to vector<2x1x1xf32>
    %239 = vector.broadcast %238 : vector<2x1x1xf32> to vector<2x1x128xf32>
    %240 = arith.subf %236, %239 : vector<2x1x128xf32>
    %241 = math.exp %240 : vector<2x1x128xf32>
    %cst_110 = arith.constant dense<0.000000e+00> : vector<2x1xf32>
    %242 = vector.multi_reduction <add>, %241, %cst_110 [2] : vector<2x1x128xf32> to vector<2x1xf32>
    %243 = vector.shape_cast %242 : vector<2x1xf32> to vector<2x1x1xf32>
    %244 = tpu.reciprocal %243 {approx = true} : vector<2x1x1xf32> -> vector<2x1x1xf32>
    %245 = vector.broadcast %244 : vector<2x1x1xf32> to vector<2x1x128xf32>
    %246 = arith.mulf %241, %245 : vector<2x1x128xf32>
    "tpu.trace_start"() <{level = 10 : i32, message = "bqs,bsh->bqh"}> : () -> ()
    %cst_111 = arith.constant dense<0.000000e+00> : vector<2x1x32xf32>
    %247 = tpu.matmul %246, %3, %cst_111 {dimension_numbers = #tpu.dot_dimension_numbers<[2], [1], [1], [2], [0, 0, 0, 1, 1, 2], [0], [0]>} : vector<2x1x128xf32>, vector<2x128x32xf32>, vector<2x1x32xf32> -> vector<2x1x32xf32>
    "tpu.trace_stop"() : () -> ()
    %248 = vector.shape_cast %247 : vector<2x1x32xf32> to vector<2x32xf32>
    %cst_112 = arith.constant dense<0.000000e+00> : vector<2x32xf32>
    %249 = tpu.matmul %248, %11, %cst_112 {dimension_numbers = #tpu.dot_dimension_numbers<[1], [0], [0], [1], [0, 0, 1, 1], [], []>} : vector<2x32xf32>, vector<32x32xf32>, vector<2x32xf32> -> vector<2x32xf32>
    %cst_113 = arith.constant dense<0.000000e+00> : vector<2x32xf32>
    %250 = tpu.matmul %232, %12, %cst_113 {dimension_numbers = #tpu.dot_dimension_numbers<[1], [0], [0], [1], [0, 0, 1, 1], [], []>} : vector<2x32xf32>, vector<32x32xf32>, vector<2x32xf32> -> vector<2x32xf32>
    %251 = arith.addf %249, %250 : vector<2x32xf32>
    %252 = arith.addf %251, %6 : vector<2x32xf32>
    %253 = math.tanh %252 : vector<2x32xf32>
    %cst_114 = arith.constant dense<0.000000e+00> : vector<2x128xf32>
    %254 = tpu.matmul %253, %13, %cst_114 {dimension_numbers = #tpu.dot_dimension_numbers<[1], [0], [0], [1], [0, 0, 1, 1], [], []>} : vector<2x32xf32>, vector<32x128xf32>, vector<2x128xf32> -> vector<2x128xf32>
    %255 = vector.broadcast %14 : vector<1x128xf32> to vector<2x128xf32>
    %256 = arith.addf %254, %255 : vector<2x128xf32>
    %cst_115 = arith.constant dense<0xFF800000> : vector<2xf32>
    %257 = vector.multi_reduction <maximumf>, %256, %cst_115 [1] : vector<2x128xf32> to vector<2xf32>
    %258 = vector.shape_cast %257 : vector<2xf32> to vector<2x1xf32>
    %259 = vector.broadcast %258 : vector<2x1xf32> to vector<2x128xf32>
    %260 = arith.subf %256, %259 : vector<2x128xf32>
    %261 = math.exp %260 : vector<2x128xf32>
    %cst_116 = arith.constant dense<0.000000e+00> : vector<2xf32>
    %262 = vector.multi_reduction <add>, %261, %cst_116 [1] : vector<2x128xf32> to vector<2xf32>
    %263 = vector.shape_cast %262 : vector<2xf32> to vector<2x1xf32>
    %264 = tpu.reciprocal %263 {approx = true} : vector<2x1xf32> -> vector<2x1xf32>
    %265 = vector.broadcast %264 : vector<2x1xf32> to vector<2x128xf32>
    %266 = arith.mulf %261, %265 : vector<2x128xf32>
    %267 = vector.broadcast %15 : vector<1x32xf32> to vector<2x32xf32>
    %268 = arith.mulf %253, %267 : vector<2x32xf32>
    %cst_117 = arith.constant dense<0.000000e+00> : vector<2xf32>
    %269 = vector.multi_reduction <add>, %268, %cst_117 [1] : vector<2x32xf32> to vector<2xf32>
    %270 = vector.shape_cast %269 : vector<2xf32> to vector<2x1xf32>
    %271 = vector.broadcast %16 : f32 to vector<2x1xf32>
    %272 = arith.addf %270, %271 : vector<2x1xf32>
    %cst_118 = arith.constant 5.000000e-01 : f32
    %273 = vector.broadcast %cst_118 : f32 to vector<2x1xf32>
    %274 = arith.mulf %273, %272 : vector<2x1xf32>
    %275 = math.tanh %274 : vector<2x1xf32>
    %cst_119 = arith.constant 1.000000e+00 : f32
    %276 = vector.broadcast %cst_119 : f32 to vector<2x1xf32>
    %277 = arith.addf %275, %276 : vector<2x1xf32>
    %cst_120 = arith.constant 5.000000e-01 : f32
    %278 = vector.broadcast %cst_120 : f32 to vector<2x1xf32>
    %279 = arith.mulf %278, %277 : vector<2x1xf32>
    %cst_121 = arith.constant 1.000000e+00 : f32
    %280 = vector.broadcast %cst_121 : f32 to vector<2x1xf32>
    %281 = arith.subf %280, %279 : vector<2x1xf32>
    %282 = vector.shape_cast %281 : vector<2x1xf32> to vector<2x1x1xf32>
    %283 = vector.broadcast %282 : vector<2x1x1xf32> to vector<2x1x128xf32>
    %284 = arith.mulf %283, %246 : vector<2x1x128xf32>
    "tpu.trace_start"() <{level = 10 : i32, message = "bqs,bsv->bqv"}> : () -> ()
    %cst_122 = arith.constant dense<0.000000e+00> : vector<2x1x128xf32>
    %285 = tpu.matmul %284, %5, %cst_122 {dimension_numbers = #tpu.dot_dimension_numbers<[2], [1], [1], [2], [0, 0, 0, 1, 1, 2], [0], [0]>} : vector<2x1x128xf32>, vector<2x128x128xf32>, vector<2x1x128xf32> -> vector<2x1x128xf32>
    "tpu.trace_stop"() : () -> ()
    %286 = vector.shape_cast %285 : vector<2x1x128xf32> to vector<2x128xf32>
    %287 = vector.broadcast %279 : vector<2x1xf32> to vector<2x128xf32>
    %288 = arith.mulf %287, %266 : vector<2x128xf32>
    %289 = arith.addf %288, %286 : vector<2x128xf32>
    %c1_123 = arith.constant 1 : index
    %c0_124 = arith.constant 0 : index
    %c0_125 = arith.constant 0 : index
    %290 = vector.load %arg17[%c1_123, %c0_124, %c0_125] : memref<4x2x128xf32, #tpu.memory_space<vmem>>, vector<1x2x128xf32>
    %291 = vector.shape_cast %290 : vector<1x2x128xf32> to vector<2x128xf32>
    %292 = vector.shape_cast %289 : vector<2x128xf32> to vector<1x2x128xf32>
    tpu.vector_store %arg17[%c1_123, %c0_124, %c0_125], %292 {strides = array<i32>} : memref<4x2x128xf32, #tpu.memory_space<vmem>>, vector<1x2x128xf32>,
    %293 = vector.shape_cast %246 : vector<2x1x128xf32> to vector<2x128xf32>
    %c1_126 = arith.constant 1 : index
    %c0_127 = arith.constant 0 : index
    %c0_128 = arith.constant 0 : index
    %294 = vector.load %arg18[%c1_126, %c0_127, %c0_128] : memref<4x2x128xf32, #tpu.memory_space<vmem>>, vector<1x2x128xf32>
    %295 = vector.shape_cast %294 : vector<1x2x128xf32> to vector<2x128xf32>
    %296 = vector.shape_cast %293 : vector<2x128xf32> to vector<1x2x128xf32>
    tpu.vector_store %arg18[%c1_126, %c0_127, %c0_128], %296 {strides = array<i32>} : memref<4x2x128xf32, #tpu.memory_space<vmem>>, vector<1x2x128xf32>,
    %c2 = arith.constant 2 : index
    %c0_129 = arith.constant 0 : index
    %c0_130 = arith.constant 0 : index
    %297 = vector.load %arg2[%c2, %c0_129, %c0_130] : memref<4x2x16xf32, #tpu.memory_space<vmem>>, vector<1x2x16xf32>
    %298 = vector.shape_cast %297 : vector<1x2x16xf32> to vector<2x16xf32>
    %299 = tpu.concatenate %298, %197 in 1 : vector<2x16xf32>, vector<2x32xf32> -> vector<2x48xf32>
    %cst_131 = arith.constant dense<0.000000e+00> : vector<2x128xf32>
    %300 = tpu.matmul %299, %7, %cst_131 {dimension_numbers = #tpu.dot_dimension_numbers<[1], [0], [0], [1], [0, 0, 1, 1], [], []>} : vector<2x48xf32>, vector<48x128xf32>, vector<2x128xf32> -> vector<2x128xf32>
    %301 = vector.broadcast %8 : vector<1x128xf32> to vector<2x128xf32>
    %302 = arith.addf %300, %301 : vector<2x128xf32>
    %303 = vector.extract_strided_slice %302 {offsets = [0, 0], sizes = [2, 32], strides = [1, 1]} : vector<2x128xf32> to vector<2x32xf32>
    %cst_132 = arith.constant 5.000000e-01 : f32
    %304 = vector.broadcast %cst_132 : f32 to vector<2x32xf32>
    %305 = arith.mulf %304, %303 : vector<2x32xf32>
    %306 = math.tanh %305 : vector<2x32xf32>
    %cst_133 = arith.constant 1.000000e+00 : f32
    %307 = vector.broadcast %cst_133 : f32 to vector<2x32xf32>
    %308 = arith.addf %306, %307 : vector<2x32xf32>
    %cst_134 = arith.constant 5.000000e-01 : f32
    %309 = vector.broadcast %cst_134 : f32 to vector<2x32xf32>
    %310 = arith.mulf %309, %308 : vector<2x32xf32>
    %311 = vector.extract_strided_slice %302 {offsets = [0, 32], sizes = [2, 32], strides = [1, 1]} : vector<2x128xf32> to vector<2x32xf32>
    %cst_135 = arith.constant 5.000000e-01 : f32
    %312 = vector.broadcast %cst_135 : f32 to vector<2x32xf32>
    %313 = arith.mulf %312, %311 : vector<2x32xf32>
    %314 = math.tanh %313 : vector<2x32xf32>
    %cst_136 = arith.constant 1.000000e+00 : f32
    %315 = vector.broadcast %cst_136 : f32 to vector<2x32xf32>
    %316 = arith.addf %314, %315 : vector<2x32xf32>
    %cst_137 = arith.constant 5.000000e-01 : f32
    %317 = vector.broadcast %cst_137 : f32 to vector<2x32xf32>
    %318 = arith.mulf %317, %316 : vector<2x32xf32>
    %319 = vector.extract_strided_slice %302 {offsets = [0, 64], sizes = [2, 32], strides = [1, 1]} : vector<2x128xf32> to vector<2x32xf32>
    %320 = math.tanh %319 : vector<2x32xf32>
    %321 = vector.extract_strided_slice %302 {offsets = [0, 96], sizes = [2, 32], strides = [1, 1]} : vector<2x128xf32> to vector<2x32xf32>
    %cst_138 = arith.constant 5.000000e-01 : f32
    %322 = vector.broadcast %cst_138 : f32 to vector<2x32xf32>
    %323 = arith.mulf %322, %321 : vector<2x32xf32>
    %324 = math.tanh %323 : vector<2x32xf32>
    %cst_139 = arith.constant 1.000000e+00 : f32
    %325 = vector.broadcast %cst_139 : f32 to vector<2x32xf32>
    %326 = arith.addf %324, %325 : vector<2x32xf32>
    %cst_140 = arith.constant 5.000000e-01 : f32
    %327 = vector.broadcast %cst_140 : f32 to vector<2x32xf32>
    %328 = arith.mulf %327, %326 : vector<2x32xf32>
    %329 = arith.mulf %318, %195 : vector<2x32xf32>
    %330 = arith.mulf %310, %320 : vector<2x32xf32>
    %331 = arith.addf %329, %330 : vector<2x32xf32>
    %332 = math.tanh %331 : vector<2x32xf32>
    %333 = arith.mulf %328, %332 : vector<2x32xf32>
    %334 = tpu.concatenate %333, %232 in 1 : vector<2x32xf32>, vector<2x32xf32> -> vector<2x64xf32>
    %cst_141 = arith.constant dense<0.000000e+00> : vector<2x128xf32>
    %335 = tpu.matmul %334, %9, %cst_141 {dimension_numbers = #tpu.dot_dimension_numbers<[1], [0], [0], [1], [0, 0, 1, 1], [], []>} : vector<2x64xf32>, vector<64x128xf32>, vector<2x128xf32> -> vector<2x128xf32>
    %336 = vector.broadcast %10 : vector<1x128xf32> to vector<2x128xf32>
    %337 = arith.addf %335, %336 : vector<2x128xf32>
    %338 = vector.extract_strided_slice %337 {offsets = [0, 0], sizes = [2, 32], strides = [1, 1]} : vector<2x128xf32> to vector<2x32xf32>
    %cst_142 = arith.constant 5.000000e-01 : f32
    %339 = vector.broadcast %cst_142 : f32 to vector<2x32xf32>
    %340 = arith.mulf %339, %338 : vector<2x32xf32>
    %341 = math.tanh %340 : vector<2x32xf32>
    %cst_143 = arith.constant 1.000000e+00 : f32
    %342 = vector.broadcast %cst_143 : f32 to vector<2x32xf32>
    %343 = arith.addf %341, %342 : vector<2x32xf32>
    %cst_144 = arith.constant 5.000000e-01 : f32
    %344 = vector.broadcast %cst_144 : f32 to vector<2x32xf32>
    %345 = arith.mulf %344, %343 : vector<2x32xf32>
    %346 = vector.extract_strided_slice %337 {offsets = [0, 32], sizes = [2, 32], strides = [1, 1]} : vector<2x128xf32> to vector<2x32xf32>
    %cst_145 = arith.constant 5.000000e-01 : f32
    %347 = vector.broadcast %cst_145 : f32 to vector<2x32xf32>
    %348 = arith.mulf %347, %346 : vector<2x32xf32>
    %349 = math.tanh %348 : vector<2x32xf32>
    %cst_146 = arith.constant 1.000000e+00 : f32
    %350 = vector.broadcast %cst_146 : f32 to vector<2x32xf32>
    %351 = arith.addf %349, %350 : vector<2x32xf32>
    %cst_147 = arith.constant 5.000000e-01 : f32
    %352 = vector.broadcast %cst_147 : f32 to vector<2x32xf32>
    %353 = arith.mulf %352, %351 : vector<2x32xf32>
    %354 = vector.extract_strided_slice %337 {offsets = [0, 64], sizes = [2, 32], strides = [1, 1]} : vector<2x128xf32> to vector<2x32xf32>
    %355 = math.tanh %354 : vector<2x32xf32>
    %356 = vector.extract_strided_slice %337 {offsets = [0, 96], sizes = [2, 32], strides = [1, 1]} : vector<2x128xf32> to vector<2x32xf32>
    %cst_148 = arith.constant 5.000000e-01 : f32
    %357 = vector.broadcast %cst_148 : f32 to vector<2x32xf32>
    %358 = arith.mulf %357, %356 : vector<2x32xf32>
    %359 = math.tanh %358 : vector<2x32xf32>
    %cst_149 = arith.constant 1.000000e+00 : f32
    %360 = vector.broadcast %cst_149 : f32 to vector<2x32xf32>
    %361 = arith.addf %359, %360 : vector<2x32xf32>
    %cst_150 = arith.constant 5.000000e-01 : f32
    %362 = vector.broadcast %cst_150 : f32 to vector<2x32xf32>
    %363 = arith.mulf %362, %361 : vector<2x32xf32>
    %364 = arith.mulf %353, %230 : vector<2x32xf32>
    %365 = arith.mulf %345, %355 : vector<2x32xf32>
    %366 = arith.addf %364, %365 : vector<2x32xf32>
    %367 = math.tanh %366 : vector<2x32xf32>
    %368 = arith.mulf %363, %367 : vector<2x32xf32>
    %369 = vector.shape_cast %368 : vector<2x32xf32> to vector<2x1x32xf32>
    "tpu.trace_start"() <{level = 10 : i32, message = "bqh,bsh->bqs"}> : () -> ()
    %cst_151 = arith.constant dense<0.000000e+00> : vector<2x1x128xf32>
    %370 = tpu.matmul %369, %3, %cst_151 {dimension_numbers = #tpu.dot_dimension_numbers<[2], [2], [1], [1], [0, 0, 0, 1, 1, 1], [0], [0]>} : vector<2x1x32xf32>, vector<2x128x32xf32>, vector<2x1x128xf32> -> vector<2x1x128xf32>
    "tpu.trace_stop"() : () -> ()
    %371 = vector.broadcast %4 : vector<1x1x128xf32> to vector<2x1x128xf32>
    %372 = arith.addf %370, %371 : vector<2x1x128xf32>
    %cst_152 = arith.constant dense<0xFF800000> : vector<2x1xf32>
    %373 = vector.multi_reduction <maximumf>, %372, %cst_152 [2] : vector<2x1x128xf32> to vector<2x1xf32>
    %374 = vector.shape_cast %373 : vector<2x1xf32> to vector<2x1x1xf32>
    %375 = vector.broadcast %374 : vector<2x1x1xf32> to vector<2x1x128xf32>
    %376 = arith.subf %372, %375 : vector<2x1x128xf32>
    %377 = math.exp %376 : vector<2x1x128xf32>
    %cst_153 = arith.constant dense<0.000000e+00> : vector<2x1xf32>
    %378 = vector.multi_reduction <add>, %377, %cst_153 [2] : vector<2x1x128xf32> to vector<2x1xf32>
    %379 = vector.shape_cast %378 : vector<2x1xf32> to vector<2x1x1xf32>
    %380 = tpu.reciprocal %379 {approx = true} : vector<2x1x1xf32> -> vector<2x1x1xf32>
    %381 = vector.broadcast %380 : vector<2x1x1xf32> to vector<2x1x128xf32>
    %382 = arith.mulf %377, %381 : vector<2x1x128xf32>
    "tpu.trace_start"() <{level = 10 : i32, message = "bqs,bsh->bqh"}> : () -> ()
    %cst_154 = arith.constant dense<0.000000e+00> : vector<2x1x32xf32>
    %383 = tpu.matmul %382, %3, %cst_154 {dimension_numbers = #tpu.dot_dimension_numbers<[2], [1], [1], [2], [0, 0, 0, 1, 1, 2], [0], [0]>} : vector<2x1x128xf32>, vector<2x128x32xf32>, vector<2x1x32xf32> -> vector<2x1x32xf32>
    "tpu.trace_stop"() : () -> ()
    %384 = vector.shape_cast %383 : vector<2x1x32xf32> to vector<2x32xf32>
    %cst_155 = arith.constant dense<0.000000e+00> : vector<2x32xf32>
    %385 = tpu.matmul %384, %11, %cst_155 {dimension_numbers = #tpu.dot_dimension_numbers<[1], [0], [0], [1], [0, 0, 1, 1], [], []>} : vector<2x32xf32>, vector<32x32xf32>, vector<2x32xf32> -> vector<2x32xf32>
    %cst_156 = arith.constant dense<0.000000e+00> : vector<2x32xf32>
    %386 = tpu.matmul %368, %12, %cst_156 {dimension_numbers = #tpu.dot_dimension_numbers<[1], [0], [0], [1], [0, 0, 1, 1], [], []>} : vector<2x32xf32>, vector<32x32xf32>, vector<2x32xf32> -> vector<2x32xf32>
    %387 = arith.addf %385, %386 : vector<2x32xf32>
    %388 = arith.addf %387, %6 : vector<2x32xf32>
    %389 = math.tanh %388 : vector<2x32xf32>
    %cst_157 = arith.constant dense<0.000000e+00> : vector<2x128xf32>
    %390 = tpu.matmul %389, %13, %cst_157 {dimension_numbers = #tpu.dot_dimension_numbers<[1], [0], [0], [1], [0, 0, 1, 1], [], []>} : vector<2x32xf32>, vector<32x128xf32>, vector<2x128xf32> -> vector<2x128xf32>
    %391 = vector.broadcast %14 : vector<1x128xf32> to vector<2x128xf32>
    %392 = arith.addf %390, %391 : vector<2x128xf32>
    %cst_158 = arith.constant dense<0xFF800000> : vector<2xf32>
    %393 = vector.multi_reduction <maximumf>, %392, %cst_158 [1] : vector<2x128xf32> to vector<2xf32>
    %394 = vector.shape_cast %393 : vector<2xf32> to vector<2x1xf32>
    %395 = vector.broadcast %394 : vector<2x1xf32> to vector<2x128xf32>
    %396 = arith.subf %392, %395 : vector<2x128xf32>
    %397 = math.exp %396 : vector<2x128xf32>
    %cst_159 = arith.constant dense<0.000000e+00> : vector<2xf32>
    %398 = vector.multi_reduction <add>, %397, %cst_159 [1] : vector<2x128xf32> to vector<2xf32>
    %399 = vector.shape_cast %398 : vector<2xf32> to vector<2x1xf32>
    %400 = tpu.reciprocal %399 {approx = true} : vector<2x1xf32> -> vector<2x1xf32>
    %401 = vector.broadcast %400 : vector<2x1xf32> to vector<2x128xf32>
    %402 = arith.mulf %397, %401 : vector<2x128xf32>
    %403 = vector.broadcast %15 : vector<1x32xf32> to vector<2x32xf32>
    %404 = arith.mulf %389, %403 : vector<2x32xf32>
    %cst_160 = arith.constant dense<0.000000e+00> : vector<2xf32>
    %405 = vector.multi_reduction <add>, %404, %cst_160 [1] : vector<2x32xf32> to vector<2xf32>
    %406 = vector.shape_cast %405 : vector<2xf32> to vector<2x1xf32>
    %407 = vector.broadcast %16 : f32 to vector<2x1xf32>
    %408 = arith.addf %406, %407 : vector<2x1xf32>
    %cst_161 = arith.constant 5.000000e-01 : f32
    %409 = vector.broadcast %cst_161 : f32 to vector<2x1xf32>
    %410 = arith.mulf %409, %408 : vector<2x1xf32>
    %411 = math.tanh %410 : vector<2x1xf32>
    %cst_162 = arith.constant 1.000000e+00 : f32
    %412 = vector.broadcast %cst_162 : f32 to vector<2x1xf32>
    %413 = arith.addf %411, %412 : vector<2x1xf32>
    %cst_163 = arith.constant 5.000000e-01 : f32
    %414 = vector.broadcast %cst_163 : f32 to vector<2x1xf32>
    %415 = arith.mulf %414, %413 : vector<2x1xf32>
    %cst_164 = arith.constant 1.000000e+00 : f32
    %416 = vector.broadcast %cst_164 : f32 to vector<2x1xf32>
    %417 = arith.subf %416, %415 : vector<2x1xf32>
    %418 = vector.shape_cast %417 : vector<2x1xf32> to vector<2x1x1xf32>
    %419 = vector.broadcast %418 : vector<2x1x1xf32> to vector<2x1x128xf32>
    %420 = arith.mulf %419, %382 : vector<2x1x128xf32>
    "tpu.trace_start"() <{level = 10 : i32, message = "bqs,bsv->bqv"}> : () -> ()
    %cst_165 = arith.constant dense<0.000000e+00> : vector<2x1x128xf32>
    %421 = tpu.matmul %420, %5, %cst_165 {dimension_numbers = #tpu.dot_dimension_numbers<[2], [1], [1], [2], [0, 0, 0, 1, 1, 2], [0], [0]>} : vector<2x1x128xf32>, vector<2x128x128xf32>, vector<2x1x128xf32> -> vector<2x1x128xf32>
    "tpu.trace_stop"() : () -> ()
    %422 = vector.shape_cast %421 : vector<2x1x128xf32> to vector<2x128xf32>
    %423 = vector.broadcast %415 : vector<2x1xf32> to vector<2x128xf32>
    %424 = arith.mulf %423, %402 : vector<2x128xf32>
    %425 = arith.addf %424, %422 : vector<2x128xf32>
    %c2_166 = arith.constant 2 : index
    %c0_167 = arith.constant 0 : index
    %c0_168 = arith.constant 0 : index
    %426 = vector.load %arg17[%c2_166, %c0_167, %c0_168] : memref<4x2x128xf32, #tpu.memory_space<vmem>>, vector<1x2x128xf32>
    %427 = vector.shape_cast %426 : vector<1x2x128xf32> to vector<2x128xf32>
    %428 = vector.shape_cast %425 : vector<2x128xf32> to vector<1x2x128xf32>
    tpu.vector_store %arg17[%c2_166, %c0_167, %c0_168], %428 {strides = array<i32>} : memref<4x2x128xf32, #tpu.memory_space<vmem>>, vector<1x2x128xf32>,
    %429 = vector.shape_cast %382 : vector<2x1x128xf32> to vector<2x128xf32>
    %c2_169 = arith.constant 2 : index
    %c0_170 = arith.constant 0 : index
    %c0_171 = arith.constant 0 : index
    %430 = vector.load %arg18[%c2_169, %c0_170, %c0_171] : memref<4x2x128xf32, #tpu.memory_space<vmem>>, vector<1x2x128xf32>
    %431 = vector.shape_cast %430 : vector<1x2x128xf32> to vector<2x128xf32>
    %432 = vector.shape_cast %429 : vector<2x128xf32> to vector<1x2x128xf32>
    tpu.vector_store %arg18[%c2_169, %c0_170, %c0_171], %432 {strides = array<i32>} : memref<4x2x128xf32, #tpu.memory_space<vmem>>, vector<1x2x128xf32>,
    %c3 = arith.constant 3 : index
    %c0_172 = arith.constant 0 : index
    %c0_173 = arith.constant 0 : index
    %433 = vector.load %arg2[%c3, %c0_172, %c0_173] : memref<4x2x16xf32, #tpu.memory_space<vmem>>, vector<1x2x16xf32>
    %434 = vector.shape_cast %433 : vector<1x2x16xf32> to vector<2x16xf32>
    %435 = tpu.concatenate %434, %333 in 1 : vector<2x16xf32>, vector<2x32xf32> -> vector<2x48xf32>
    %cst_174 = arith.constant dense<0.000000e+00> : vector<2x128xf32>
    %436 = tpu.matmul %435, %7, %cst_174 {dimension_numbers = #tpu.dot_dimension_numbers<[1], [0], [0], [1], [0, 0, 1, 1], [], []>} : vector<2x48xf32>, vector<48x128xf32>, vector<2x128xf32> -> vector<2x128xf32>
    %437 = vector.broadcast %8 : vector<1x128xf32> to vector<2x128xf32>
    %438 = arith.addf %436, %437 : vector<2x128xf32>
    %439 = vector.extract_strided_slice %438 {offsets = [0, 0], sizes = [2, 32], strides = [1, 1]} : vector<2x128xf32> to vector<2x32xf32>
    %cst_175 = arith.constant 5.000000e-01 : f32
    %440 = vector.broadcast %cst_175 : f32 to vector<2x32xf32>
    %441 = arith.mulf %440, %439 : vector<2x32xf32>
    %442 = math.tanh %441 : vector<2x32xf32>
    %cst_176 = arith.constant 1.000000e+00 : f32
    %443 = vector.broadcast %cst_176 : f32 to vector<2x32xf32>
    %444 = arith.addf %442, %443 : vector<2x32xf32>
    %cst_177 = arith.constant 5.000000e-01 : f32
    %445 = vector.broadcast %cst_177 : f32 to vector<2x32xf32>
    %446 = arith.mulf %445, %444 : vector<2x32xf32>
    %447 = vector.extract_strided_slice %438 {offsets = [0, 32], sizes = [2, 32], strides = [1, 1]} : vector<2x128xf32> to vector<2x32xf32>
    %cst_178 = arith.constant 5.000000e-01 : f32
    %448 = vector.broadcast %cst_178 : f32 to vector<2x32xf32>
    %449 = arith.mulf %448, %447 : vector<2x32xf32>
    %450 = math.tanh %449 : vector<2x32xf32>
    %cst_179 = arith.constant 1.000000e+00 : f32
    %451 = vector.broadcast %cst_179 : f32 to vector<2x32xf32>
    %452 = arith.addf %450, %451 : vector<2x32xf32>
    %cst_180 = arith.constant 5.000000e-01 : f32
    %453 = vector.broadcast %cst_180 : f32 to vector<2x32xf32>
    %454 = arith.mulf %453, %452 : vector<2x32xf32>
    %455 = vector.extract_strided_slice %438 {offsets = [0, 64], sizes = [2, 32], strides = [1, 1]} : vector<2x128xf32> to vector<2x32xf32>
    %456 = math.tanh %455 : vector<2x32xf32>
    %457 = vector.extract_strided_slice %438 {offsets = [0, 96], sizes = [2, 32], strides = [1, 1]} : vector<2x128xf32> to vector<2x32xf32>
    %cst_181 = arith.constant 5.000000e-01 : f32
    %458 = vector.broadcast %cst_181 : f32 to vector<2x32xf32>
    %459 = arith.mulf %458, %457 : vector<2x32xf32>
    %460 = math.tanh %459 : vector<2x32xf32>
    %cst_182 = arith.constant 1.000000e+00 : f32
    %461 = vector.broadcast %cst_182 : f32 to vector<2x32xf32>
    %462 = arith.addf %460, %461 : vector<2x32xf32>
    %cst_183 = arith.constant 5.000000e-01 : f32
    %463 = vector.broadcast %cst_183 : f32 to vector<2x32xf32>
    %464 = arith.mulf %463, %462 : vector<2x32xf32>
    %465 = arith.mulf %454, %331 : vector<2x32xf32>
    %466 = arith.mulf %446, %456 : vector<2x32xf32>
    %467 = arith.addf %465, %466 : vector<2x32xf32>
    %468 = math.tanh %467 : vector<2x32xf32>
    %469 = arith.mulf %464, %468 : vector<2x32xf32>
    %470 = tpu.concatenate %469, %368 in 1 : vector<2x32xf32>, vector<2x32xf32> -> vector<2x64xf32>
    %cst_184 = arith.constant dense<0.000000e+00> : vector<2x128xf32>
    %471 = tpu.matmul %470, %9, %cst_184 {dimension_numbers = #tpu.dot_dimension_numbers<[1], [0], [0], [1], [0, 0, 1, 1], [], []>} : vector<2x64xf32>, vector<64x128xf32>, vector<2x128xf32> -> vector<2x128xf32>
    %472 = vector.broadcast %10 : vector<1x128xf32> to vector<2x128xf32>
    %473 = arith.addf %471, %472 : vector<2x128xf32>
    %474 = vector.extract_strided_slice %473 {offsets = [0, 0], sizes = [2, 32], strides = [1, 1]} : vector<2x128xf32> to vector<2x32xf32>
    %cst_185 = arith.constant 5.000000e-01 : f32
    %475 = vector.broadcast %cst_185 : f32 to vector<2x32xf32>
    %476 = arith.mulf %475, %474 : vector<2x32xf32>
    %477 = math.tanh %476 : vector<2x32xf32>
    %cst_186 = arith.constant 1.000000e+00 : f32
    %478 = vector.broadcast %cst_186 : f32 to vector<2x32xf32>
    %479 = arith.addf %477, %478 : vector<2x32xf32>
    %cst_187 = arith.constant 5.000000e-01 : f32
    %480 = vector.broadcast %cst_187 : f32 to vector<2x32xf32>
    %481 = arith.mulf %480, %479 : vector<2x32xf32>
    %482 = vector.extract_strided_slice %473 {offsets = [0, 32], sizes = [2, 32], strides = [1, 1]} : vector<2x128xf32> to vector<2x32xf32>
    %cst_188 = arith.constant 5.000000e-01 : f32
    %483 = vector.broadcast %cst_188 : f32 to vector<2x32xf32>
    %484 = arith.mulf %483, %482 : vector<2x32xf32>
    %485 = math.tanh %484 : vector<2x32xf32>
    %cst_189 = arith.constant 1.000000e+00 : f32
    %486 = vector.broadcast %cst_189 : f32 to vector<2x32xf32>
    %487 = arith.addf %485, %486 : vector<2x32xf32>
    %cst_190 = arith.constant 5.000000e-01 : f32
    %488 = vector.broadcast %cst_190 : f32 to vector<2x32xf32>
    %489 = arith.mulf %488, %487 : vector<2x32xf32>
    %490 = vector.extract_strided_slice %473 {offsets = [0, 64], sizes = [2, 32], strides = [1, 1]} : vector<2x128xf32> to vector<2x32xf32>
    %491 = math.tanh %490 : vector<2x32xf32>
    %492 = vector.extract_strided_slice %473 {offsets = [0, 96], sizes = [2, 32], strides = [1, 1]} : vector<2x128xf32> to vector<2x32xf32>
    %cst_191 = arith.constant 5.000000e-01 : f32
    %493 = vector.broadcast %cst_191 : f32 to vector<2x32xf32>
    %494 = arith.mulf %493, %492 : vector<2x32xf32>
    %495 = math.tanh %494 : vector<2x32xf32>
    %cst_192 = arith.constant 1.000000e+00 : f32
    %496 = vector.broadcast %cst_192 : f32 to vector<2x32xf32>
    %497 = arith.addf %495, %496 : vector<2x32xf32>
    %cst_193 = arith.constant 5.000000e-01 : f32
    %498 = vector.broadcast %cst_193 : f32 to vector<2x32xf32>
    %499 = arith.mulf %498, %497 : vector<2x32xf32>
    %500 = arith.mulf %489, %366 : vector<2x32xf32>
    %501 = arith.mulf %481, %491 : vector<2x32xf32>
    %502 = arith.addf %500, %501 : vector<2x32xf32>
    %503 = math.tanh %502 : vector<2x32xf32>
    %504 = arith.mulf %499, %503 : vector<2x32xf32>
    %505 = vector.shape_cast %504 : vector<2x32xf32> to vector<2x1x32xf32>
    "tpu.trace_start"() <{level = 10 : i32, message = "bqh,bsh->bqs"}> : () -> ()
    %cst_194 = arith.constant dense<0.000000e+00> : vector<2x1x128xf32>
    %506 = tpu.matmul %505, %3, %cst_194 {dimension_numbers = #tpu.dot_dimension_numbers<[2], [2], [1], [1], [0, 0, 0, 1, 1, 1], [0], [0]>} : vector<2x1x32xf32>, vector<2x128x32xf32>, vector<2x1x128xf32> -> vector<2x1x128xf32>
    "tpu.trace_stop"() : () -> ()
    %507 = vector.broadcast %4 : vector<1x1x128xf32> to vector<2x1x128xf32>
    %508 = arith.addf %506, %507 : vector<2x1x128xf32>
    %cst_195 = arith.constant dense<0xFF800000> : vector<2x1xf32>
    %509 = vector.multi_reduction <maximumf>, %508, %cst_195 [2] : vector<2x1x128xf32> to vector<2x1xf32>
    %510 = vector.shape_cast %509 : vector<2x1xf32> to vector<2x1x1xf32>
    %511 = vector.broadcast %510 : vector<2x1x1xf32> to vector<2x1x128xf32>
    %512 = arith.subf %508, %511 : vector<2x1x128xf32>
    %513 = math.exp %512 : vector<2x1x128xf32>
    %cst_196 = arith.constant dense<0.000000e+00> : vector<2x1xf32>
    %514 = vector.multi_reduction <add>, %513, %cst_196 [2] : vector<2x1x128xf32> to vector<2x1xf32>
    %515 = vector.shape_cast %514 : vector<2x1xf32> to vector<2x1x1xf32>
    %516 = tpu.reciprocal %515 {approx = true} : vector<2x1x1xf32> -> vector<2x1x1xf32>
    %517 = vector.broadcast %516 : vector<2x1x1xf32> to vector<2x1x128xf32>
    %518 = arith.mulf %513, %517 : vector<2x1x128xf32>
    "tpu.trace_start"() <{level = 10 : i32, message = "bqs,bsh->bqh"}> : () -> ()
    %cst_197 = arith.constant dense<0.000000e+00> : vector<2x1x32xf32>
    %519 = tpu.matmul %518, %3, %cst_197 {dimension_numbers = #tpu.dot_dimension_numbers<[2], [1], [1], [2], [0, 0, 0, 1, 1, 2], [0], [0]>} : vector<2x1x128xf32>, vector<2x128x32xf32>, vector<2x1x32xf32> -> vector<2x1x32xf32>
    "tpu.trace_stop"() : () -> ()
    %520 = vector.shape_cast %519 : vector<2x1x32xf32> to vector<2x32xf32>
    %cst_198 = arith.constant dense<0.000000e+00> : vector<2x32xf32>
    %521 = tpu.matmul %520, %11, %cst_198 {dimension_numbers = #tpu.dot_dimension_numbers<[1], [0], [0], [1], [0, 0, 1, 1], [], []>} : vector<2x32xf32>, vector<32x32xf32>, vector<2x32xf32> -> vector<2x32xf32>
    %cst_199 = arith.constant dense<0.000000e+00> : vector<2x32xf32>
    %522 = tpu.matmul %504, %12, %cst_199 {dimension_numbers = #tpu.dot_dimension_numbers<[1], [0], [0], [1], [0, 0, 1, 1], [], []>} : vector<2x32xf32>, vector<32x32xf32>, vector<2x32xf32> -> vector<2x32xf32>
    %523 = arith.addf %521, %522 : vector<2x32xf32>
    %524 = arith.addf %523, %6 : vector<2x32xf32>
    %525 = math.tanh %524 : vector<2x32xf32>
    %cst_200 = arith.constant dense<0.000000e+00> : vector<2x128xf32>
    %526 = tpu.matmul %525, %13, %cst_200 {dimension_numbers = #tpu.dot_dimension_numbers<[1], [0], [0], [1], [0, 0, 1, 1], [], []>} : vector<2x32xf32>, vector<32x128xf32>, vector<2x128xf32> -> vector<2x128xf32>
    %527 = vector.broadcast %14 : vector<1x128xf32> to vector<2x128xf32>
    %528 = arith.addf %526, %527 : vector<2x128xf32>
    %cst_201 = arith.constant dense<0xFF800000> : vector<2xf32>
    %529 = vector.multi_reduction <maximumf>, %528, %cst_201 [1] : vector<2x128xf32> to vector<2xf32>
    %530 = vector.shape_cast %529 : vector<2xf32> to vector<2x1xf32>
    %531 = vector.broadcast %530 : vector<2x1xf32> to vector<2x128xf32>
    %532 = arith.subf %528, %531 : vector<2x128xf32>
    %533 = math.exp %532 : vector<2x128xf32>
    %cst_202 = arith.constant dense<0.000000e+00> : vector<2xf32>
    %534 = vector.multi_reduction <add>, %533, %cst_202 [1] : vector<2x128xf32> to vector<2xf32>
    %535 = vector.shape_cast %534 : vector<2xf32> to vector<2x1xf32>
    %536 = tpu.reciprocal %535 {approx = true} : vector<2x1xf32> -> vector<2x1xf32>
    %537 = vector.broadcast %536 : vector<2x1xf32> to vector<2x128xf32>
    %538 = arith.mulf %533, %537 : vector<2x128xf32>
    %539 = vector.broadcast %15 : vector<1x32xf32> to vector<2x32xf32>
    %540 = arith.mulf %525, %539 : vector<2x32xf32>
    %cst_203 = arith.constant dense<0.000000e+00> : vector<2xf32>
    %541 = vector.multi_reduction <add>, %540, %cst_203 [1] : vector<2x32xf32> to vector<2xf32>
    %542 = vector.shape_cast %541 : vector<2xf32> to vector<2x1xf32>
    %543 = vector.broadcast %16 : f32 to vector<2x1xf32>
    %544 = arith.addf %542, %543 : vector<2x1xf32>
    %cst_204 = arith.constant 5.000000e-01 : f32
    %545 = vector.broadcast %cst_204 : f32 to vector<2x1xf32>
    %546 = arith.mulf %545, %544 : vector<2x1xf32>
    %547 = math.tanh %546 : vector<2x1xf32>
    %cst_205 = arith.constant 1.000000e+00 : f32
    %548 = vector.broadcast %cst_205 : f32 to vector<2x1xf32>
    %549 = arith.addf %547, %548 : vector<2x1xf32>
    %cst_206 = arith.constant 5.000000e-01 : f32
    %550 = vector.broadcast %cst_206 : f32 to vector<2x1xf32>
    %551 = arith.mulf %550, %549 : vector<2x1xf32>
    %cst_207 = arith.constant 1.000000e+00 : f32
    %552 = vector.broadcast %cst_207 : f32 to vector<2x1xf32>
    %553 = arith.subf %552, %551 : vector<2x1xf32>
    %554 = vector.shape_cast %553 : vector<2x1xf32> to vector<2x1x1xf32>
    %555 = vector.broadcast %554 : vector<2x1x1xf32> to vector<2x1x128xf32>
    %556 = arith.mulf %555, %518 : vector<2x1x128xf32>
    "tpu.trace_start"() <{level = 10 : i32, message = "bqs,bsv->bqv"}> : () -> ()
    %cst_208 = arith.constant dense<0.000000e+00> : vector<2x1x128xf32>
    %557 = tpu.matmul %556, %5, %cst_208 {dimension_numbers = #tpu.dot_dimension_numbers<[2], [1], [1], [2], [0, 0, 0, 1, 1, 2], [0], [0]>} : vector<2x1x128xf32>, vector<2x128x128xf32>, vector<2x1x128xf32> -> vector<2x1x128xf32>
    "tpu.trace_stop"() : () -> ()
    %558 = vector.shape_cast %557 : vector<2x1x128xf32> to vector<2x128xf32>
    %559 = vector.broadcast %551 : vector<2x1xf32> to vector<2x128xf32>
    %560 = arith.mulf %559, %538 : vector<2x128xf32>
    %561 = arith.addf %560, %558 : vector<2x128xf32>
    %c3_209 = arith.constant 3 : index
    %c0_210 = arith.constant 0 : index
    %c0_211 = arith.constant 0 : index
    %562 = vector.load %arg17[%c3_209, %c0_210, %c0_211] : memref<4x2x128xf32, #tpu.memory_space<vmem>>, vector<1x2x128xf32>
    %563 = vector.shape_cast %562 : vector<1x2x128xf32> to vector<2x128xf32>
    %564 = vector.shape_cast %561 : vector<2x128xf32> to vector<1x2x128xf32>
    tpu.vector_store %arg17[%c3_209, %c0_210, %c0_211], %564 {strides = array<i32>} : memref<4x2x128xf32, #tpu.memory_space<vmem>>, vector<1x2x128xf32>,
    %565 = vector.shape_cast %518 : vector<2x1x128xf32> to vector<2x128xf32>
    %c3_212 = arith.constant 3 : index
    %c0_213 = arith.constant 0 : index
    %c0_214 = arith.constant 0 : index
    %566 = vector.load %arg18[%c3_212, %c0_213, %c0_214] : memref<4x2x128xf32, #tpu.memory_space<vmem>>, vector<1x2x128xf32>
    %567 = vector.shape_cast %566 : vector<1x2x128xf32> to vector<2x128xf32>
    %568 = vector.shape_cast %565 : vector<2x128xf32> to vector<1x2x128xf32>
    tpu.vector_store %arg18[%c3_212, %c0_213, %c0_214], %568 {strides = array<i32>} : memref<4x2x128xf32, #tpu.memory_space<vmem>>, vector<1x2x128xf32>,
    %c0_215 = arith.constant 0 : index
    %c0_216 = arith.constant 0 : index
    %c0_217 = arith.constant 0 : index
    %569 = vector.load %arg19[%c0_215, %c0_216, %c0_217] : memref<2x2x32xf32, #tpu.memory_space<vmem>>, vector<1x2x32xf32>
    %570 = vector.shape_cast %569 : vector<1x2x32xf32> to vector<2x32xf32>
    %571 = vector.shape_cast %469 : vector<2x32xf32> to vector<1x2x32xf32>
    tpu.vector_store %arg19[%c0_215, %c0_216, %c0_217], %571 {strides = array<i32>} : memref<2x2x32xf32, #tpu.memory_space<vmem>>, vector<1x2x32xf32>,
    %c0_218 = arith.constant 0 : index
    %c0_219 = arith.constant 0 : index
    %c0_220 = arith.constant 0 : index
    %572 = vector.load %arg20[%c0_218, %c0_219, %c0_220] : memref<2x2x32xf32, #tpu.memory_space<vmem>>, vector<1x2x32xf32>
    %573 = vector.shape_cast %572 : vector<1x2x32xf32> to vector<2x32xf32>
    %574 = vector.shape_cast %467 : vector<2x32xf32> to vector<1x2x32xf32>
    tpu.vector_store %arg20[%c0_218, %c0_219, %c0_220], %574 {strides = array<i32>} : memref<2x2x32xf32, #tpu.memory_space<vmem>>, vector<1x2x32xf32>,
    %c1_221 = arith.constant 1 : index
    %c0_222 = arith.constant 0 : index
    %c0_223 = arith.constant 0 : index
    %575 = vector.load %arg19[%c1_221, %c0_222, %c0_223] : memref<2x2x32xf32, #tpu.memory_space<vmem>>, vector<1x2x32xf32>
    %576 = vector.shape_cast %575 : vector<1x2x32xf32> to vector<2x32xf32>
    %577 = vector.shape_cast %504 : vector<2x32xf32> to vector<1x2x32xf32>
    tpu.vector_store %arg19[%c1_221, %c0_222, %c0_223], %577 {strides = array<i32>} : memref<2x2x32xf32, #tpu.memory_space<vmem>>, vector<1x2x32xf32>,
    %c1_224 = arith.constant 1 : index
    %c0_225 = arith.constant 0 : index
    %c0_226 = arith.constant 0 : index
    %578 = vector.load %arg20[%c1_224, %c0_225, %c0_226] : memref<2x2x32xf32, #tpu.memory_space<vmem>>, vector<1x2x32xf32>
    %579 = vector.shape_cast %578 : vector<1x2x32xf32> to vector<2x32xf32>
    %580 = vector.shape_cast %502 : vector<2x32xf32> to vector<1x2x32xf32>
    tpu.vector_store %arg20[%c1_224, %c0_225, %c0_226], %580 {strides = array<i32>} : memref<2x2x32xf32, #tpu.memory_space<vmem>>, vector<1x2x32xf32>,
    return
  }
  func.func @transform_0(%arg0: i32, %arg1: i32) -> (i32, i32, i32) {
    %c0_i32 = arith.constant 0 : i32
    %c0_i32_0 = arith.constant 0 : i32
    return %arg1, %arg0, %c0_i32 : i32, i32, i32
  }
  func.func @transform_1(%arg0: i32, %arg1: i32) -> (i32, i32, i32) {
    %c0_i32 = arith.constant 0 : i32
    %c0_i32_0 = arith.constant 0 : i32
    %c0_i32_1 = arith.constant 0 : i32
    return %arg0, %c0_i32, %c0_i32_0 : i32, i32, i32
  }
  func.func @transform_2(%arg0: i32, %arg1: i32) -> (i32, i32, i32) {
    %c0_i32 = arith.constant 0 : i32
    %c0_i32_0 = arith.constant 0 : i32
    %c0_i32_1 = arith.constant 0 : i32
    %c0_i32_2 = arith.constant 0 : i32
    return %c0_i32, %c0_i32_0, %c0_i32_1 : i32, i32, i32
  }
  func.func @transform_3(%arg0: i32, %arg1: i32) -> (i32, i32, i32) {
    %c0_i32 = arith.constant 0 : i32
    %c0_i32_0 = arith.constant 0 : i32
    %c0_i32_1 = arith.constant 0 : i32
    return %arg0, %c0_i32, %c0_i32_0 : i32, i32, i32
  }
  func.func @transform_4(%arg0: i32, %arg1: i32) -> (i32, i32) {
    %c0_i32 = arith.constant 0 : i32
    %c0_i32_0 = arith.constant 0 : i32
    return %arg0, %c0_i32 : i32, i32
  }
  func.func @transform_5(%arg0: i32, %arg1: i32) -> (i32, i32) {
    %c0_i32 = arith.constant 0 : i32
    %c0_i32_0 = arith.constant 0 : i32
    %c0_i32_1 = arith.constant 0 : i32
    return %c0_i32, %c0_i32_0 : i32, i32
  }
  func.func @transform_6(%arg0: i32, %arg1: i32) -> (i32, i32) {
    %c0_i32 = arith.constant 0 : i32
    %c0_i32_0 = arith.constant 0 : i32
    %c0_i32_1 = arith.constant 0 : i32
    return %c0_i32, %c0_i32_0 : i32, i32
  }
  func.func @transform_7(%arg0: i32, %arg1: i32) -> (i32, i32) {
    %c0_i32 = arith.constant 0 : i32
    %c0_i32_0 = arith.constant 0 : i32
    %c0_i32_1 = arith.constant 0 : i32
    return %c0_i32, %c0_i32_0 : i32, i32
  }
  func.func @transform_8(%arg0: i32, %arg1: i32) -> (i32, i32) {
    %c0_i32 = arith.constant 0 : i32
    %c0_i32_0 = arith.constant 0 : i32
    %c0_i32_1 = arith.constant 0 : i32
    return %c0_i32, %c0_i32_0 : i32, i32
  }
  func.func @transform_9(%arg0: i32, %arg1: i32) -> (i32, i32) {
    %c0_i32 = arith.constant 0 : i32
    %c0_i32_0 = arith.constant 0 : i32
    %c0_i32_1 = arith.constant 0 : i32
    return %c0_i32, %c0_i32_0 : i32, i32
  }
  func.func @transform_10(%arg0: i32, %arg1: i32) -> (i32, i32) {
    %c0_i32 = arith.constant 0 : i32
    %c0_i32_0 = arith.constant 0 : i32
    %c0_i32_1 = arith.constant 0 : i32
    return %c0_i32, %c0_i32_0 : i32, i32
  }
  func.func @transform_11(%arg0: i32, %arg1: i32) -> (i32, i32) {
    %c0_i32 = arith.constant 0 : i32
    %c0_i32_0 = arith.constant 0 : i32
    %c0_i32_1 = arith.constant 0 : i32
    return %c0_i32, %c0_i32_0 : i32, i32
  }
  func.func @transform_12(%arg0: i32, %arg1: i32) -> (i32, i32) {
    %c0_i32 = arith.constant 0 : i32
    %c0_i32_0 = arith.constant 0 : i32
    %c0_i32_1 = arith.constant 0 : i32
    return %c0_i32, %c0_i32_0 : i32, i32
  }
  func.func @transform_13(%arg0: i32, %arg1: i32) -> (i32, i32) {
    %c0_i32 = arith.constant 0 : i32
    %c0_i32_0 = arith.constant 0 : i32
    %c0_i32_1 = arith.constant 0 : i32
    return %c0_i32, %c0_i32_0 : i32, i32
  }
  func.func @transform_14(%arg0: i32, %arg1: i32) -> (i32, i32) {
    %c0_i32 = arith.constant 0 : i32
    %c0_i32_0 = arith.constant 0 : i32
    %c0_i32_1 = arith.constant 0 : i32
    return %c0_i32, %c0_i32_0 : i32, i32
  }
  func.func @transform_15(%arg0: i32, %arg1: i32) -> (i32, i32, i32) {
    %c0_i32 = arith.constant 0 : i32
    %c0_i32_0 = arith.constant 0 : i32
    return %arg1, %arg0, %c0_i32 : i32, i32, i32
  }
  func.func @transform_16(%arg0: i32, %arg1: i32) -> (i32, i32, i32) {
    %c0_i32 = arith.constant 0 : i32
    %c0_i32_0 = arith.constant 0 : i32
    return %arg1, %arg0, %c0_i32 : i32, i32, i32
  }
}

</mosaic_0001>

<bundles_post_ra>
// kernel: pointer_decoder_forward.1
= control target key start
LH: loop header
LB: loop body
LE: loop exit
PB: predicated region body
PF: predicated region fallthrough
CT: control target
= control target key end

     0   :  { %s7809_s23 = smov 0   ;;  %s7811_s24 = smov 0   ;;  %s9330_s0 = inlined_call_operand.vmem [shape: f32[8,2,16], index: 0, kind: input, shape index: {}]   ;;  %s9331_s1 = inlined_call_operand.vmem [shape: f32[2,128,32], index: 1, kind: input, shape index: {}]   ;;  %s9332_s2 = inlined_call_operand.vmem [shape: f32[1,1,128], index: 2, kind: input, shape index: {}]   ;;  %s9333_s3 = inlined_call_operand.vmem [shape: f32[2,128,128], index: 3, kind: input, shape index: {}]   ;;  %s9334_s4 = inlined_call_operand.vmem [shape: f32[2,32], index: 4, kind: input, shape index: {}]   ;;  %s9335_s5 = inlined_call_operand.vmem [shape: f32[48,128], index: 5, kind: input, shape index: {}]   ;;  %s9336_s6 = inlined_call_operand.vmem [shape: f32[1,128], index: 6, kind: input, shape index: {}]   ;;  %s9337_s7 = inlined_call_operand.vmem [shape: f32[64,128], index: 7, kind: input, shape index: {}]   ;;  %s9338_s8 = inlined_call_operand.vmem [shape: f32[1,128], index: 8, kind: input, shape index: {}]   ;;  %s9339_s9 = inlined_call_operand.vmem [shape: f32[32,32], index: 9, kind: input, shape index: {}]   ;;  %s9340_s10 = inlined_call_operand.vmem [shape: f32[32,32], index: 10, kind: input, shape index: {}]   ;;  %s9341_s11 = inlined_call_operand.vmem [shape: f32[32,128], index: 11, kind: input, shape index: {}]   ;;  %s9342_s12 = inlined_call_operand.vmem [shape: f32[1,128], index: 12, kind: input, shape index: {}]   ;;  %s9343_s13 = inlined_call_operand.vmem [shape: f32[1,32], index: 13, kind: input, shape index: {}]   ;;  %s9344_s14 = inlined_call_operand.<no memory space> [shape: f32[1,1], index: 14, kind: input, shape index: {}]   ;;  %s9345_s15 = inlined_call_operand.vmem [shape: f32[8,2,128], index: 15, kind: output, shape index: {0}]   ;;  %s9346_s16 = inlined_call_operand.vmem [shape: f32[8,2,128], index: 16, kind: output, shape index: {1}]  }
   0x1   :  { %9388 = sst [smem:[#allocation22_spill]] %s9330_s0  ;;  %s7813_s25 = smov 0  }
   0x2   :  { %22 = sst [smem:[#allocation4]] %s9344_s14 }
   0x3 LB: > { %s37_s14 = sadd.s32 1, %s7705_s24  ;;  %p4921_p0 = scmp.ge.s32.totalorder %s7709_s25, 1  ;;  %s7709_s25 = sphi %s7813_s25, %s28_s25   ;;  %s7705_s24 = sphi %s7811_s24, %s9449_s24   ;;  %s7701_s23 = sphi %s7809_s23, %s9448_s23  }
   0x4   : > { %p38_p1 = scmp.ge.s32.totalorder %s37_s14, 2  ;;  %p521_p2 = scmp.lt.s32.totalorder %s7709_s25, 3 }
   0x6   : > { %s9451_s14 = smov (%p38_p1, %s37_s14), 0  ;;  %p522_p3 = pnand %p4921_p0, %p521_p2 }
   0x8   : > { %525 = sbr.rel (%p522_p3) target bundleno = 10758 (0x2a06), region = 80 }
   0xf   : > { %s4922_s26 = sshll.u32 %s7701_s23, 2  ;;  %s9389_s30 = sld [smem:[#allocation22_spill]] }
  0x10   : > { %p602_p4 = scmp.lt.s32.totalorder %s4922_s26, 7  ;;  %p4928_p5 = scmp.ne.s32.totalorder %s7701_s23, 0 }
  0x11   : > { %vm650_vm0 = vcmask (!%p4928_p5), 254976   ;;  %v7711_v0 = vmov (!%p4928_p5), 0.0  }
  0x12   : > { %s9453_s26 = smov (!%p602_p4, %s4922_s26), 7  ;;  %649 = sbr.rel (%p4928_p5) target bundleno = 25 (0x19), region = 84 }
  0x13   : > { %s4923_s27 = sshll.u32 %s9453_s26, 1  ;;  %651 = vst.msk [vmem:[#allocation2] sm:$0x3] (!%p4928_p5), %vm650_vm0, %v7711_v0  ;;  %652 = vst.msk [vmem:[#allocation2 + $0x2] sm:$0x3] (!%p4928_p5), %vm650_vm0, %v7711_v0 }
  0x14   : > { %s7835_s19 = scalar_lea.vmem %s9345_s15, %s4923_s27  ;;  %s7840_s22 = scalar_lea.vmem %s9346_s16, %s4923_s27  ;;  %653 = vst.msk [vmem:[#allocation3] sm:$0x3] (!%p4928_p5), %vm650_vm0, %v7711_v0  ;;  %654 = vst.msk [vmem:[#allocation3 + $0x2] sm:$0x3] (!%p4928_p5), %vm650_vm0, %v7711_v0 }
  0x15   : > { %s7830_s0 = scalar_lea.vmem %s9389_s30, %s4923_s27 }
  0x19 PF: > { %v721_v2 = vld [vmem:[%s9335_s5] sm:$0xff]  ;;  %v722_v3 = vld [vmem:[%s9335_s5 + $0x8] sm:$0xff]  ;;  %s7712_s27 = smov 16   ;;  %v9365_v4 = vmov 0.0|0.0   ;;  %v723_v6 = vld [vmem:[%s9335_s5 + $0x10] sm:$0xff]  ;;  %vm7714_vm1 = vmmov 0  }
  0x1a   : > { %v752_v1 = vld [vmem:[#allocation2] sm:$0x3]  ;;  %6740 = vmatprep.subr.bf16.mxu0 %v9365_v4  ;;  %v7849_v5 = vpack.c.bf16 %v722_v3, %v721_v2  ;;  %v724_v7 = vld [vmem:[%s9335_s5 + $0x18] sm:$0xff]  ;;  %v9351_v8 = vmov 0.0   ;;  %6749 = vmatprep.subr.bf16.mxu1 %v9365_v4  ;;  %v726_v12 = vld [vmem:[%s9335_s5 + $0x28] sm:$0xff]  ;;  %s9347_s30 = smov 32  }
  0x1b   : > { %760 = vrot.lane.b32.xlu0 %v752_v1, %s7712_s27  ;;  %5644 = vmatprep.mubr.msk.f32.mxu0 %vm7714_vm1, %v9351_v8  ;;  %v753_v9 = vld [vmem:[#allocation3] sm:$0x3]  ;;  %v7861_v10 = vpack.c.bf16 %v724_v7, %v723_v6  ;;  %v758_v14 = vld [vmem:[%s7830_s0] sm:$0x3]  ;;  %vm763_vm2 = vcmask 130048   ;;  %vm771_vm3 = vcmask 392192  }
  0x1c   : > { %6742 = vmatpush3.bf16.msra.mxu0 %v7849_v5  ;;  %5663 = vmatprep.mubr.msk.f32.mxu1 %vm7714_vm1, %v9351_v8  ;;  %v725_v11 = vld [vmem:[%s9335_s5 + $0x20] sm:$0xff]  ;;  %s9349_s17 = smov 64   ;;  %v729_v33 = vld [vmem:[%s9337_s7 + $0x8] sm:$0xff]  ;;  %v730_v34 = vld [vmem:[%s9337_s7 + $0x10] sm:$0xff]  ;;  %vm879_vm4 = vcmask 261120   ;;  %vm887_vm5 = vcmask 523264  }
  0x1d   : > { %9390 = vst [vmem:[#allocation5_spill] sm:$0xff] %v7861_v10  ;;  %6743 = vmatprep.subr.bf16.mxu0 %v9365_v4  ;;  %851 = vrot.lane.b32.xlu1 %v753_v9, %s9347_s30  ;;  %v7874_v13 = vpack.c.bf16 %v726_v12, %v725_v11  ;;  %v7887_v17 = vld [vmem:[%s9336_s6] ss:$0 sm:$0xff]  ;;  %v731_v36 = vld [vmem:[%s9337_s7 + $0x18] sm:$0xff]  ;;  %v733_v39 = vld [vmem:[%s9337_s7 + $0x28] sm:$0xff]  ;;  %vm1262_vm7 = vcmask 1040384  }
  0x1e   : > { %v728_v32 = vld [vmem:[%s9337_s7] sm:$0xff]  ;;  %v7910_v37 = vpack.c.bf16 %v731_v36, %v730_v34  ;;  %v734_v41 = vld [vmem:[%s9337_s7 + $0x30] sm:$0xff]  ;;  %v735_v42 = vld [vmem:[%s9337_s7 + $0x38] sm:$0xff]  ;;  %vm1502_vm8 = vcmask 1041409   ;;  %vm1676_vm9 = vcmask 254976   ;;  %s7719_s18 = smov 48  }
  0x1f   : > { %9391 = vst [vmem:[#allocation6_spill] sm:$0xff] %v7874_v13  ;;  %v7904_v35 = vpack.c.bf16 %v729_v33, %v728_v32  ;;  %v732_v38 = vld [vmem:[%s9337_s7 + $0x20] sm:$0xff]  ;;  %v7931_v44 = vpack.c.bf16 %v735_v42, %v734_v41  ;;  %vm7963_vm6 = vmpackc.low %vm879_vm4, %vm879_vm4  ;;  %v656_v7 = vld [vmem:[%s9331_s1 + $0x8] sm:$0xff]  ;;  %s751_s28 = sld [smem:[#allocation4]]  ;;  %s9411_s29 = smov 64   ;;  %vm1657_vm10 = vcmask 1041408  }
  0x20   : > { %6745 = vmatpush3.bf16.msra.mxu0 %v7861_v10  ;;  %9392 = vst [vmem:[#allocation7_spill] sm:$0xff] %v7910_v37  ;;  %v7920_v40 = vpack.c.bf16 %v733_v39, %v732_v38  ;;  %v755_v45 = vld [vmem:[#allocation2 + $0x2] sm:$0x3]  ;;  %v757_v46 = vld [vmem:[#allocation3 + $0x2] sm:$0x3]  ;;  %v672_v12 = vld [vmem:[%s9331_s1 + $0x88] sm:$0xff] }
  0x21   : > { %6746 = vmatprep.subr.bf16.mxu0 %v9365_v4  ;;  %6751 = vmatpush3.bf16.msra.mxu1 %v7904_v35  ;;  %9394 = vst [vmem:[#allocation9_spill] sm:$0xff] %v7931_v44  ;;  %v7949_v52 = vld [vmem:[%s9338_s8] ss:$0 sm:$0xff]  ;;  %v677_v32 = vld [vmem:[%s9331_s1 + $0xb0] sm:$0xff]  ;;  %v678_v33 = vld [vmem:[%s9331_s1 + $0xb8] sm:$0xff]  ;;  %s9412_s27 = smov 32  }
  0x22   : > { %6752 = vmatprep.subr.bf16.mxu1 %v9365_v4  ;;  %9393 = vst [vmem:[#allocation8_spill] sm:$0xff] %v7920_v40  ;;  %v655_v6 = vld [vmem:[%s9331_s1] sm:$0xff]  ;;  %v8054_v36 = vpack.c.bf16 %v678_v33, %v677_v32  ;;  %v664_v39 = vld [vmem:[%s9331_s1 + $0x48] sm:$0xff] }
  0x23   : > { %v671_v9 = vld [vmem:[%s9331_s1 + $0x80] sm:$0xff]  ;;  %v7976_v11 = vpack.c.bf16 %v656_v7, %v655_v6  ;;  %v680_v42 = vld [vmem:[%s9331_s1 + $0xc8] sm:$0xff]  ;;  %v7718_v7 = vmov 1966171168  }
  0x24   : > { %6748 = vmatpush3.bf16.msra.mxu0 %v7874_v13  ;;  %v663_v38 = vld [vmem:[%s9331_s1 + $0x40] sm:$0xff] }
  0x25   : > { %6761 = vmatprep.subr.bf16.mxu0 %v9365_v4  ;;  %6754 = vmatpush3.bf16.msra.mxu1 %v7910_v37  ;;  %v679_v41 = vld [vmem:[%s9331_s1 + $0xc0] sm:$0xff] }
  0x26   : > { %6755 = vmatprep.subr.bf16.mxu1 %v9365_v4 }
  0x29   : > { %6757 = vmatpush3.bf16.msra.mxu1 %v7920_v40 }
  0x2a   : > { %6758 = vmatprep.subr.bf16.mxu1 %v9365_v4 }
  0x2d   : > { %6760 = vmatpush3.bf16.msra.mxu1 %v7931_v44 }
  0x2e   : > { %6793 = vmatprep.subr.bf16.mxu1 %v9365_v4 }
  0x8d   : > { %v761_v15 = vpop.permute.xlu0 %760 }
  0x8e   : > { %v764_v16 = vsel %vm763_vm2, %v758_v14, %v761_v15  ;;  %v7981_v15 = vpack.c.bf16 %v672_v12, %v671_v9  ;;  %v989_v9 = vunpack.c.l.s4 %v7718_v7  ;;  %v991_v12 = vlaneseq }
  0x8f   : > { %5645 = vmatmul.mubr.msk.f32.vlgmr.msra.gmra.mrb[0].mxu0 %vm771_vm3, %v764_v16  ;;  %v852_v28 = vpop.permute.xlu1 %851  ;;  %v657_v16 = vld [vmem:[%s9331_s1 + $0x10] sm:$0xff] }
  0x90   : > { %5698 = vmatprep.mubr.msk.f32.mxu0 %vm7714_vm1, %v9351_v8  ;;  %6764 = vmatpush3.bf16.xpose.msk.msra.mxu0 %vm7963_vm6, %v7976_v11 }
  0x91   : > { %6765 = vmatprep.subr.bf16.mxu0 %v9365_v4 }
 0x162   : > { %v841_v18 = vpop.f32.mrb[0].mxu0 }
 0x163   : > { %v842_v19 = vadd.f32 %v7887_v17, %v841_v18  ;;  %v5646_v20 = vpop.f32.mrb[1].mxu0  ;;  %v658_v18 = vld [vmem:[%s9331_s1 + $0x18] sm:$0xff] }
 0x164   : > { %v674_v20 = vld [vmem:[%s9331_s1 + $0x98] sm:$0xff] }
 0x165   : > { %7570 = vtanh.f32 %v842_v19  ;;  %v845_v22 = vmul.f32 0.5, %v842_v19  ;;  %v673_v19 = vld [vmem:[%s9331_s1 + $0x90] sm:$0xff] }
 0x167   : > { %7572 = vtanh.f32 %v845_v22  ;;  %v8006_v22 = vpack.c.bf16 %v674_v20, %v673_v19 }
 0x16f   : > { %v7571_v21 = vpop.eup %7570 }
 0x170   : > { %856 = vrot.lane.b32.xlu0 %v7571_v21, %s9349_s17  ;;  %v8004_v21 = vpack.c.bf16 %v658_v18, %v657_v16  ;;  %v8160_v16 = vshrl.u32 %v991_v12, 7 }
 0x171   : > { %v7573_v23 = vpop.eup %7572 }
 0x172   : > { %v847_v24 = vadd.f32 1.0, %v7573_v23  ;;  %6768 = vmatpush3.bf16.xpose.msk.msra.mxu0 %vm7963_vm6, %v8004_v21  ;;  %v659_v23 = vld [vmem:[%s9331_s1 + $0x20] sm:$0xff] }
 0x173   : > { %6769 = vmatprep.subr.bf16.mxu0 %v9365_v4 }
 0x174   : > { %v848_v25 = vmul.f32 0.5, %v847_v24  ;;  %v660_v24 = vld [vmem:[%s9331_s1 + $0x28] sm:$0xff] }
 0x176   : > { %v854_v29 = vmul.f32 %v852_v28, %v848_v25 }
 0x1e2   : > { %v857_v26 = vpop.permute.xlu0 %856 }
 0x1e3   : > { %v859_v27 = vmul.f32 %v857_v26, %v848_v25  ;;  %v676_v26 = vld [vmem:[%s9331_s1 + $0xa8] sm:$0xff] }
 0x1e5   : > { %861 = vrot.lane.b32.xlu1 %v859_v27, %s9347_s30  ;;  %v8028_v27 = vpack.c.bf16 %v660_v24, %v659_v23  ;;  %v8171_v24 = vsub.s32 0, %v8160_v16 }
 0x1e7   : > { %6772 = vmatpush3.bf16.xpose.msk.msra.mxu0 %vm7963_vm6, %v8028_v27 }
 0x1e8   : > { %6773 = vmatprep.subr.bf16.mxu0 %v9365_v4 }
 0x257   : > { %v862_v30 = vpop.permute.xlu1 %861 }
 0x258   : > { %v7892_v31 = vadd.f32 %v862_v30, %v854_v29  ;;  %v661_v29 = vld [vmem:[%s9331_s1 + $0x30] sm:$0xff]  ;;  %v662_v30 = vld [vmem:[%s9331_s1 + $0x38] sm:$0xff] }
 0x259   : > { %v8052_v34 = vpack.c.bf16 %v662_v30, %v661_v29 }
 0x25a   : > { %7574 = vtanh.f32 %v7892_v31 }
 0x25b   : > { %6776 = vmatpush3.bf16.xpose.msk.msra.mxu0 %vm7963_vm6, %v8052_v34 }
 0x25c   : > { %6777 = vmatprep.subr.bf16.mxu0 %v9365_v4 }
 0x264   : > { %v7575_v43 = vpop.eup %7574 }
 0x265   : > { %867 = vrot.lane.b32.xlu0 %v7575_v43, %s9349_s17  ;;  %v8076_v43 = vpack.c.bf16 %v664_v39, %v663_v38  ;;  %v8220_v38 = vld [vmem:[%s9332_s2] sm:$0x1] }
 0x267   : > { %6780 = vmatpush3.bf16.xpose.msk.msra.mxu0 %vm7963_vm6, %v8076_v43 }
 0x268   : > { %6781 = vmatprep.subr.bf16.mxu0 %v9365_v4 }
 0x269   : > { %876 = vrot.lane.b32.xlu0 %v755_v45, %s9347_s30  ;;  %v8078_v45 = vpack.c.bf16 %v680_v42, %v679_v41 }
 0x26d   : > { %967 = vrot.lane.b32.xlu0 %v757_v46, %s9347_s30  ;;  %v665_v46 = vld [vmem:[%s9331_s1 + $0x50] sm:$0xff] }
 0x2d7   : > { %v868_v47 = vpop.permute.xlu0 %867 }
 0x2d8   : > { %v7938_v48 = vmul.f32 %v868_v47, %v848_v25  ;;  %v675_v25 = vld [vmem:[%s9331_s1 + $0xa0] sm:$0xff]  ;;  %v666_v47 = vld [vmem:[%s9331_s1 + $0x58] sm:$0xff] }
 0x2d9   : > { %v8030_v28 = vpack.c.bf16 %v676_v26, %v675_v25 }
 0x2da   : > { %872 = vrot.lane.b32.xlu1 %v7938_v48, %s9347_s30 }
 0x2db   : > { %v877_v49 = vpop.permute.xlu0 %876 }
 0x2df   : > { %v968_v63 = vpop.permute.xlu0 %967 }
 0x34c   : > { %v873_v50 = vpop.permute.xlu1 %872 }
 0x34d   : > { %v880_v51 = vsel %vm879_vm4, %v873_v50, %v877_v49  ;;  %v681_v49 = vld [vmem:[%s9331_s1 + $0xd0] sm:$0xff]  ;;  %v682_v50 = vld [vmem:[%s9331_s1 + $0xd8] sm:$0xff] }
 0x34e   : > { %5664 = vmatmul.mubr.msk.f32.vlgmr.msra.gmra.mrb[0].mxu1 %vm887_vm5, %v880_v51  ;;  %v8100_v51 = vpack.c.bf16 %v666_v47, %v665_v46 }
 0x34f   : > { %5733 = vmatprep.mubr.msk.f32.mxu1 %vm7714_vm1, %v9351_v8  ;;  %6796 = vmatpush3.bf16.xpose.msk.msra.mxu1 %vm7963_vm6, %v7981_v15 }
 0x350   : > { %6797 = vmatprep.subr.bf16.mxu1 %v9365_v4  ;;  %6784 = vmatpush3.bf16.xpose.msk.msra.mxu0 %vm7963_vm6, %v8100_v51 }
 0x351   : > { %6785 = vmatprep.subr.bf16.mxu0 %v9365_v4 }
 0x357   : > { %6800 = vmatpush3.bf16.xpose.msk.msra.mxu1 %vm7963_vm6, %v8006_v22 }
 0x358   : > { %6801 = vmatprep.subr.bf16.mxu1 %v9365_v4 }
 0x35f   : > { %6804 = vmatpush3.bf16.xpose.msk.msra.mxu1 %vm7963_vm6, %v8030_v28 }
 0x360   : > { %6805 = vmatprep.subr.bf16.mxu1 %v9365_v4 }
 0x367   : > { %6808 = vmatpush3.bf16.xpose.msk.msra.mxu1 %vm7963_vm6, %v8054_v36 }
 0x368   : > { %6809 = vmatprep.subr.bf16.mxu1 %v9365_v4 }
 0x36f   : > { %6812 = vmatpush3.bf16.xpose.msk.msra.mxu1 %vm7963_vm6, %v8078_v45 }
 0x370   : > { %6813 = vmatprep.subr.bf16.mxu1 %v9365_v4 }
 0x421   : > { %v957_v53 = vpop.f32.mrb[0].mxu1 }
 0x422   : > { %v958_v54 = vadd.f32 %v7949_v52, %v957_v53  ;;  %v5665_v55 = vpop.f32.mrb[1].mxu1  ;;  %v8102_v53 = vpack.c.bf16 %v682_v50, %v681_v49 }
 0x423   : > { %v668_v55 = vld [vmem:[%s9331_s1 + $0x68] sm:$0xff] }
 0x424   : > { %7576 = vtanh.f32 %v958_v54  ;;  %v961_v57 = vmul.f32 0.5, %v958_v54  ;;  %6816 = vmatpush3.bf16.xpose.msk.msra.mxu1 %vm7963_vm6, %v8102_v53  ;;  %v667_v54 = vld [vmem:[%s9331_s1 + $0x60] sm:$0xff] }
 0x425   : > { %6817 = vmatprep.subr.bf16.mxu1 %v9365_v4 }
 0x426   : > { %7578 = vtanh.f32 %v961_v57  ;;  %v684_v57 = vld [vmem:[%s9331_s1 + $0xe8] sm:$0xff] }
 0x42e   : > { %v7577_v56 = vpop.eup %7576 }
 0x42f   : > { %972 = vrot.lane.b32.xlu1 %v7577_v56, %s9349_s17  ;;  %v683_v56 = vld [vmem:[%s9331_s1 + $0xe0] sm:$0xff] }
 0x430   : > { %v7579_v58 = vpop.eup %7578 }
 0x431   : > { %v963_v59 = vadd.f32 1.0, %v7579_v58  ;;  %v8124_v58 = vpack.c.bf16 %v668_v55, %v667_v54 }
 0x433   : > { %v7953_v60 = vmul.f32 0.5, %v963_v59  ;;  %v8126_v59 = vpack.c.bf16 %v684_v57, %v683_v56  ;;  %6788 = vmatpush3.bf16.xpose.msk.msra.mxu0 %vm7963_vm6, %v8124_v58 }
 0x434   : > { %6789 = vmatprep.subr.bf16.mxu0 %v9365_v4 }
 0x435   : > { %v970_v0 = vmul.f32 %v968_v63, %v7953_v60  ;;  %6820 = vmatpush3.bf16.xpose.msk.msra.mxu1 %vm7963_vm6, %v8126_v59  ;;  %v685_v63 = vld [vmem:[%s9331_s1 + $0xf0] sm:$0xff] }
 0x436   : > { %6821 = vmatprep.subr.bf16.mxu1 %v9365_v4 }
 0x4a1   : > { %v973_v61 = vpop.permute.xlu1 %972 }
 0x4a2   : > { %v975_v62 = vmul.f32 %v973_v61, %v7953_v60  ;;  %v669_v61 = vld [vmem:[%s9331_s1 + $0x70] sm:$0xff] }
 0x4a4   : > { %977 = vrot.lane.b32.xlu1 %v975_v62, %s9347_s30  ;;  %v670_v62 = vld [vmem:[%s9331_s1 + $0x78] sm:$0xff] }
 0x516   : > { %v978_v1 = vpop.permute.xlu1 %977 }
 0x517   : > { %v7958_v2 = vadd.f32 %v978_v1, %v970_v0  ;;  %v686_v0 = vld [vmem:[%s9331_s1 + $0xf8] sm:$0xff]  ;;  %v8148_v1 = vpack.c.bf16 %v670_v62, %v669_v61 }
 0x518   : > { %v8150_v6 = vpack.c.bf16 %v686_v0, %v685_v63 }
 0x519   : > { %7580 = vtanh.f32 %v7958_v2  ;;  %6792 = vmatpush3.bf16.xpose.msk.msra.mxu0 %vm7963_vm6, %v8148_v1 }
 0x51a   : > { %9397 = vst [vmem:[#allocation10_spill] sm:$0xff] %v8150_v6  ;;  %6824 = vmatpush3.bf16.xpose.msk.msra.mxu1 %vm7963_vm6, %v8150_v6  ;;  %6825 = vmatprep.subr.bf16.mxu0 %v9365_v4 }
 0x51b   : > { %6849 = vmatprep.subr.bf16.mxu1 %v9365_v4 }
 0x523   : > { %v7581_v14 = vpop.eup %7580 }
 0x524   : > { %983 = vrot.lane.b32.xlu0 %v7581_v14, %s9349_s17  ;;  %v990_v14 = vunpack.c.0.s8 %v989_v9 }
 0x526   : > { %v8163_v18 = vsub.s32 %v990_v14, %v8160_v16 }
 0x528   : > { %9398 = vst [vmem:[#allocation11_spill] sm:$0xff] %v8163_v18 }
 0x596   : > { %v984_v19 = vpop.permute.xlu0 %983 }
 0x597   : > { %v8166_v20 = vmul.f32 %v984_v19, %v7953_v60 }
 0x599   : > { %v994_v23 = vrot.slane %v8166_v20, %v8163_v18 }
 0x59b   : > { %v995_v25 = vcombine.high %v994_v23, %v994_v23  ;;  %v1002_v26 = vrot.slane %v994_v23, %v8163_v18  ;;  %v741_v23 = vld [vmem:[%s9340_s10] sm:$0xff] }
 0x59d   : > { %v1013_v29 = vrot.slane %v1002_v26, %v8171_v24  ;;  %v1009_v30 = vrot.slane %v995_v25, %v8163_v18  ;;  %v742_v25 = vld [vmem:[%s9340_s10 + $0x8] sm:$0xff]  ;;  %v737_v26 = vld [vmem:[%s9339_s9] sm:$0xff] }
 0x59f   : > { %1014 = vrot.lane.b32.xlu0 %v1013_v29, %s9347_s30  ;;  %v1139_v32 = vrot.slane %v1009_v30, %v8171_v24  ;;  %v738_v29 = vld [vmem:[%s9339_s9 + $0x8] sm:$0xff] }
 0x5a1   : > { %1140 = vrot.lane.b32.xlu1 %v1139_v32, %s9347_s30  ;;  %v8242_v32 = vpack.c.bf16 %v742_v25, %v741_v23  ;;  %v746_v23 = vld [vmem:[%s9341_s11 + $0x8] sm:$0xff]  ;;  %v747_v25 = vld [vmem:[%s9341_s11 + $0x10] sm:$0xff] }
 0x611   : > { %v1015_v60 = vpop.permute.xlu0 %1014 }
 0x612   : > { %5699 = vmatmul.mubr.msk.f32.vlgmr.msra.gmra.mrb[2].mxu0 %vm879_vm4, %v1015_v60 }
 0x613   : > { %v1141_v33 = vpop.permute.xlu1 %1140  ;;  %6827 = vmatpush3.bf16.msra.mxu0 %v7976_v11  ;;  %5768 = vmatprep.mubr.msk.f32.mxu0 %vm7714_vm1, %v9351_v8 }
 0x614   : > { %5734 = vmatmul.mubr.msk.f32.vlgmr.msra.gmra.mrb[2].mxu1 %vm879_vm4, %v1141_v33  ;;  %6828 = vmatprep.subr.bf16.mxu0 %v9365_v4  ;;  %v743_v33 = vld [vmem:[%s9340_s10 + $0x10] sm:$0xff] }
 0x615   : > { %6851 = vmatpush3.bf16.msra.mxu1 %v7981_v15  ;;  %5803 = vmatprep.mubr.msk.f32.mxu1 %vm7714_vm1, %v9351_v8 }
 0x616   : > { %6852 = vmatprep.subr.bf16.mxu1 %v9365_v4 }
 0x617   : > { %6830 = vmatpush3.bf16.msra.mxu0 %v8004_v21 }
 0x618   : > { %6831 = vmatprep.subr.bf16.mxu0 %v9365_v4 }
 0x619   : > { %6854 = vmatpush3.bf16.msra.mxu1 %v8006_v22 }
 0x61a   : > { %6855 = vmatprep.subr.bf16.mxu1 %v9365_v4 }
 0x61b   : > { %6833 = vmatpush3.bf16.msra.mxu0 %v8028_v27 }
 0x61c   : > { %6834 = vmatprep.subr.bf16.mxu0 %v9365_v4 }
 0x61d   : > { %6857 = vmatpush3.bf16.msra.mxu1 %v8030_v28 }
 0x61e   : > { %6858 = vmatprep.subr.bf16.mxu1 %v9365_v4 }
 0x61f   : > { %6836 = vmatpush3.bf16.msra.mxu0 %v8052_v34 }
 0x620   : > { %6837 = vmatprep.subr.bf16.mxu0 %v9365_v4 }
 0x621   : > { %6860 = vmatpush3.bf16.msra.mxu1 %v8054_v36 }
 0x622   : > { %6861 = vmatprep.subr.bf16.mxu1 %v9365_v4 }
 0x623   : > { %6839 = vmatpush3.bf16.msra.mxu0 %v8076_v43 }
 0x624   : > { %6840 = vmatprep.subr.bf16.mxu0 %v9365_v4 }
 0x625   : > { %6863 = vmatpush3.bf16.msra.mxu1 %v8078_v45 }
 0x626   : > { %6864 = vmatprep.subr.bf16.mxu1 %v9365_v4 }
 0x627   : > { %6842 = vmatpush3.bf16.msra.mxu0 %v8100_v51 }
 0x628   : > { %6843 = vmatprep.subr.bf16.mxu0 %v9365_v4 }
 0x629   : > { %6866 = vmatpush3.bf16.msra.mxu1 %v8102_v53 }
 0x62a   : > { %6867 = vmatprep.subr.bf16.mxu1 %v9365_v4 }
 0x62b   : > { %6845 = vmatpush3.bf16.msra.mxu0 %v8124_v58 }
 0x62c   : > { %6846 = vmatprep.subr.bf16.mxu0 %v9365_v4 }
 0x62d   : > { %6869 = vmatpush3.bf16.msra.mxu1 %v8126_v59 }
 0x62e   : > { %6870 = vmatprep.subr.bf16.mxu1 %v9365_v4 }
 0x62f   : > { %6848 = vmatpush3.bf16.msra.mxu0 %v8148_v1 }
 0x630   : > { %6873 = vmatprep.subr.bf16.mxu0 %v9365_v4 }
 0x631   : > { %6872 = vmatpush3.bf16.msra.mxu1 %v8150_v6 }
 0x632   : > { %6879 = vmatprep.subr.bf16.mxu1 %v9365_v4 }
 0x6e5   : > { %v1132_v39 = vpop.f32.mrb[2].mxu0 }
 0x6e6   : > { %v1133_v41 = vadd.f32 %v1132_v39, %v8220_v38  ;;  %v5700_v42 = vpop.f32.mrb[3].mxu0  ;;  %v744_v39 = vld [vmem:[%s9340_s10 + $0x18] sm:$0xff] }
 0x6e7   : > { %v1258_v46 = vpop.f32.mrb[2].mxu1  ;;  %v8252_v42 = vpack.c.bf16 %v738_v29, %v737_v26  ;;  %v748_v29 = vld [vmem:[%s9341_s11 + $0x18] sm:$0xff] }
 0x6e8   : > { %v1259_v47 = vadd.f32 %v1258_v46, %v8220_v38  ;;  %v5735_v49 = vpop.f32.mrb[3].mxu1  ;;  %v1263_v50 = vsel %vm1262_vm7, %v1133_v41, -inf }
 0x6e9   : > { %1264 = vmax.xlane.f32.xlu0 %v1263_v50 }
 0x6ea   : > { %v1266_v54 = vsel %vm1262_vm7, %v1259_v47, -inf }
 0x6eb   : > { %1267 = vmax.xlane.f32.xlu1 %v1266_v54 }
 0x776   : > { %v1265_v55 = vpop.xlane.xlu0 %1264 }
 0x777   : > { %v1269_v56 = vsub.f32 %v1133_v41, %v1265_v55  ;;  %v739_v55 = vld [vmem:[%s9339_s9 + $0x10] sm:$0xff] }
 0x778   : > { %v1268_v57 = vpop.xlane.xlu1 %1267 }
 0x779   : > { %v1271_v61 = vmul.f32 1.442695, %v1269_v56  ;;  %v1270_v62 = vsub.f32 %v1259_v47, %v1268_v57  ;;  %v8258_v47 = vpack.c.bf16 %v744_v39, %v743_v33  ;;  %v740_v56 = vld [vmem:[%s9339_s9 + $0x18] sm:$0xff]  ;;  %v688_v33 = vld [vmem:[%s9333_s3] sm:$0xff]  ;;  %v689_v39 = vld [vmem:[%s9333_s3 + $0x8] sm:$0xff] }
 0x77a   : > { %v8283_v57 = vpack.c.bf16 %v740_v56, %v739_v55  ;;  %v8334_v55 = vld [vmem:[%s9334_s4] sm:$0x3] }
 0x77b   : > { %7582 = vpow2.f32 %v1271_v61  ;;  %v1273_v63 = vmul.f32 1.442695, %v1270_v62 }
 0x77d   : > { %7584 = vpow2.f32 %v1273_v63 }
 0x785   : > { %v7583_v0 = vpop.eup %7582 }
 0x786   : > { %v1275_v7 = vsel %vm1262_vm7, %v7583_v0, 0.0 }
 0x787   : > { %v7585_v9 = vpop.eup %7584  ;;  %1276 = vadd.xlane.f32.xlu1 %v1275_v7 }
 0x788   : > { %v1278_v12 = vsel %vm1262_vm7, %v7585_v9, 0.0 }
 0x789   : > { %1279 = vadd.xlane.f32.xlu0 %v1278_v12 }
 0x79f   : > { %1425 = vrot.lane.b32.xlu0 %v8166_v20, %s9347_s30 }
 0x814   : > { %v1277_v14 = vpop.xlane.xlu1 %1276 }
 0x815   : > { %7586 = vrcp.f32 %v1277_v14 }
 0x816   : > { %v1280_v19 = vpop.xlane.xlu0 %1279 }
 0x817   : > { %7588 = vrcp.f32 %v1280_v19  ;;  %v745_v19 = vld [vmem:[%s9341_s11] sm:$0xff] }
 0x818   : > { %v8300_v26 = vpack.c.bf16 %v746_v23, %v745_v19  ;;  %v707_v19 = vld [vmem:[%s9333_s3 + $0x98] sm:$0xff] }
 0x81a   : > { %v1426_v54 = vpop.permute.xlu0 %1425 }
 0x81f   : > { %v7587_v30 = vpop.eup %7586 }
 0x820   : > { %v8244_v60 = vmul.f32 %v7587_v30, %v7583_v0  ;;  %v8306_v30 = vpack.c.bf16 %v748_v29, %v747_v25 }
 0x821   : > { %v7589_v41 = vpop.eup %7588 }
 0x822   : > { %5769 = vmatmul.mubr.f32.vlgmr.msra.gmra.mrb[4].mxu0 %v8244_v60  ;;  %v8255_v46 = vmul.f32 %v7589_v41, %v7585_v9  ;;  %v8317_v41 = vpack.c.bf16 %v689_v39, %v688_v33  ;;  %v692_v39 = vld [vmem:[%s9333_s3 + $0x20] sm:$0xff] }
 0x823   : > { %6875 = vmatpush3.bf16.msra.mxu0 %v8242_v32  ;;  %5814 = vmatprep.mubr.msk.f32.mxu0 %vm7714_vm1, %v9351_v8 }
 0x824   : > { %5804 = vmatmul.mubr.f32.vlgmr.msra.gmra.mrb[4].mxu1 %v8255_v46  ;;  %v1850_v49 = vrot.slane %v8255_v46, 7  ;;  %6876 = vmatprep.subr.bf16.mxu0 %v9365_v4 }
 0x825   : > { %6881 = vmatpush3.bf16.msra.mxu1 %v8252_v42  ;;  %5825 = vmatprep.mubr.msk.f32.mxu1 %vm7714_vm1, %v9351_v8 }
 0x826   : > { %6882 = vmatprep.subr.bf16.mxu1 %v9365_v4  ;;  %v1851_v50 = vsel %vm1502_vm8, %v1850_v49, %v8244_v60  ;;  %v690_v49 = vld [vmem:[%s9333_s3 + $0x10] sm:$0xff] }
 0x827   : > { %6878 = vmatpush3.bf16.msra.mxu0 %v8258_v47  ;;  %1853 = vst [vmem:[%s7840_s22] sm:$0x3] %v1851_v50  ;;  %v691_v50 = vld [vmem:[%s9333_s3 + $0x18] sm:$0xff] }
 0x828   : > { %6885 = vmatprep.subr.bf16.mxu0 %v9365_v4 }
 0x829   : > { %6884 = vmatpush3.bf16.msra.mxu1 %v8283_v57 }
 0x82a   : > { %5815 = vmatmul.mubr.msk.f32.vlgmr.msra.gmra.mrb[6].mxu0 %vm879_vm4, %v1426_v54  ;;  %6891 = vmatprep.subr.bf16.mxu1 %v9365_v4  ;;  %v8326_v54 = vpack.c.bf16 %v691_v50, %v690_v49  ;;  %v693_v49 = vld [vmem:[%s9333_s3 + $0x28] sm:$0xff] }
 0x82b   : > { %5836 = vmatprep.mubr.msk.f32.mxu0 %vm7714_vm1, %v9351_v8  ;;  %6887 = vmatpush3.bf16.msra.mxu0 %v8300_v26  ;;  %v8373_v50 = vpack.c.bf16 %v693_v49, %v692_v39  ;;  %v712_v39 = vld [vmem:[%s9333_s3 + $0xc0] sm:$0xff]  ;;  %v713_v49 = vld [vmem:[%s9333_s3 + $0xc8] sm:$0xff] }
 0x82c   : > { %6888 = vmatprep.subr.bf16.mxu0 %v9365_v4 }
 0x82f   : > { %6890 = vmatpush3.bf16.msra.mxu0 %v8306_v30 }
 0x830   : > { %6915 = vmatprep.subr.bf16.mxu0 %v9365_v4 }
 0x8f5   : > { %v1351_v61 = vpop.f32.mrb[4].mxu0 }
 0x8f6   : > { %v5770_v62 = vpop.f32.mrb[5].mxu0 }
 0x8f7   : > { %v1421_v63 = vpop.f32.mrb[4].mxu1 }
 0x8f8   : > { %v1501_v0 = vrot.slane %v1421_v63, 7  ;;  %v5805_v7 = vpop.f32.mrb[5].mxu1 }
 0x8f9   : > { %v705_v7 = vld [vmem:[%s9333_s3 + $0x88] sm:$0xff] }
 0x8fa   : > { %v1503_v9 = vsel %vm1502_vm8, %v1501_v0, %v1351_v61  ;;  %v704_v0 = vld [vmem:[%s9333_s3 + $0x80] sm:$0xff] }
 0x8fb   : > { %5826 = vmatmul.mubr.msk.f32.vlgmr.msra.gmra.mrb[6].mxu1 %vm879_vm4, %v1503_v9  ;;  %v8346_v9 = vld [vmem:[%s9343_s13] ss:$0 sm:$0xff] }
 0x8fc   : > { %5871 = vmatprep.mubr.msk.f32.mxu1 %vm7714_vm1, %v9351_v8  ;;  %6893 = vmatpush3.bf16.msra.mxu1 %v8317_v41 }
 0x8fd   : > { %v1495_v12 = vpop.f32.mrb[6].mxu0  ;;  %6894 = vmatprep.subr.bf16.mxu1 %v9365_v4 }
 0x8fe   : > { %v5816_v14 = vpop.f32.mrb[7].mxu0 }
 0x8ff   : > { %v8348_v14 = vpack.c.bf16 %v705_v7, %v704_v0  ;;  %v695_v0 = vld [vmem:[%s9333_s3 + $0x38] sm:$0xff] }
 0x900   : > { %6896 = vmatpush3.bf16.msra.mxu1 %v8326_v54 }
 0x901   : > { %6897 = vmatprep.subr.bf16.mxu1 %v9365_v4 }
 0x904   : > { %6899 = vmatpush3.bf16.msra.mxu1 %v8373_v50 }
 0x905   : > { %6900 = vmatprep.subr.bf16.mxu1 %v9365_v4 }
 0x9ce   : > { %v1572_v56 = vpop.f32.mrb[6].mxu1 }
 0x9cf   : > { %v1573_v61 = vadd.f32 %v1572_v56, %v1495_v12  ;;  %v5827_v62 = vpop.f32.mrb[7].mxu1  ;;  %v706_v12 = vld [vmem:[%s9333_s3 + $0x90] sm:$0xff]  ;;  %v708_v56 = vld [vmem:[%s9333_s3 + $0xa0] sm:$0xff] }
 0x9d0   : > { %v8359_v29 = vpack.c.bf16 %v707_v19, %v706_v12  ;;  %v711_v12 = vld [vmem:[%s9333_s3 + $0xb8] sm:$0xff] }
 0x9d1   : > { %v1576_v63 = vadd.f32 %v1573_v61, %v8334_v55  ;;  %v709_v61 = vld [vmem:[%s9333_s3 + $0xa8] sm:$0xff] }
 0x9d2   : > { %9399 = vst [vmem:[#allocation12_spill] sm:$0xff] %v8359_v29  ;;  %v8381_v62 = vpack.c.bf16 %v709_v61, %v708_v56  ;;  %v8423_v56 = vpack.c.bf16 %v713_v49, %v712_v39  ;;  %v698_v61 = vld [vmem:[%s9333_s3 + $0x50] sm:$0xff]  ;;  %v701_v39 = vld [vmem:[%s9333_s3 + $0x68] sm:$0xff] }
 0x9d3   : > { %7590 = vtanh.f32 %v1576_v63  ;;  %v694_v63 = vld [vmem:[%s9333_s3 + $0x30] sm:$0xff] }
 0x9d4   : > { %9400 = vst [vmem:[#allocation13_spill] sm:$0xff] %v8381_v62  ;;  %v8394_v7 = vpack.c.bf16 %v695_v0, %v694_v63  ;;  %9402 = vst [vmem:[#allocation15_spill] sm:$0xff] %v8423_v56  ;;  %v699_v63 = vld [vmem:[%s9333_s3 + $0x58] sm:$0xff] }
 0x9d5   : > { %v8434_v0 = vpack.c.bf16 %v699_v63, %v698_v61  ;;  %v716_v61 = vld [vmem:[%s9333_s3 + $0xe0] sm:$0xff]  ;;  %v717_v63 = vld [vmem:[%s9333_s3 + $0xe8] sm:$0xff] }
 0x9d6   : > { %6902 = vmatpush3.bf16.msra.mxu1 %v8394_v7 }
 0x9d7   : > { %6903 = vmatprep.subr.bf16.mxu1 %v9365_v4 }
 0x9dd   : > { %v7591_v23 = vpop.eup %7590 }
 0x9de   : > { %5837 = vmatmul.mubr.msk.f32.vlgmr.msra.gmra.mrb[8].mxu0 %vm879_vm4, %v7591_v23  ;;  %v1675_v25 = vmul.f32 %v7591_v23, %v8346_v9  ;;  %v696_v23 = vld [vmem:[%s9333_s3 + $0x40] sm:$0xff] }
 0x9df   : > { %6917 = vmatpush3.bf16.msra.mxu0 %v8348_v14  ;;  %5906 = vmatprep.mubr.msk.f32.mxu0 %vm7714_vm1, %v9351_v8 }
 0x9e0   : > { %v1677_v33 = vsel %vm1676_vm9, %v1675_v25, 0.0  ;;  %6918 = vmatprep.subr.bf16.mxu0 %v9365_v4  ;;  %v697_v25 = vld [vmem:[%s9333_s3 + $0x48] sm:$0xff] }
 0x9e1   : > { %1678 = vadd.xlane.f32.xlu1 %v1677_v33  ;;  %v8414_v33 = vpack.c.bf16 %v697_v25, %v696_v23  ;;  %v700_v25 = vld [vmem:[%s9333_s3 + $0x60] sm:$0xff] }
 0x9e2   : > { %v8454_v49 = vpack.c.bf16 %v701_v39, %v700_v25  ;;  %v703_v25 = vld [vmem:[%s9333_s3 + $0x78] sm:$0xff] }
 0x9e3   : > { %6920 = vmatpush3.bf16.msra.mxu0 %v8359_v29  ;;  %6905 = vmatpush3.bf16.msra.mxu1 %v8414_v33 }
 0x9e4   : > { %6921 = vmatprep.subr.bf16.mxu0 %v9365_v4  ;;  %6906 = vmatprep.subr.bf16.mxu1 %v9365_v4 }
 0x9e7   : > { %6923 = vmatpush3.bf16.msra.mxu0 %v8381_v62  ;;  %6908 = vmatpush3.bf16.msra.mxu1 %v8434_v0 }
 0x9e8   : > { %6924 = vmatprep.subr.bf16.mxu0 %v9365_v4  ;;  %6909 = vmatprep.subr.bf16.mxu1 %v9365_v4 }
 0x9eb   : > { %6911 = vmatpush3.bf16.msra.mxu1 %v8454_v49 }
 0x9ec   : > { %6912 = vmatprep.subr.bf16.mxu1 %v9365_v4 }
 0x9f2   : > { %1856 = vrot.lane.b32.xlu1 %v7938_v48, %s7719_s18  ;;  %v710_v48 = vld [vmem:[%s9333_s3 + $0xb0] sm:$0xff] }
 0x9f3   : > { %v8403_v19 = vpack.c.bf16 %v711_v12, %v710_v48  ;;  %v714_v48 = vld [vmem:[%s9333_s3 + $0xd0] sm:$0xff]  ;;  %v715_v12 = vld [vmem:[%s9333_s3 + $0xd8] sm:$0xff] }
 0x9f4   : > { %v8443_v23 = vpack.c.bf16 %v715_v12, %v714_v48  ;;  %v8463_v48 = vpack.c.bf16 %v717_v63, %v716_v61  ;;  %v702_v12 = vld [vmem:[%s9333_s3 + $0x70] sm:$0xff]  ;;  %v719_v63 = vld [vmem:[%s9333_s3 + $0xf8] sm:$0xff] }
 0x9f5   : > { %9401 = vst [vmem:[#allocation14_spill] sm:$0xff] %v8403_v19  ;;  %6926 = vmatpush3.bf16.msra.mxu0 %v8403_v19  ;;  %v8474_v39 = vpack.c.bf16 %v703_v25, %v702_v12  ;;  %v718_v61 = vld [vmem:[%s9333_s3 + $0xf0] sm:$0xff]  ;;  %v8489_v12 = vstv %s751_s28 }
 0x9f6   : > { %6927 = vmatprep.subr.bf16.mxu0 %v9365_v4  ;;  %9403 = vst [vmem:[#allocation16_spill] sm:$0xff] %v8443_v23  ;;  %9404 = vst [vmem:[#allocation17_spill] sm:$0xff] %v8463_v48  ;;  %v8483_v8 = vpack.c.bf16 %v719_v63, %v718_v61  ;;  %v8493_v61 = vsub.s32 1, %v8160_v16  ;;  %v9408_v16 = vmov 0.0|0.0  }
 0x9f7   : > { %6914 = vmatpush3.bf16.msra.mxu1 %v8474_v39 }
 0x9f8   : > { %9405 = vst [vmem:[#allocation18_spill] sm:$0xff] %v8483_v8  ;;  %6939 = vmatprep.subr.bf16.mxu1 %v9365_v4 }
 0x9f9   : > { %6929 = vmatpush3.bf16.msra.mxu0 %v8423_v56 }
 0x9fa   : > { %6930 = vmatprep.subr.bf16.mxu0 %v9365_v4 }
 0x9fd   : > { %6932 = vmatpush3.bf16.msra.mxu0 %v8443_v23 }
 0x9fe   : > { %6933 = vmatprep.subr.bf16.mxu0 %v9365_v4 }
 0xa01   : > { %6935 = vmatpush3.bf16.msra.mxu0 %v8463_v48 }
 0xa02   : > { %6936 = vmatprep.subr.bf16.mxu0 %v9365_v4 }
 0xa05   : > { %6938 = vmatpush3.bf16.msra.mxu0 %v8483_v8 }
 0xa06   : > { %6948 = vmatprep.subr.bf16.mxu0 %v9365_v4 }
 0xa6e   : > { %v1679_v25 = vpop.xlane.xlu1 %1678 }
 0xa6f   : > { %v1681_v48 = vadd.f32 %v8489_v12, %v1679_v25 }
 0xa71   : > { %v1682_v23 = vmul.f32 0.5, %v1681_v48 }
 0xa73   : > { %7592 = vtanh.f32 %v1682_v23 }
 0xa7d   : > { %v7593_v56 = vpop.eup %7592 }
 0xa7e   : > { %v1684_v19 = vadd.f32 1.0, %v7593_v56  ;;  %v9407_v56 = vmov 0.0  }
 0xa80   : > { %v8495_v63 = vmul.f32 0.5, %v1684_v19 }
 0xa82   : > { %9406 = vst [vmem:[#allocation19_spill] sm:$0xff] %v8495_v63  ;;  %v1686_v8 = vsub.f32 1.0, %v8495_v63 }
 0xa84   : > { %v1691_v62 = vrot.slane %v1686_v8, %v8171_v24  ;;  %v1695_v4 = vrot.slane %v1686_v8, %v8493_v61  ;;  %v1857_v8 = vpop.permute.xlu1 %1856 }
 0xa86   : > { %v1698_v29 = vmul.f32 %v1691_v62, %v8244_v60  ;;  %v1699_v25 = vmul.f32 %v1695_v4, %v8255_v46  ;;  %v4972_v4 = vld [vmem:[%s7830_s0 + $0x2] sm:$0x3] }
 0xa87   : > { %v1859_v60 = vsel %vm763_vm2, %v4972_v4, %v1857_v8 }
 0xa88   : > { %5872 = vmatmul.mubr.f32.vlgmr.msra.gmra.mrb[8].mxu1 %v1698_v29  ;;  %5907 = vmatmul.mubr.f32.vlgmr.msra.gmra.mrb[10].mxu0 %v1699_v25 }
 0xa89   : > { %6941 = vmatpush3.bf16.msra.mxu1 %v7849_v5  ;;  %5921 = vmatprep.mubr.msk.f32.mxu1 %vm7714_vm1, %v9407_v56 }
 0xa8a   : > { %6942 = vmatprep.subr.bf16.mxu1 %v9408_v16  ;;  %6950 = vmatpush3.bf16.msra.mxu0 %v7904_v35 }
 0xa8b   : > { %6951 = vmatprep.subr.bf16.mxu0 %v9408_v16  ;;  %5940 = vmatprep.mubr.msk.f32.mxu0 %vm7714_vm1, %v9407_v56 }
 0xa8d   : > { %6944 = vmatpush3.bf16.msra.mxu1 %v7861_v10 }
 0xa8e   : > { %6945 = vmatprep.subr.bf16.mxu1 %v9408_v16  ;;  %6953 = vmatpush3.bf16.msra.mxu0 %v7910_v37 }
 0xa8f   : > { %6954 = vmatprep.subr.bf16.mxu0 %v9408_v16 }
 0xa91   : > { %6947 = vmatpush3.bf16.msra.mxu1 %v7874_v13 }
 0xa92   : > { %6956 = vmatpush3.bf16.msra.mxu0 %v7920_v40  ;;  %6960 = vmatprep.subr.bf16.mxu1 %v9408_v16 }
 0xa93   : > { %6957 = vmatprep.subr.bf16.mxu0 %v9408_v16 }
 0xa94   : > { %5922 = vmatmul.mubr.msk.f32.vlgmr.msra.gmra.mrb[10].mxu1 %vm771_vm3, %v1859_v60 }
 0xa95   : > { %5975 = vmatprep.mubr.msk.f32.mxu1 %vm7714_vm1, %v9407_v56 }
 0xa96   : > { %6959 = vmatpush3.bf16.msra.mxu0 %v7931_v44 }
 0xa97   : > { %6992 = vmatprep.subr.bf16.mxu0 %v9408_v16 }
 0xa9a   : > { %6963 = vmatpush3.bf16.xpose.msk.msra.mxu1 %vm7963_vm6, %v7976_v11 }
 0xa9b   : > { %6964 = vmatprep.subr.bf16.mxu1 %v9408_v16 }
 0xaa2   : > { %6967 = vmatpush3.bf16.xpose.msk.msra.mxu1 %vm7963_vm6, %v8004_v21 }
 0xaa3   : > { %6968 = vmatprep.subr.bf16.mxu1 %v9408_v16 }
 0xaaa   : > { %6971 = vmatpush3.bf16.xpose.msk.msra.mxu1 %vm7963_vm6, %v8028_v27 }
 0xaab   : > { %6972 = vmatprep.subr.bf16.mxu1 %v9408_v16 }
 0xab1   : > { %v8537_v46 = vpop.f32.mrb[8].mxu0 }
 0xab2   : > { %9409 = vst [vmem:[#allocation20_spill] sm:$0xff] %v8537_v46  ;;  %v5838_v29 = vpop.f32.mrb[9].mxu0  ;;  %6975 = vmatpush3.bf16.xpose.msk.msra.mxu1 %vm7963_vm6, %v8052_v34 }
 0xab3   : > { %6976 = vmatprep.subr.bf16.mxu1 %v9408_v16 }
 0xaba   : > { %6979 = vmatpush3.bf16.xpose.msk.msra.mxu1 %vm7963_vm6, %v8076_v43 }
 0xabb   : > { %6980 = vmatprep.subr.bf16.mxu1 %v9408_v16 }
 0xac2   : > { %6983 = vmatpush3.bf16.xpose.msk.msra.mxu1 %vm7963_vm6, %v8100_v51 }
 0xac3   : > { %6984 = vmatprep.subr.bf16.mxu1 %v9408_v16 }
 0xaca   : > { %6987 = vmatpush3.bf16.xpose.msk.msra.mxu1 %vm7963_vm6, %v8124_v58 }
 0xacb   : > { %6988 = vmatprep.subr.bf16.mxu1 %v9408_v16 }
 0xad2   : > { %6991 = vmatpush3.bf16.xpose.msk.msra.mxu1 %vm7963_vm6, %v8148_v1 }
 0xad3   : > { %7024 = vmatprep.subr.bf16.mxu1 %v9408_v16 }
 0xb5b   : > { %v1766_v62 = vpop.f32.mrb[8].mxu1  ;;  %v1836_v19 = vpop.f32.mrb[10].mxu0 }
 0xb5c   : > { %v1843_v23 = vrot.slane %v1836_v19, 7  ;;  %v5873_v48 = vpop.f32.mrb[9].mxu1  ;;  %v5908_v25 = vpop.f32.mrb[11].mxu0 }
 0xb5e   : > { %v8560_v4 = vsel %vm1502_vm8, %v1843_v23, %v1766_v62 }
 0xb5f   : > { %9410 = vst [vmem:[#allocation21_spill] sm:$0xff] %v8560_v4 }
 0xb67   : > { %v1929_v8 = vpop.f32.mrb[10].mxu1 }
 0xb68   : > { %v1930_v60 = vadd.f32 %v7887_v17, %v1929_v8  ;;  %v5923_v29 = vpop.f32.mrb[11].mxu1 }
 0xb6a   : > { %7594 = vtanh.f32 %v1930_v60  ;;  %v1933_v46 = vmul.f32 0.5, %v1930_v60 }
 0xb6c   : > { %7596 = vtanh.f32 %v1933_v46 }
 0xb74   : > { %v7595_v63 = vpop.eup %7594 }
 0xb75   : > { %1940 = vrot.lane.b32.xlu0 %v7595_v63, %s9411_s29 }
 0xb76   : > { %v7597_v44 = vpop.eup %7596 }
 0xb77   : > { %v1935_v40 = vadd.f32 1.0, %v7597_v44 }
 0xb79   : > { %v1936_v13 = vmul.f32 0.5, %v1935_v40 }
 0xb7b   : > { %v1938_v62 = vmul.f32 %v1936_v13, %v7892_v31 }
 0xbe7   : > { %v1941_v37 = vpop.permute.xlu0 %1940 }
 0xbe8   : > { %v1943_v19 = vmul.f32 %v1941_v37, %v1936_v13 }
 0xbea   : > { %1945 = vrot.lane.b32.xlu1 %v1943_v19, %s9412_s27 }
 0xc5c   : > { %v1946_v23 = vpop.permute.xlu1 %1945 }
 0xc5d   : > { %v8566_v48 = vadd.f32 %v1946_v23, %v1938_v62 }
 0xc5f   : > { %7598 = vtanh.f32 %v8566_v48 }
 0xc69   : > { %v7599_v17 = vpop.eup %7598 }
 0xc6a   : > { %1951 = vrot.lane.b32.xlu0 %v7599_v17, %s9411_s29 }
 0xc6e   : > { %1959 = vrot.lane.b32.xlu0 %v8166_v20, %s9411_s29 }
 0xcdc   : > { %v1952_v63 = vpop.permute.xlu0 %1951 }
 0xcdd   : > { %v8572_v44 = vmul.f32 %v1952_v63, %v1936_v13 }
 0xcdf   : > { %1956 = vrot.lane.b32.xlu1 %v8572_v44, %s9412_s27 }
 0xce0   : > { %v1960_v37 = vpop.permute.xlu0 %1959 }
 0xd51   : > { %v1957_v40 = vpop.permute.xlu1 %1956 }
 0xd52   : > { %v1962_v31 = vsel %vm879_vm4, %v1957_v40, %v1960_v37 }
 0xd53   : > { %5941 = vmatmul.mubr.msk.f32.vlgmr.msra.gmra.mrb[12].mxu0 %vm887_vm5, %v1962_v31 }
 0xd54   : > { %6995 = vmatpush3.bf16.xpose.msk.msra.mxu0 %vm7963_vm6, %v7981_v15  ;;  %6010 = vmatprep.mubr.msk.f32.mxu0 %vm7714_vm1, %v9407_v56 }
 0xd55   : > { %6996 = vmatprep.subr.bf16.mxu0 %v9408_v16 }
 0xd5c   : > { %6999 = vmatpush3.bf16.xpose.msk.msra.mxu0 %vm7963_vm6, %v8006_v22 }
 0xd5d   : > { %7000 = vmatprep.subr.bf16.mxu0 %v9408_v16 }
 0xd64   : > { %7003 = vmatpush3.bf16.xpose.msk.msra.mxu0 %vm7963_vm6, %v8030_v28 }
 0xd65   : > { %7004 = vmatprep.subr.bf16.mxu0 %v9408_v16 }
 0xd6c   : > { %7007 = vmatpush3.bf16.xpose.msk.msra.mxu0 %vm7963_vm6, %v8054_v36 }
 0xd6d   : > { %7008 = vmatprep.subr.bf16.mxu0 %v9408_v16 }
 0xd74   : > { %7011 = vmatpush3.bf16.xpose.msk.msra.mxu0 %vm7963_vm6, %v8078_v45 }
 0xd75   : > { %7012 = vmatprep.subr.bf16.mxu0 %v9408_v16 }
 0xd7c   : > { %7015 = vmatpush3.bf16.xpose.msk.msra.mxu0 %vm7963_vm6, %v8102_v53 }
 0xd7d   : > { %7016 = vmatprep.subr.bf16.mxu0 %v9408_v16 }
 0xd84   : > { %7019 = vmatpush3.bf16.xpose.msk.msra.mxu0 %vm7963_vm6, %v8126_v59 }
 0xd85   : > { %7020 = vmatprep.subr.bf16.mxu0 %v9408_v16 }
 0xd8c   : > { %7023 = vmatpush3.bf16.xpose.msk.msra.mxu0 %vm7963_vm6, %v8150_v6 }
 0xd8d   : > { %7048 = vmatprep.subr.bf16.mxu0 %v9408_v16 }
 0xe26   : > { %v2032_v13 = vpop.f32.mrb[12].mxu0 }
 0xe27   : > { %v2033_v20 = vadd.f32 %v7949_v52, %v2032_v13  ;;  %v5942_v46 = vpop.f32.mrb[13].mxu0 }
 0xe29   : > { %7600 = vtanh.f32 %v2033_v20  ;;  %v2036_v8 = vmul.f32 0.5, %v2033_v20 }
 0xe2b   : > { %7602 = vtanh.f32 %v2036_v8 }
 0xe33   : > { %v7601_v25 = vpop.eup %7600 }
 0xe34   : > { %2043 = vrot.lane.b32.xlu1 %v7601_v25, %s9411_s29 }
 0xe35   : > { %v7603_v60 = vpop.eup %7602 }
 0xe36   : > { %v2038_v29 = vadd.f32 1.0, %v7603_v60 }
 0xe38   : > { %v2039_v19 = vmul.f32 0.5, %v2038_v29 }
 0xe3a   : > { %v2041_v17 = vmul.f32 %v2039_v19, %v7958_v2 }
 0xea6   : > { %v2044_v62 = vpop.permute.xlu1 %2043 }
 0xea7   : > { %v2046_v23 = vmul.f32 %v2044_v62, %v2039_v19 }
 0xea9   : > { %2048 = vrot.lane.b32.xlu0 %v2046_v23, %s9412_s27 }
 0xf1b   : > { %v2049_v63 = vpop.permute.xlu0 %2048 }
 0xf1c   : > { %v8616_v37 = vadd.f32 %v2049_v63, %v2041_v17 }
 0xf1e   : > { %7604 = vtanh.f32 %v8616_v37 }
 0xf28   : > { %v7605_v52 = vpop.eup %7604 }
 0xf29   : > { %2054 = vrot.lane.b32.xlu1 %v7605_v52, %s9411_s29 }
 0xf9b   : > { %v2055_v40 = vpop.permute.xlu1 %2054 }
 0xf9c   : > { %v8620_v31 = vmul.f32 %v2055_v40, %v2039_v19 }
 0xf9e   : > { %v2065_v13 = vrot.slane %v8620_v31, %v8163_v18 }
 0xfa0   : > { %v2066_v20 = vcombine.high %v2065_v13, %v2065_v13  ;;  %v2073_v46 = vrot.slane %v2065_v13, %v8163_v18 }
 0xfa2   : > { %v2084_v25 = vrot.slane %v2073_v46, %v8171_v24  ;;  %v2080_v2 = vrot.slane %v2066_v20, %v8163_v18 }
 0xfa4   : > { %2085 = vrot.lane.b32.xlu1 %v2084_v25, %s9412_s27  ;;  %v2162_v8 = vrot.slane %v2080_v2, %v8171_v24 }
 0xfa6   : > { %2163 = vrot.lane.b32.xlu0 %v2162_v8, %s9412_s27 }
0x1016   : > { %v2086_v60 = vpop.permute.xlu1 %2085 }
0x1017   : > { %5976 = vmatmul.mubr.msk.f32.vlgmr.msra.gmra.mrb[12].mxu1 %vm879_vm4, %v2086_v60 }
0x1018   : > { %v2164_v29 = vpop.permute.xlu0 %2163  ;;  %7026 = vmatpush3.bf16.msra.mxu1 %v7976_v11  ;;  %6045 = vmatprep.mubr.msk.f32.mxu1 %vm7714_vm1, %v9407_v56 }
0x1019   : > { %6011 = vmatmul.mubr.msk.f32.vlgmr.msra.gmra.mrb[14].mxu0 %vm879_vm4, %v2164_v29  ;;  %7027 = vmatprep.subr.bf16.mxu1 %v9408_v16 }
0x101a   : > { %7050 = vmatpush3.bf16.msra.mxu0 %v7981_v15  ;;  %6080 = vmatprep.mubr.msk.f32.mxu0 %vm7714_vm1, %v9407_v56 }
0x101b   : > { %7051 = vmatprep.subr.bf16.mxu0 %v9408_v16 }
0x101c   : > { %7029 = vmatpush3.bf16.msra.mxu1 %v8004_v21 }
0x101d   : > { %7030 = vmatprep.subr.bf16.mxu1 %v9408_v16 }
0x101e   : > { %7053 = vmatpush3.bf16.msra.mxu0 %v8006_v22 }
0x101f   : > { %7054 = vmatprep.subr.bf16.mxu0 %v9408_v16 }
0x1020   : > { %7032 = vmatpush3.bf16.msra.mxu1 %v8028_v27 }
0x1021   : > { %7033 = vmatprep.subr.bf16.mxu1 %v9408_v16 }
0x1022   : > { %7056 = vmatpush3.bf16.msra.mxu0 %v8030_v28 }
0x1023   : > { %7057 = vmatprep.subr.bf16.mxu0 %v9408_v16 }
0x1024   : > { %7035 = vmatpush3.bf16.msra.mxu1 %v8052_v34 }
0x1025   : > { %7036 = vmatprep.subr.bf16.mxu1 %v9408_v16 }
0x1026   : > { %7059 = vmatpush3.bf16.msra.mxu0 %v8054_v36 }
0x1027   : > { %7060 = vmatprep.subr.bf16.mxu0 %v9408_v16 }
0x1028   : > { %7038 = vmatpush3.bf16.msra.mxu1 %v8076_v43 }
0x1029   : > { %7039 = vmatprep.subr.bf16.mxu1 %v9408_v16 }
0x102a   : > { %7062 = vmatpush3.bf16.msra.mxu0 %v8078_v45 }
0x102b   : > { %7063 = vmatprep.subr.bf16.mxu0 %v9408_v16 }
0x102c   : > { %7041 = vmatpush3.bf16.msra.mxu1 %v8100_v51 }
0x102d   : > { %7042 = vmatprep.subr.bf16.mxu1 %v9408_v16 }
0x102e   : > { %7065 = vmatpush3.bf16.msra.mxu0 %v8102_v53 }
0x102f   : > { %7066 = vmatprep.subr.bf16.mxu0 %v9408_v16 }
0x1030   : > { %7044 = vmatpush3.bf16.msra.mxu1 %v8124_v58 }
0x1031   : > { %7045 = vmatprep.subr.bf16.mxu1 %v9408_v16 }
0x1032   : > { %7068 = vmatpush3.bf16.msra.mxu0 %v8126_v59 }
0x1033   : > { %7069 = vmatprep.subr.bf16.mxu0 %v9408_v16 }
0x1034   : > { %7047 = vmatpush3.bf16.msra.mxu1 %v8148_v1 }
0x1035   : > { %7072 = vmatprep.subr.bf16.mxu1 %v9408_v16 }
0x1036   : > { %7071 = vmatpush3.bf16.msra.mxu0 %v8150_v6 }
0x1037   : > { %7078 = vmatprep.subr.bf16.mxu0 %v9408_v16 }
0x10ea   : > { %v2155_v19 = vpop.f32.mrb[12].mxu1 }
0x10eb   : > { %v2156_v62 = vadd.f32 %v2155_v19, %v8220_v38  ;;  %v5977_v23 = vpop.f32.mrb[13].mxu1 }
0x10ec   : > { %v2233_v17 = vpop.f32.mrb[14].mxu0 }
0x10ed   : > { %v2234_v63 = vadd.f32 %v2233_v17, %v8220_v38  ;;  %v6012_v52 = vpop.f32.mrb[15].mxu0  ;;  %v2237_v40 = vsel %vm1262_vm7, %v2156_v62, -inf }
0x10ee   : > { %2238 = vmax.xlane.f32.xlu1 %v2237_v40 }
0x10ef   : > { %v2240_v13 = vsel %vm1262_vm7, %v2234_v63, -inf }
0x10f0   : > { %2241 = vmax.xlane.f32.xlu0 %v2240_v13 }
0x10ff   : > { %2399 = vrot.lane.b32.xlu1 %v8620_v31, %s9412_s27 }
0x117b   : > { %v2239_v20 = vpop.xlane.xlu1 %2238 }
0x117c   : > { %v2243_v46 = vsub.f32 %v2156_v62, %v2239_v20 }
0x117d   : > { %v2242_v25 = vpop.xlane.xlu0 %2241 }
0x117e   : > { %v2244_v2 = vsub.f32 %v2234_v63, %v2242_v25  ;;  %v2245_v8 = vmul.f32 1.442695, %v2243_v46 }
0x117f   : > { %v2400_v25 = vpop.permute.xlu1 %2399 }
0x1180   : > { %v2247_v60 = vmul.f32 1.442695, %v2244_v2 }
0x1182   : > { %7606 = vpow2.f32 %v2247_v60 }
0x1183   : > { %7608 = vpow2.f32 %v2245_v8 }
0x118c   : > { %v7607_v29 = vpop.eup %7606 }
0x118d   : > { %v2252_v38 = vsel %vm1262_vm7, %v7607_v29, 0.0  ;;  %v7609_v19 = vpop.eup %7608 }
0x118e   : > { %2253 = vadd.xlane.f32.xlu0 %v2252_v38  ;;  %v2249_v23 = vsel %vm1262_vm7, %v7609_v19, 0.0 }
0x1192   : > { %2250 = vadd.xlane.f32.xlu0 %v2249_v23 }
0x121b   : > { %v2254_v17 = vpop.xlane.xlu0 %2253 }
0x121c   : > { %7610 = vrcp.f32 %v2254_v17 }
0x121f   : > { %v2251_v52 = vpop.xlane.xlu0 %2250 }
0x1220   : > { %7612 = vrcp.f32 %v2251_v52 }
0x1226   : > { %v7611_v62 = vpop.eup %7610 }
0x1227   : > { %v8676_v40 = vmul.f32 %v7611_v62, %v7607_v29 }
0x1229   : > { %6081 = vmatmul.mubr.f32.vlgmr.msra.gmra.mrb[16].mxu0 %v8676_v40  ;;  %v2809_v13 = vrot.slane %v8676_v40, 7 }
0x122a   : > { %v7613_v63 = vpop.eup %7612  ;;  %7080 = vmatpush3.bf16.msra.mxu0 %v8252_v42  ;;  %6102 = vmatprep.mubr.msk.f32.mxu0 %vm7714_vm1, %v9407_v56 }
0x122b   : > { %v8683_v20 = vmul.f32 %v7613_v63, %v7609_v19  ;;  %7081 = vmatprep.subr.bf16.mxu0 %v9408_v16 }
0x122d   : > { %6046 = vmatmul.mubr.f32.vlgmr.msra.gmra.mrb[14].mxu1 %v8683_v20  ;;  %v2810_v46 = vsel %vm1502_vm8, %v2809_v13, %v8683_v20 }
0x122e   : > { %5013 = vst [vmem:[%s7840_s22 + $0x2] sm:$0x3] %v2810_v46  ;;  %7074 = vmatpush3.bf16.msra.mxu1 %v8242_v32  ;;  %6091 = vmatprep.mubr.msk.f32.mxu1 %vm7714_vm1, %v9407_v56 }
0x122f   : > { %7075 = vmatprep.subr.bf16.mxu1 %v9408_v16  ;;  %7083 = vmatpush3.bf16.msra.mxu0 %v8283_v57 }
0x1230   : > { %7090 = vmatprep.subr.bf16.mxu0 %v9408_v16 }
0x1232   : > { %7077 = vmatpush3.bf16.msra.mxu1 %v8258_v47 }
0x1233   : > { %7084 = vmatprep.subr.bf16.mxu1 %v9408_v16 }
0x1235   : > { %6092 = vmatmul.mubr.msk.f32.vlgmr.msra.gmra.mrb[16].mxu1 %vm879_vm4, %v2400_v25 }
0x1236   : > { %7086 = vmatpush3.bf16.msra.mxu1 %v8300_v26  ;;  %6113 = vmatprep.mubr.msk.f32.mxu1 %vm7714_vm1, %v9407_v56 }
0x1237   : > { %7087 = vmatprep.subr.bf16.mxu1 %v9408_v16 }
0x123a   : > { %7089 = vmatpush3.bf16.msra.mxu1 %v8306_v30 }
0x123b   : > { %7114 = vmatprep.subr.bf16.mxu1 %v9408_v16 }
0x12fc   : > { %v2395_v2 = vpop.f32.mrb[16].mxu0 }
0x12fd   : > { %v6082_v8 = vpop.f32.mrb[17].mxu0  ;;  %v2475_v60 = vrot.slane %v2395_v2, 7 }
0x12fe   : > { %v9413_v8 = vld [vmem:[#allocation12_spill] sm:$0xff] }
0x1300   : > { %v2325_v29 = vpop.f32.mrb[14].mxu1 }
0x1301   : > { %v2476_v38 = vsel %vm1502_vm8, %v2475_v60, %v2325_v29  ;;  %v6047_v19 = vpop.f32.mrb[15].mxu1  ;;  %v9415_v60 = vld [vmem:[#allocation14_spill] sm:$0xff]  ;;  %v9417_v29 = vld [vmem:[#allocation16_spill] sm:$0xff] }
0x1302   : > { %6103 = vmatmul.mubr.msk.f32.vlgmr.msra.gmra.mrb[18].mxu0 %vm879_vm4, %v2476_v38  ;;  %v9418_v38 = vld [vmem:[#allocation17_spill] sm:$0xff]  ;;  %v9419_v19 = vld [vmem:[#allocation18_spill] sm:$0xff] }
0x1303   : > { %7092 = vmatpush3.bf16.msra.mxu0 %v8317_v41  ;;  %6148 = vmatprep.mubr.msk.f32.mxu0 %vm7714_vm1, %v9407_v56 }
0x1304   : > { %7093 = vmatprep.subr.bf16.mxu0 %v9408_v16 }
0x1307   : > { %7095 = vmatpush3.bf16.msra.mxu0 %v8326_v54 }
0x1308   : > { %v2469_v23 = vpop.f32.mrb[16].mxu1  ;;  %7096 = vmatprep.subr.bf16.mxu0 %v9408_v16 }
0x1309   : > { %v6093_v17 = vpop.f32.mrb[17].mxu1 }
0x130b   : > { %7098 = vmatpush3.bf16.msra.mxu0 %v8373_v50 }
0x130c   : > { %7099 = vmatprep.subr.bf16.mxu0 %v9408_v16 }
0x130f   : > { %7101 = vmatpush3.bf16.msra.mxu0 %v8394_v7 }
0x1310   : > { %7102 = vmatprep.subr.bf16.mxu0 %v9408_v16 }
0x1313   : > { %7104 = vmatpush3.bf16.msra.mxu0 %v8414_v33 }
0x1314   : > { %7105 = vmatprep.subr.bf16.mxu0 %v9408_v16 }
0x1317   : > { %7107 = vmatpush3.bf16.msra.mxu0 %v8434_v0 }
0x1318   : > { %7108 = vmatprep.subr.bf16.mxu0 %v9408_v16 }
0x131b   : > { %7110 = vmatpush3.bf16.msra.mxu0 %v8454_v49 }
0x131c   : > { %7111 = vmatprep.subr.bf16.mxu0 %v9408_v16 }
0x131f   : > { %7113 = vmatpush3.bf16.msra.mxu0 %v8474_v39 }
0x1320   : > { %7138 = vmatprep.subr.bf16.mxu0 %v9408_v16 }
0x13d5   : > { %v2545_v52 = vpop.f32.mrb[18].mxu0 }
0x13d6   : > { %v2546_v62 = vadd.f32 %v2545_v52, %v2469_v23  ;;  %v6104_v63 = vpop.f32.mrb[19].mxu0 }
0x13d8   : > { %v2549_v13 = vadd.f32 %v2546_v62, %v8334_v55  ;;  %v9414_v55 = vld [vmem:[#allocation13_spill] sm:$0xff] }
0x13da   : > { %7614 = vtanh.f32 %v2549_v13 }
0x13e4   : > { %v7615_v46 = vpop.eup %7614 }
0x13e5   : > { %6114 = vmatmul.mubr.msk.f32.vlgmr.msra.gmra.mrb[18].mxu1 %vm879_vm4, %v7615_v46  ;;  %v2635_v25 = vmul.f32 %v7615_v46, %v8346_v9  ;;  %v9416_v9 = vld [vmem:[#allocation15_spill] sm:$0xff] }
0x13e6   : > { %7116 = vmatpush3.bf16.msra.mxu1 %v8348_v14  ;;  %6183 = vmatprep.mubr.msk.f32.mxu1 %vm7714_vm1, %v9407_v56 }
0x13e7   : > { %v2636_v2 = vsel %vm1676_vm9, %v2635_v25, 0.0  ;;  %7117 = vmatprep.subr.bf16.mxu1 %v9408_v16 }
0x13e8   : > { %2637 = vadd.xlane.f32.xlu0 %v2636_v2 }
0x13ea   : > { %7119 = vmatpush3.bf16.msra.mxu1 %v9413_v8 }
0x13eb   : > { %7120 = vmatprep.subr.bf16.mxu1 %v9408_v16 }
0x13ee   : > { %7122 = vmatpush3.bf16.msra.mxu1 %v9414_v55 }
0x13ef   : > { %7123 = vmatprep.subr.bf16.mxu1 %v9408_v16 }
0x13f2   : > { %7125 = vmatpush3.bf16.msra.mxu1 %v9415_v60 }
0x13f3   : > { %7126 = vmatprep.subr.bf16.mxu1 %v9408_v16 }
0x13f6   : > { %7128 = vmatpush3.bf16.msra.mxu1 %v9416_v9 }
0x13f7   : > { %7129 = vmatprep.subr.bf16.mxu1 %v9408_v16 }
0x13fa   : > { %7131 = vmatpush3.bf16.msra.mxu1 %v9417_v29 }
0x13fb   : > { %7132 = vmatprep.subr.bf16.mxu1 %v9408_v16 }
0x13fe   : > { %2816 = vrot.lane.b32.xlu0 %v8572_v44, %s7719_s18  ;;  %7134 = vmatpush3.bf16.msra.mxu1 %v9418_v38 }
0x13ff   : > { %7135 = vmatprep.subr.bf16.mxu1 %v9408_v16 }
0x1402   : > { %7137 = vmatpush3.bf16.msra.mxu1 %v9419_v19 }
0x1403   : > { %7147 = vmatprep.subr.bf16.mxu1 %v9408_v16 }
0x1475   : > { %v2638_v23 = vpop.xlane.xlu0 %2637 }
0x1476   : > { %v2639_v17 = vadd.f32 %v2638_v23, %v8489_v12  ;;  %v9422_v23 = vld [vmem:[#allocation6_spill] sm:$0xff] }
0x1478   : > { %v2640_v52 = vmul.f32 0.5, %v2639_v17  ;;  %v9423_v17 = vld [vmem:[#allocation8_spill] sm:$0xff] }
0x147a   : > { %7616 = vtanh.f32 %v2640_v52 }
0x1484   : > { %v7617_v62 = vpop.eup %7616 }
0x1485   : > { %v2642_v63 = vadd.f32 1.0, %v7617_v62  ;;  %v9424_v62 = vld [vmem:[#allocation9_spill] sm:$0xff] }
0x1487   : > { %v8750_v13 = vmul.f32 0.5, %v2642_v63 }
0x1489   : > { %9420 = vst [vmem:[#allocation12_spill] sm:$0xff] %v8750_v13  ;;  %v2644_v46 = vsub.f32 1.0, %v8750_v13  ;;  %v8820_v13 = vld [vmem:[%s9336_s6] ss:$0 sm:$0xff] }
0x148b   : > { %v2649_v44 = vrot.slane %v2644_v46, %v8171_v24  ;;  %v2653_v25 = vrot.slane %v2644_v46, %v8493_v61 }
0x148d   : > { %v2656_v2 = vmul.f32 %v2649_v44, %v8683_v20  ;;  %v2657_v4 = vmul.f32 %v2653_v25, %v8676_v40  ;;  %v9421_v40 = vld [vmem:[#allocation7_spill] sm:$0xff]  ;;  %v2817_v20 = vpop.permute.xlu0 %2816 }
0x148f   : > { %6149 = vmatmul.mubr.f32.vlgmr.msra.gmra.mrb[20].mxu0 %v2656_v2  ;;  %6184 = vmatmul.mubr.f32.vlgmr.msra.gmra.mrb[20].mxu1 %v2657_v4  ;;  %v5014_v4 = vld [vmem:[%s7830_s0 + $0x4] sm:$0x3] }
0x1490   : > { %7140 = vmatpush3.bf16.msra.mxu0 %v7849_v5  ;;  %6198 = vmatprep.mubr.msk.f32.mxu0 %vm7714_vm1, %v9407_v56  ;;  %v2819_v52 = vsel %vm763_vm2, %v5014_v4, %v2817_v20 }
0x1491   : > { %7141 = vmatprep.subr.bf16.mxu0 %v9408_v16  ;;  %7149 = vmatpush3.bf16.msra.mxu1 %v7904_v35 }
0x1492   : > { %7150 = vmatprep.subr.bf16.mxu1 %v9408_v16  ;;  %6217 = vmatprep.mubr.msk.f32.mxu1 %vm7714_vm1, %v9407_v56 }
0x1494   : > { %7143 = vmatpush3.bf16.msra.mxu0 %v7861_v10 }
0x1495   : > { %7144 = vmatprep.subr.bf16.mxu0 %v9408_v16  ;;  %7152 = vmatpush3.bf16.msra.mxu1 %v9421_v40 }
0x1496   : > { %7153 = vmatprep.subr.bf16.mxu1 %v9408_v16 }
0x1498   : > { %7146 = vmatpush3.bf16.msra.mxu0 %v9422_v23 }
0x1499   : > { %7155 = vmatpush3.bf16.msra.mxu1 %v9423_v17  ;;  %7159 = vmatprep.subr.bf16.mxu0 %v9408_v16 }
0x149a   : > { %7156 = vmatprep.subr.bf16.mxu1 %v9408_v16 }
0x149b   : > { %6199 = vmatmul.mubr.msk.f32.vlgmr.msra.gmra.mrb[22].mxu0 %vm771_vm3, %v2819_v52 }
0x149c   : > { %6252 = vmatprep.mubr.msk.f32.mxu0 %vm7714_vm1, %v9407_v56 }
0x149d   : > { %7158 = vmatpush3.bf16.msra.mxu1 %v9424_v62 }
0x149e   : > { %7191 = vmatprep.subr.bf16.mxu1 %v9408_v16 }
0x14a1   : > { %7162 = vmatpush3.bf16.xpose.msk.msra.mxu0 %vm7963_vm6, %v7976_v11 }
0x14a2   : > { %7163 = vmatprep.subr.bf16.mxu0 %v9408_v16 }
0x14a9   : > { %7166 = vmatpush3.bf16.xpose.msk.msra.mxu0 %vm7963_vm6, %v8004_v21 }
0x14aa   : > { %7167 = vmatprep.subr.bf16.mxu0 %v9408_v16 }
0x14b1   : > { %7170 = vmatpush3.bf16.xpose.msk.msra.mxu0 %vm7963_vm6, %v8028_v27 }
0x14b2   : > { %7171 = vmatprep.subr.bf16.mxu0 %v9408_v16 }
0x14b8   : > { %v8792_v63 = vpop.f32.mrb[18].mxu1 }
0x14b9   : > { %9425 = vst [vmem:[#allocation13_spill] sm:$0xff] %v8792_v63  ;;  %v6115_v46 = vpop.f32.mrb[19].mxu1  ;;  %7174 = vmatpush3.bf16.xpose.msk.msra.mxu0 %vm7963_vm6, %v8052_v34 }
0x14ba   : > { %7175 = vmatprep.subr.bf16.mxu0 %v9408_v16 }
0x14c1   : > { %7178 = vmatpush3.bf16.xpose.msk.msra.mxu0 %vm7963_vm6, %v8076_v43 }
0x14c2   : > { %7179 = vmatprep.subr.bf16.mxu0 %v9408_v16 }
0x14c9   : > { %7182 = vmatpush3.bf16.xpose.msk.msra.mxu0 %vm7963_vm6, %v8100_v51 }
0x14ca   : > { %7183 = vmatprep.subr.bf16.mxu0 %v9408_v16 }
0x14d1   : > { %7186 = vmatpush3.bf16.xpose.msk.msra.mxu0 %vm7963_vm6, %v8124_v58 }
0x14d2   : > { %7187 = vmatprep.subr.bf16.mxu0 %v9408_v16 }
0x14d9   : > { %7190 = vmatpush3.bf16.xpose.msk.msra.mxu0 %vm7963_vm6, %v8148_v1 }
0x14da   : > { %7223 = vmatprep.subr.bf16.mxu0 %v9408_v16 }
0x1562   : > { %v2724_v44 = vpop.f32.mrb[20].mxu0  ;;  %v2794_v25 = vpop.f32.mrb[20].mxu1 }
0x1563   : > { %v2801_v2 = vrot.slane %v2794_v25, 7  ;;  %v6150_v4 = vpop.f32.mrb[21].mxu0  ;;  %v6185_v20 = vpop.f32.mrb[21].mxu1 }
0x1565   : > { %v8815_v52 = vsel %vm1502_vm8, %v2801_v2, %v2724_v44 }
0x1566   : > { %9426 = vst [vmem:[#allocation14_spill] sm:$0xff] %v8815_v52 }
0x156e   : > { %v2889_v46 = vpop.f32.mrb[22].mxu0 }
0x156f   : > { %v2890_v63 = vadd.f32 %v8820_v13, %v2889_v46  ;;  %v6200_v62 = vpop.f32.mrb[23].mxu0 }
0x1571   : > { %7618 = vtanh.f32 %v2890_v63  ;;  %v2893_v23 = vmul.f32 0.5, %v2890_v63 }
0x1573   : > { %7620 = vtanh.f32 %v2893_v23 }
0x157b   : > { %v7619_v17 = vpop.eup %7618 }
0x157c   : > { %2900 = vrot.lane.b32.xlu1 %v7619_v17, %s9411_s29 }
0x157d   : > { %v7621_v25 = vpop.eup %7620 }
0x157e   : > { %v2895_v4 = vadd.f32 1.0, %v7621_v25 }
0x1580   : > { %v2896_v20 = vmul.f32 0.5, %v2895_v4 }
0x1582   : > { %v2898_v52 = vmul.f32 %v2896_v20, %v8566_v48 }
0x15ee   : > { %v2901_v44 = vpop.permute.xlu1 %2900 }
0x15ef   : > { %v2903_v2 = vmul.f32 %v2901_v44, %v2896_v20 }
0x15f1   : > { %2905 = vrot.lane.b32.xlu1 %v2903_v2, %s9412_s27 }
0x1663   : > { %v2906_v40 = vpop.permute.xlu1 %2905 }
0x1664   : > { %v8826_v10 = vadd.f32 %v2906_v40, %v2898_v52  ;;  %v8875_v40 = vld [vmem:[%s9338_s8] ss:$0 sm:$0xff] }
0x1665   : > { %9428 = vst [vmem:[#allocation16_spill] sm:$0xff] %v8875_v40 }
0x1666   : > { %9427 = vst [vmem:[#allocation15_spill] sm:$0xff] %v8826_v10  ;;  %7622 = vtanh.f32 %v8826_v10 }
0x1670   : > { %v7623_v62 = vpop.eup %7622 }
0x1671   : > { %2911 = vrot.lane.b32.xlu1 %v7623_v62, %s9411_s29 }
0x1675   : > { %2919 = vrot.lane.b32.xlu1 %v8620_v31, %s9411_s29 }
0x16e3   : > { %v2912_v23 = vpop.permute.xlu1 %2911 }
0x16e4   : > { %v8832_v17 = vmul.f32 %v2912_v23, %v2896_v20 }
0x16e6   : > { %2916 = vrot.lane.b32.xlu0 %v8832_v17, %s9412_s27 }
0x16e7   : > { %v2920_v63 = vpop.permute.xlu1 %2919 }
0x1758   : > { %v2917_v46 = vpop.permute.xlu0 %2916 }
0x1759   : > { %v2922_v48 = vsel %vm879_vm4, %v2917_v46, %v2920_v63 }
0x175a   : > { %6218 = vmatmul.mubr.msk.f32.vlgmr.msra.gmra.mrb[22].mxu1 %vm887_vm5, %v2922_v48 }
0x175b   : > { %7194 = vmatpush3.bf16.xpose.msk.msra.mxu1 %vm7963_vm6, %v7981_v15  ;;  %6287 = vmatprep.mubr.msk.f32.mxu1 %vm7714_vm1, %v9407_v56 }
0x175c   : > { %7195 = vmatprep.subr.bf16.mxu1 %v9408_v16 }
0x1763   : > { %7198 = vmatpush3.bf16.xpose.msk.msra.mxu1 %vm7963_vm6, %v8006_v22 }
0x1764   : > { %7199 = vmatprep.subr.bf16.mxu1 %v9408_v16 }
0x176b   : > { %7202 = vmatpush3.bf16.xpose.msk.msra.mxu1 %vm7963_vm6, %v8030_v28 }
0x176c   : > { %7203 = vmatprep.subr.bf16.mxu1 %v9408_v16 }
0x1773   : > { %7206 = vmatpush3.bf16.xpose.msk.msra.mxu1 %vm7963_vm6, %v8054_v36 }
0x1774   : > { %7207 = vmatprep.subr.bf16.mxu1 %v9408_v16 }
0x177b   : > { %7210 = vmatpush3.bf16.xpose.msk.msra.mxu1 %vm7963_vm6, %v8078_v45 }
0x177c   : > { %7211 = vmatprep.subr.bf16.mxu1 %v9408_v16 }
0x1783   : > { %7214 = vmatpush3.bf16.xpose.msk.msra.mxu1 %vm7963_vm6, %v8102_v53 }
0x1784   : > { %7215 = vmatprep.subr.bf16.mxu1 %v9408_v16 }
0x178b   : > { %7218 = vmatpush3.bf16.xpose.msk.msra.mxu1 %vm7963_vm6, %v8126_v59 }
0x178c   : > { %7219 = vmatprep.subr.bf16.mxu1 %v9408_v16 }
0x1793   : > { %7222 = vmatpush3.bf16.xpose.msk.msra.mxu1 %vm7963_vm6, %v8150_v6 }
0x1794   : > { %7247 = vmatprep.subr.bf16.mxu1 %v9408_v16 }
0x182d   : > { %v2992_v31 = vpop.f32.mrb[22].mxu1 }
0x182e   : > { %v2993_v52 = vadd.f32 %v8875_v40, %v2992_v31  ;;  %v6219_v25 = vpop.f32.mrb[23].mxu1 }
0x1830   : > { %7624 = vtanh.f32 %v2993_v52  ;;  %v2996_v20 = vmul.f32 0.5, %v2993_v52 }
0x1832   : > { %7626 = vtanh.f32 %v2996_v20 }
0x183a   : > { %v7625_v4 = vpop.eup %7624 }
0x183b   : > { %3003 = vrot.lane.b32.xlu0 %v7625_v4, %s9411_s29 }
0x183c   : > { %v7627_v44 = vpop.eup %7626 }
0x183d   : > { %v2998_v2 = vadd.f32 1.0, %v7627_v44 }
0x183f   : > { %v2999_v62 = vmul.f32 0.5, %v2998_v2 }
0x1841   : > { %v3001_v46 = vmul.f32 %v2999_v62, %v8616_v37 }
0x18ad   : > { %v3004_v23 = vpop.permute.xlu0 %3003 }
0x18ae   : > { %v3006_v63 = vmul.f32 %v3004_v23, %v2999_v62 }
0x18b0   : > { %3008 = vrot.lane.b32.xlu1 %v3006_v63, %s9412_s27 }
0x1922   : > { %v3009_v48 = vpop.permute.xlu1 %3008 }
0x1923   : > { %v8881_v10 = vadd.f32 %v3009_v48, %v3001_v46  ;;  %v8936_v48 = vld [vmem:[%s9332_s2] sm:$0x1] }
0x1925   : > { %9429 = vst [vmem:[#allocation17_spill] sm:$0xff] %v8881_v10  ;;  %7628 = vtanh.f32 %v8881_v10 }
0x192c   : > { %v9439_v3 = vld [vmem:[#allocation17_spill] sm:$0xff] }
0x192f   : > { %v7629_v31 = vpop.eup %7628 }
0x1930   : > { %3014 = vrot.lane.b32.xlu0 %v7629_v31, %s9411_s29 }
0x19a2   : > { %v3015_v25 = vpop.permute.xlu0 %3014 }
0x19a3   : > { %v8885_v52 = vmul.f32 %v3015_v25, %v2999_v62 }
0x19a5   : > { %v3025_v4 = vrot.slane %v8885_v52, %v8163_v18 }
0x19a7   : > { %v3026_v20 = vcombine.high %v3025_v4, %v3025_v4  ;;  %v3033_v44 = vrot.slane %v3025_v4, %v8163_v18 }
0x19a9   : > { %v3044_v2 = vrot.slane %v3033_v44, %v8171_v24  ;;  %v3040_v37 = vrot.slane %v3026_v20, %v8163_v18 }
0x19ab   : > { %3045 = vrot.lane.b32.xlu0 %v3044_v2, %s9412_s27  ;;  %v3122_v23 = vrot.slane %v3040_v37, %v8171_v24 }
0x19ad   : > { %3123 = vrot.lane.b32.xlu1 %v3122_v23, %s9412_s27 }
0x1a1d   : > { %v3046_v63 = vpop.permute.xlu0 %3045 }
0x1a1e   : > { %6253 = vmatmul.mubr.msk.f32.vlgmr.msra.gmra.mrb[24].mxu0 %vm879_vm4, %v3046_v63 }
0x1a1f   : > { %v3124_v62 = vpop.permute.xlu1 %3123  ;;  %7225 = vmatpush3.bf16.msra.mxu0 %v7976_v11  ;;  %6322 = vmatprep.mubr.msk.f32.mxu0 %vm7714_vm1, %v9407_v56 }
0x1a20   : > { %6288 = vmatmul.mubr.msk.f32.vlgmr.msra.gmra.mrb[24].mxu1 %vm879_vm4, %v3124_v62  ;;  %7226 = vmatprep.subr.bf16.mxu0 %v9408_v16 }
0x1a21   : > { %7249 = vmatpush3.bf16.msra.mxu1 %v7981_v15  ;;  %6357 = vmatprep.mubr.msk.f32.mxu1 %vm7714_vm1, %v9407_v56 }
0x1a22   : > { %7250 = vmatprep.subr.bf16.mxu1 %v9408_v16 }
0x1a23   : > { %7228 = vmatpush3.bf16.msra.mxu0 %v8004_v21 }
0x1a24   : > { %7229 = vmatprep.subr.bf16.mxu0 %v9408_v16 }
0x1a25   : > { %7252 = vmatpush3.bf16.msra.mxu1 %v8006_v22 }
0x1a26   : > { %7253 = vmatprep.subr.bf16.mxu1 %v9408_v16 }
0x1a27   : > { %7231 = vmatpush3.bf16.msra.mxu0 %v8028_v27 }
0x1a28   : > { %7232 = vmatprep.subr.bf16.mxu0 %v9408_v16 }
0x1a29   : > { %7255 = vmatpush3.bf16.msra.mxu1 %v8030_v28 }
0x1a2a   : > { %7256 = vmatprep.subr.bf16.mxu1 %v9408_v16 }
0x1a2b   : > { %7234 = vmatpush3.bf16.msra.mxu0 %v8052_v34 }
0x1a2c   : > { %7235 = vmatprep.subr.bf16.mxu0 %v9408_v16 }
0x1a2d   : > { %7258 = vmatpush3.bf16.msra.mxu1 %v8054_v36 }
0x1a2e   : > { %7259 = vmatprep.subr.bf16.mxu1 %v9408_v16 }
0x1a2f   : > { %7237 = vmatpush3.bf16.msra.mxu0 %v8076_v43 }
0x1a30   : > { %7238 = vmatprep.subr.bf16.mxu0 %v9408_v16 }
0x1a31   : > { %7261 = vmatpush3.bf16.msra.mxu1 %v8078_v45 }
0x1a32   : > { %7262 = vmatprep.subr.bf16.mxu1 %v9408_v16 }
0x1a33   : > { %7240 = vmatpush3.bf16.msra.mxu0 %v8100_v51 }
0x1a34   : > { %7241 = vmatprep.subr.bf16.mxu0 %v9408_v16 }
0x1a35   : > { %7264 = vmatpush3.bf16.msra.mxu1 %v8102_v53 }
0x1a36   : > { %7265 = vmatprep.subr.bf16.mxu1 %v9408_v16 }
0x1a37   : > { %7243 = vmatpush3.bf16.msra.mxu0 %v8124_v58 }
0x1a38   : > { %7244 = vmatprep.subr.bf16.mxu0 %v9408_v16 }
0x1a39   : > { %7267 = vmatpush3.bf16.msra.mxu1 %v8126_v59 }
0x1a3a   : > { %7268 = vmatprep.subr.bf16.mxu1 %v9408_v16 }
0x1a3b   : > { %7246 = vmatpush3.bf16.msra.mxu0 %v8148_v1 }
0x1a3c   : > { %7271 = vmatprep.subr.bf16.mxu0 %v9408_v16 }
0x1a3d   : > { %7270 = vmatpush3.bf16.msra.mxu1 %v8150_v6 }
0x1a3e   : > { %7277 = vmatprep.subr.bf16.mxu1 %v9408_v16 }
0x1af1   : > { %v3115_v46 = vpop.f32.mrb[24].mxu0 }
0x1af2   : > { %v3116_v31 = vadd.f32 %v8936_v48, %v3115_v46  ;;  %v6254_v25 = vpop.f32.mrb[25].mxu0 }
0x1af3   : > { %v3193_v4 = vpop.f32.mrb[24].mxu1 }
0x1af4   : > { %v3194_v20 = vadd.f32 %v8936_v48, %v3193_v4  ;;  %v6289_v44 = vpop.f32.mrb[25].mxu1  ;;  %v3197_v2 = vsel %vm1262_vm7, %v3116_v31, -inf }
0x1af5   : > { %3198 = vmax.xlane.f32.xlu0 %v3197_v2 }
0x1af6   : > { %v3200_v37 = vsel %vm1262_vm7, %v3194_v20, -inf }
0x1af7   : > { %3201 = vmax.xlane.f32.xlu1 %v3200_v37 }
0x1b82   : > { %v3199_v23 = vpop.xlane.xlu0 %3198 }
0x1b83   : > { %v3203_v63 = vsub.f32 %v3116_v31, %v3199_v23 }
0x1b84   : > { %v3202_v62 = vpop.xlane.xlu1 %3201 }
0x1b85   : > { %v3205_v18 = vmul.f32 1.442695, %v3203_v63  ;;  %v3204_v10 = vsub.f32 %v3194_v20, %v3202_v62 }
0x1b87   : > { %7630 = vpow2.f32 %v3205_v18  ;;  %v3207_v40 = vmul.f32 1.442695, %v3204_v10 }
0x1b89   : > { %7632 = vpow2.f32 %v3207_v40 }
0x1b91   : > { %v7631_v46 = vpop.eup %7630 }
0x1b92   : > { %v3209_v25 = vsel %vm1262_vm7, %v7631_v46, 0.0 }
0x1b93   : > { %v7633_v6 = vpop.eup %7632  ;;  %3210 = vadd.xlane.f32.xlu1 %v3209_v25 }
0x1b94   : > { %v3212_v4 = vsel %vm1262_vm7, %v7633_v6, 0.0 }
0x1b95   : > { %3213 = vadd.xlane.f32.xlu0 %v3212_v4 }
0x1bab   : > { %3359 = vrot.lane.b32.xlu0 %v8885_v52, %s9412_s27 }
0x1c20   : > { %v3211_v44 = vpop.xlane.xlu1 %3210 }
0x1c21   : > { %7634 = vrcp.f32 %v3211_v44 }
0x1c22   : > { %v3214_v31 = vpop.xlane.xlu0 %3213 }
0x1c23   : > { %7636 = vrcp.f32 %v3214_v31 }
0x1c26   : > { %v3360_v37 = vpop.permute.xlu0 %3359 }
0x1c2b   : > { %v7635_v20 = vpop.eup %7634 }
0x1c2c   : > { %v8946_v18 = vmul.f32 %v7635_v20, %v7631_v46 }
0x1c2d   : > { %v7637_v10 = vpop.eup %7636 }
0x1c2e   : > { %6323 = vmatmul.mubr.f32.vlgmr.msra.gmra.mrb[26].mxu0 %v8946_v18  ;;  %v8949_v40 = vmul.f32 %v7637_v10, %v7633_v6 }
0x1c2f   : > { %7273 = vmatpush3.bf16.msra.mxu0 %v8242_v32  ;;  %6368 = vmatprep.mubr.msk.f32.mxu0 %vm7714_vm1, %v9407_v56 }
0x1c30   : > { %6358 = vmatmul.mubr.f32.vlgmr.msra.gmra.mrb[26].mxu1 %v8949_v40  ;;  %v3769_v2 = vrot.slane %v8949_v40, 7  ;;  %7274 = vmatprep.subr.bf16.mxu0 %v9408_v16 }
0x1c31   : > { %7279 = vmatpush3.bf16.msra.mxu1 %v8252_v42  ;;  %6379 = vmatprep.mubr.msk.f32.mxu1 %vm7714_vm1, %v9407_v56 }
0x1c32   : > { %7280 = vmatprep.subr.bf16.mxu1 %v9408_v16  ;;  %v3770_v6 = vsel %vm1502_vm8, %v3769_v2, %v8946_v18 }
0x1c33   : > { %7276 = vmatpush3.bf16.msra.mxu0 %v8258_v47  ;;  %5055 = vst [vmem:[%s7840_s22 + $0x4] sm:$0x3] %v3770_v6  ;;  %v8998_v6 = vld [vmem:[%s9334_s4] sm:$0x3] }
0x1c34   : > { %7283 = vmatprep.subr.bf16.mxu0 %v9408_v16 }
0x1c35   : > { %7282 = vmatpush3.bf16.msra.mxu1 %v8283_v57 }
0x1c36   : > { %6369 = vmatmul.mubr.msk.f32.vlgmr.msra.gmra.mrb[28].mxu0 %vm879_vm4, %v3360_v37  ;;  %7289 = vmatprep.subr.bf16.mxu1 %v9408_v16 }
0x1c37   : > { %7285 = vmatpush3.bf16.msra.mxu0 %v8300_v26  ;;  %6390 = vmatprep.mubr.msk.f32.mxu0 %vm7714_vm1, %v9407_v56 }
0x1c38   : > { %7286 = vmatprep.subr.bf16.mxu0 %v9408_v16 }
0x1c3b   : > { %7288 = vmatpush3.bf16.msra.mxu0 %v8306_v30 }
0x1c3c   : > { %7313 = vmatprep.subr.bf16.mxu0 %v9408_v16 }
0x1d01   : > { %v3285_v23 = vpop.f32.mrb[26].mxu0 }
0x1d02   : > { %v6324_v63 = vpop.f32.mrb[27].mxu0 }
0x1d03   : > { %v3355_v62 = vpop.f32.mrb[26].mxu1  ;;  %v9005_v63 = vld [vmem:[%s9343_s13] ss:$0 sm:$0xff] }
0x1d04   : > { %v3435_v46 = vrot.slane %v3355_v62, 7  ;;  %v6359_v25 = vpop.f32.mrb[27].mxu1 }
0x1d06   : > { %v3436_v4 = vsel %vm1502_vm8, %v3435_v46, %v3285_v23 }
0x1d07   : > { %6380 = vmatmul.mubr.msk.f32.vlgmr.msra.gmra.mrb[28].mxu1 %vm879_vm4, %v3436_v4 }
0x1d08   : > { %7291 = vmatpush3.bf16.msra.mxu1 %v8317_v41  ;;  %6425 = vmatprep.mubr.msk.f32.mxu1 %vm7714_vm1, %v9407_v56 }
0x1d09   : > { %v3429_v44 = vpop.f32.mrb[28].mxu0  ;;  %7292 = vmatprep.subr.bf16.mxu1 %v9408_v16 }
0x1d0a   : > { %v6370_v31 = vpop.f32.mrb[29].mxu0 }
0x1d0c   : > { %7294 = vmatpush3.bf16.msra.mxu1 %v8326_v54 }
0x1d0d   : > { %7295 = vmatprep.subr.bf16.mxu1 %v9408_v16 }
0x1d10   : > { %7297 = vmatpush3.bf16.msra.mxu1 %v8373_v50 }
0x1d11   : > { %7298 = vmatprep.subr.bf16.mxu1 %v9408_v16 }
0x1d14   : > { %7300 = vmatpush3.bf16.msra.mxu1 %v8394_v7 }
0x1d15   : > { %7301 = vmatprep.subr.bf16.mxu1 %v9408_v16 }
0x1d18   : > { %7303 = vmatpush3.bf16.msra.mxu1 %v8414_v33 }
0x1d19   : > { %7304 = vmatprep.subr.bf16.mxu1 %v9408_v16 }
0x1d1c   : > { %7306 = vmatpush3.bf16.msra.mxu1 %v8434_v0 }
0x1d1d   : > { %7307 = vmatprep.subr.bf16.mxu1 %v9408_v16 }
0x1d20   : > { %7309 = vmatpush3.bf16.msra.mxu1 %v8454_v49 }
0x1d21   : > { %7310 = vmatprep.subr.bf16.mxu1 %v9408_v16 }
0x1d24   : > { %7312 = vmatpush3.bf16.msra.mxu1 %v8474_v39 }
0x1d25   : > { %7337 = vmatprep.subr.bf16.mxu1 %v9408_v16 }
0x1dda   : > { %v3505_v20 = vpop.f32.mrb[28].mxu1 }
0x1ddb   : > { %v3506_v10 = vadd.f32 %v3505_v20, %v3429_v44  ;;  %v6381_v2 = vpop.f32.mrb[29].mxu1 }
0x1ddd   : > { %v3509_v37 = vadd.f32 %v8998_v6, %v3506_v10 }
0x1ddf   : > { %7638 = vtanh.f32 %v3509_v37 }
0x1de9   : > { %v7639_v23 = vpop.eup %7638 }
0x1dea   : > { %6391 = vmatmul.mubr.msk.f32.vlgmr.msra.gmra.mrb[30].mxu0 %vm879_vm4, %v7639_v23  ;;  %v3595_v62 = vmul.f32 %v9005_v63, %v7639_v23 }
0x1deb   : > { %7315 = vmatpush3.bf16.msra.mxu0 %v8348_v14  ;;  %6460 = vmatprep.mubr.msk.f32.mxu0 %vm7714_vm1, %v9407_v56 }
0x1dec   : > { %v3596_v46 = vsel %vm1676_vm9, %v3595_v62, 0.0  ;;  %7316 = vmatprep.subr.bf16.mxu0 %v9408_v16 }
0x1ded   : > { %3597 = vadd.xlane.f32.xlu1 %v3596_v46  ;;  %v9431_v46 = vld [vmem:[#allocation5_spill] sm:$0xff] }
0x1def   : > { %7318 = vmatpush3.bf16.msra.mxu0 %v9413_v8 }
0x1df0   : > { %7319 = vmatprep.subr.bf16.mxu0 %v9408_v16 }
0x1df3   : > { %7321 = vmatpush3.bf16.msra.mxu0 %v9414_v55 }
0x1df4   : > { %7322 = vmatprep.subr.bf16.mxu0 %v9408_v16 }
0x1df7   : > { %7324 = vmatpush3.bf16.msra.mxu0 %v9415_v60 }
0x1df8   : > { %7325 = vmatprep.subr.bf16.mxu0 %v9408_v16 }
0x1dfb   : > { %7327 = vmatpush3.bf16.msra.mxu0 %v9416_v9 }
0x1dfc   : > { %7328 = vmatprep.subr.bf16.mxu0 %v9408_v16 }
0x1dfe   : > { %3776 = vrot.lane.b32.xlu1 %v8832_v17, %s7719_s18  ;;  %s7720_s18 = smov 96  }
0x1dff   : > { %7330 = vmatpush3.bf16.msra.mxu0 %v9417_v29 }
0x1e00   : > { %7331 = vmatprep.subr.bf16.mxu0 %v9408_v16 }
0x1e03   : > { %7333 = vmatpush3.bf16.msra.mxu0 %v9418_v38 }
0x1e04   : > { %7334 = vmatprep.subr.bf16.mxu0 %v9408_v16 }
0x1e07   : > { %7336 = vmatpush3.bf16.msra.mxu0 %v9419_v19 }
0x1e08   : > { %7346 = vmatprep.subr.bf16.mxu0 %v9408_v16 }
0x1e7a   : > { %v3598_v25 = vpop.xlane.xlu1 %3597 }
0x1e7b   : > { %v3599_v4 = vadd.f32 %v3598_v25, %v8489_v12  ;;  %v9433_v25 = vld [vmem:[#allocation6_spill] sm:$0xff] }
0x1e7d   : > { %v3600_v44 = vmul.f32 0.5, %v3599_v4  ;;  %v9434_v4 = vld [vmem:[#allocation8_spill] sm:$0xff] }
0x1e7f   : > { %7640 = vtanh.f32 %v3600_v44  ;;  %v9435_v44 = vld [vmem:[#allocation9_spill] sm:$0xff] }
0x1e89   : > { %v7641_v31 = vpop.eup %7640 }
0x1e8a   : > { %v3602_v20 = vadd.f32 1.0, %v7641_v31 }
0x1e8c   : > { %v9030_v17 = vmul.f32 0.5, %v3602_v20 }
0x1e8e   : > { %9430 = vst [vmem:[#allocation18_spill] sm:$0xff] %v9030_v17  ;;  %v3604_v10 = vsub.f32 1.0, %v9030_v17 }
0x1e90   : > { %v3609_v2 = vrot.slane %v3604_v10, %v8171_v24  ;;  %v3613_v37 = vrot.slane %v3604_v10, %v8493_v61 }
0x1e92   : > { %v3616_v23 = vmul.f32 %v3609_v2, %v8946_v18  ;;  %v3617_v62 = vmul.f32 %v3613_v37, %v8949_v40  ;;  %v9432_v18 = vld [vmem:[#allocation7_spill] sm:$0xff]  ;;  %v3777_v40 = vpop.permute.xlu1 %3776 }
0x1e94   : > { %6426 = vmatmul.mubr.f32.vlgmr.msra.gmra.mrb[30].mxu1 %v3616_v23  ;;  %6461 = vmatmul.mubr.f32.vlgmr.msra.gmra.mrb[32].mxu0 %v3617_v62 }
0x1e95   : > { %7339 = vmatpush3.bf16.msra.mxu1 %v7849_v5  ;;  %6475 = vmatprep.mubr.msk.f32.mxu1 %vm7714_vm1, %v9407_v56  ;;  %v5056_v5 = vld [vmem:[%s7830_s0 + $0x6] sm:$0x3] }
0x1e96   : > { %7340 = vmatprep.subr.bf16.mxu1 %v9408_v16  ;;  %7348 = vmatpush3.bf16.msra.mxu0 %v7904_v35  ;;  %v3779_v35 = vsel %vm763_vm2, %v5056_v5, %v3777_v40 }
0x1e97   : > { %7349 = vmatprep.subr.bf16.mxu0 %v9408_v16  ;;  %6494 = vmatprep.mubr.msk.f32.mxu0 %vm7714_vm1, %v9407_v56 }
0x1e99   : > { %7342 = vmatpush3.bf16.msra.mxu1 %v9431_v46 }
0x1e9a   : > { %7343 = vmatprep.subr.bf16.mxu1 %v9408_v16  ;;  %7351 = vmatpush3.bf16.msra.mxu0 %v9432_v18 }
0x1e9b   : > { %7352 = vmatprep.subr.bf16.mxu0 %v9408_v16 }
0x1e9d   : > { %7345 = vmatpush3.bf16.msra.mxu1 %v9433_v25 }
0x1e9e   : > { %7354 = vmatpush3.bf16.msra.mxu0 %v9434_v4  ;;  %7358 = vmatprep.subr.bf16.mxu1 %v9408_v16 }
0x1e9f   : > { %7355 = vmatprep.subr.bf16.mxu0 %v9408_v16 }
0x1ea0   : > { %6476 = vmatmul.mubr.msk.f32.vlgmr.msra.gmra.mrb[32].mxu1 %vm771_vm3, %v3779_v35 }
0x1ea1   : > { %6529 = vmatprep.mubr.msk.f32.mxu1 %vm7714_vm1, %v9407_v56 }
0x1ea2   : > { %7357 = vmatpush3.bf16.msra.mxu0 %v9435_v44 }
0x1ea3   : > { %7390 = vmatprep.subr.bf16.mxu0 %v9408_v16 }
0x1ea6   : > { %7361 = vmatpush3.bf16.xpose.msk.msra.mxu1 %vm7963_vm6, %v7976_v11 }
0x1ea7   : > { %7362 = vmatprep.subr.bf16.mxu1 %v9408_v16 }
0x1eae   : > { %7365 = vmatpush3.bf16.xpose.msk.msra.mxu1 %vm7963_vm6, %v8004_v21 }
0x1eaf   : > { %7366 = vmatprep.subr.bf16.mxu1 %v9408_v16 }
0x1eb6   : > { %7369 = vmatpush3.bf16.xpose.msk.msra.mxu1 %vm7963_vm6, %v8028_v27 }
0x1eb7   : > { %7370 = vmatprep.subr.bf16.mxu1 %v9408_v16 }
0x1ebd   : > { %v9072_v31 = vpop.f32.mrb[30].mxu0 }
0x1ebe   : > { %v6392_v20 = vpop.f32.mrb[31].mxu0  ;;  %7373 = vmatpush3.bf16.xpose.msk.msra.mxu1 %vm7963_vm6, %v8052_v34 }
0x1ebf   : > { %7374 = vmatprep.subr.bf16.mxu1 %v9408_v16 }
0x1ec6   : > { %7377 = vmatpush3.bf16.xpose.msk.msra.mxu1 %vm7963_vm6, %v8076_v43 }
0x1ec7   : > { %7378 = vmatprep.subr.bf16.mxu1 %v9408_v16 }
0x1ece   : > { %7381 = vmatpush3.bf16.xpose.msk.msra.mxu1 %vm7963_vm6, %v8100_v51 }
0x1ecf   : > { %7382 = vmatprep.subr.bf16.mxu1 %v9408_v16 }
0x1ed6   : > { %7385 = vmatpush3.bf16.xpose.msk.msra.mxu1 %vm7963_vm6, %v8124_v58 }
0x1ed7   : > { %7386 = vmatprep.subr.bf16.mxu1 %v9408_v16 }
0x1ede   : > { %7389 = vmatpush3.bf16.xpose.msk.msra.mxu1 %vm7963_vm6, %v8148_v1 }
0x1edf   : > { %7422 = vmatprep.subr.bf16.mxu1 %v9408_v16 }
0x1f67   : > { %v3684_v10 = vpop.f32.mrb[30].mxu1  ;;  %v3754_v2 = vpop.f32.mrb[32].mxu0 }
0x1f68   : > { %v3761_v37 = vrot.slane %v3754_v2, 7  ;;  %v6427_v23 = vpop.f32.mrb[31].mxu1  ;;  %v6462_v62 = vpop.f32.mrb[33].mxu0 }
0x1f69   : > { %v9436_v23 = vld [vmem:[#allocation15_spill] sm:$0xff] }
0x1f6a   : > { %v9095_v46 = vsel %vm1502_vm8, %v3761_v37, %v3684_v10 }
0x1f73   : > { %v3849_v18 = vpop.f32.mrb[32].mxu1 }
0x1f74   : > { %v3850_v5 = vadd.f32 %v8820_v13, %v3849_v18  ;;  %v6477_v40 = vpop.f32.mrb[33].mxu1 }
0x1f76   : > { %7642 = vtanh.f32 %v3850_v5  ;;  %v3853_v4 = vmul.f32 0.5, %v3850_v5 }
0x1f78   : > { %7644 = vtanh.f32 %v3853_v4 }
0x1f80   : > { %v7643_v25 = vpop.eup %7642 }
0x1f81   : > { %3860 = vrot.lane.b32.xlu0 %v7643_v25, %s9411_s29 }
0x1f82   : > { %v7645_v35 = vpop.eup %7644 }
0x1f83   : > { %v3855_v44 = vadd.f32 1.0, %v7645_v35  ;;  %v9438_v35 = vld [vmem:[#allocation16_spill] sm:$0xff] }
0x1f85   : > { %v3856_v20 = vmul.f32 0.5, %v3855_v44 }
0x1f87   : > { %v3858_v10 = vmul.f32 %v3856_v20, %v9436_v23 }
0x1ff3   : > { %v3861_v17 = vpop.permute.xlu0 %3860 }
0x1ff4   : > { %v3863_v2 = vmul.f32 %v3861_v17, %v3856_v20 }
0x1ff6   : > { %3865 = vrot.lane.b32.xlu1 %v3863_v2, %s9412_s27 }
0x2068   : > { %v3866_v37 = vpop.permute.xlu1 %3865 }
0x2069   : > { %v9101_v62 = vadd.f32 %v3866_v37, %v3858_v10 }
0x206b   : > { %7646 = vtanh.f32 %v9101_v62 }
0x2075   : > { %v7647_v13 = vpop.eup %7646 }
0x2076   : > { %3871 = vrot.lane.b32.xlu0 %v7647_v13, %s9411_s29 }
0x207a   : > { %3879 = vrot.lane.b32.xlu0 %v8885_v52, %s9411_s29  ;;  %v9437_v52 = vld [vmem:[#allocation10_spill] sm:$0xff] }
0x20e8   : > { %v3872_v18 = vpop.permute.xlu0 %3871 }
0x20e9   : > { %v3874_v5 = vmul.f32 %v3872_v18, %v3856_v20 }
0x20eb   : > { %3876 = vrot.lane.b32.xlu1 %v3874_v5, %s9412_s27 }
0x20ec   : > { %v3880_v17 = vpop.permute.xlu0 %3879 }
0x215d   : > { %v3877_v40 = vpop.permute.xlu1 %3876 }
0x215e   : > { %v3882_v25 = vsel %vm879_vm4, %v3877_v40, %v3880_v17  ;;  %4734 = vst.msk [vmem:[#allocation2] sm:$0x3] %vm1676_vm9, %v3877_v40 }
0x215f   : > { %6495 = vmatmul.mubr.msk.f32.vlgmr.msra.gmra.mrb[34].mxu0 %vm887_vm5, %v3882_v25 }
0x2160   : > { %7393 = vmatpush3.bf16.xpose.msk.msra.mxu0 %vm7963_vm6, %v7981_v15  ;;  %6564 = vmatprep.mubr.msk.f32.mxu0 %vm7714_vm1, %v9407_v56 }
0x2161   : > { %7394 = vmatprep.subr.bf16.mxu0 %v9408_v16 }
0x2168   : > { %7397 = vmatpush3.bf16.xpose.msk.msra.mxu0 %vm7963_vm6, %v8006_v22 }
0x2169   : > { %7398 = vmatprep.subr.bf16.mxu0 %v9408_v16 }
0x2170   : > { %7401 = vmatpush3.bf16.xpose.msk.msra.mxu0 %vm7963_vm6, %v8030_v28 }
0x2171   : > { %7402 = vmatprep.subr.bf16.mxu0 %v9408_v16 }
0x2178   : > { %7405 = vmatpush3.bf16.xpose.msk.msra.mxu0 %vm7963_vm6, %v8054_v36 }
0x2179   : > { %7406 = vmatprep.subr.bf16.mxu0 %v9408_v16 }
0x2180   : > { %7409 = vmatpush3.bf16.xpose.msk.msra.mxu0 %vm7963_vm6, %v8078_v45 }
0x2181   : > { %7410 = vmatprep.subr.bf16.mxu0 %v9408_v16 }
0x2188   : > { %7413 = vmatpush3.bf16.xpose.msk.msra.mxu0 %vm7963_vm6, %v8102_v53 }
0x2189   : > { %7414 = vmatprep.subr.bf16.mxu0 %v9408_v16 }
0x2190   : > { %7417 = vmatpush3.bf16.xpose.msk.msra.mxu0 %vm7963_vm6, %v8126_v59 }
0x2191   : > { %7418 = vmatprep.subr.bf16.mxu0 %v9408_v16 }
0x2198   : > { %7421 = vmatpush3.bf16.xpose.msk.msra.mxu0 %vm7963_vm6, %v9437_v52 }
0x2199   : > { %7446 = vmatprep.subr.bf16.mxu0 %v9408_v16 }
0x2232   : > { %v3952_v4 = vpop.f32.mrb[34].mxu0 }
0x2233   : > { %v3953_v44 = vadd.f32 %v9438_v35, %v3952_v4  ;;  %v6496_v20 = vpop.f32.mrb[35].mxu0 }
0x2234   : > { %v9440_v20 = vld [vmem:[#allocation11_spill] sm:$0xff] }
0x2235   : > { %7648 = vtanh.f32 %v3953_v44  ;;  %v3956_v23 = vmul.f32 0.5, %v3953_v44 }
0x2237   : > { %7650 = vtanh.f32 %v3956_v23 }
0x223f   : > { %v7649_v2 = vpop.eup %7648 }
0x2240   : > { %3963 = vrot.lane.b32.xlu1 %v7649_v2, %s9411_s29 }
0x2241   : > { %v7651_v10 = vpop.eup %7650 }
0x2242   : > { %v3958_v37 = vadd.f32 1.0, %v7651_v10 }
0x2244   : > { %v3959_v13 = vmul.f32 0.5, %v3958_v37 }
0x2246   : > { %v3961_v17 = vmul.f32 %v3959_v13, %v9439_v3 }
0x22b2   : > { %v3964_v18 = vpop.permute.xlu1 %3963 }
0x22b3   : > { %v3966_v5 = vmul.f32 %v3964_v18, %v3959_v13 }
0x22b5   : > { %3968 = vrot.lane.b32.xlu0 %v3966_v5, %s9412_s27 }
0x2327   : > { %v3969_v40 = vpop.permute.xlu0 %3968 }
0x2328   : > { %v9149_v25 = vadd.f32 %v3969_v40, %v3961_v17 }
0x232a   : > { %7652 = vtanh.f32 %v9149_v25 }
0x2334   : > { %v7653_v4 = vpop.eup %7652 }
0x2335   : > { %3974 = vrot.lane.b32.xlu1 %v7653_v4, %s9411_s29 }
0x23a7   : > { %v3975_v35 = vpop.permute.xlu1 %3974 }
0x23a8   : > { %v3977_v44 = vmul.f32 %v3975_v35, %v3959_v13 }
0x23aa   : > { %v3985_v2 = vrot.slane %v3977_v44, %v9440_v20 }
0x23ac   : > { %v3986_v23 = vcombine.high %v3985_v2, %v3985_v2  ;;  %v3993_v10 = vrot.slane %v3985_v2, %v9440_v20 }
0x23ae   : > { %v4004_v37 = vrot.slane %v3993_v10, %v8171_v24  ;;  %v4000_v18 = vrot.slane %v3986_v23, %v9440_v20 }
0x23b0   : > { %4005 = vrot.lane.b32.xlu1 %v4004_v37, %s9412_s27  ;;  %v4082_v5 = vrot.slane %v4000_v18, %v8171_v24 }
0x23b2   : > { %4083 = vrot.lane.b32.xlu0 %v4082_v5, %s9412_s27 }
0x2422   : > { %v4006_v3 = vpop.permute.xlu1 %4005 }
0x2423   : > { %6530 = vmatmul.mubr.msk.f32.vlgmr.msra.gmra.mrb[34].mxu1 %vm879_vm4, %v4006_v3 }
0x2424   : > { %v4084_v17 = vpop.permute.xlu0 %4083  ;;  %7424 = vmatpush3.bf16.msra.mxu1 %v7976_v11  ;;  %6599 = vmatprep.mubr.msk.f32.mxu1 %vm7714_vm1, %v9407_v56 }
0x2425   : > { %6565 = vmatmul.mubr.msk.f32.vlgmr.msra.gmra.mrb[36].mxu0 %vm879_vm4, %v4084_v17  ;;  %7425 = vmatprep.subr.bf16.mxu1 %v9408_v16  ;;  %v9442_v17 = vld [vmem:[#allocation13_spill] sm:$0xff] }
0x2426   : > { %7448 = vmatpush3.bf16.msra.mxu0 %v7981_v15  ;;  %6634 = vmatprep.mubr.msk.f32.mxu0 %vm7714_vm1, %v9407_v56 }
0x2427   : > { %7449 = vmatprep.subr.bf16.mxu0 %v9408_v16 }
0x2428   : > { %7427 = vmatpush3.bf16.msra.mxu1 %v8004_v21 }
0x2429   : > { %7428 = vmatprep.subr.bf16.mxu1 %v9408_v16 }
0x242a   : > { %7451 = vmatpush3.bf16.msra.mxu0 %v8006_v22 }
0x242b   : > { %7452 = vmatprep.subr.bf16.mxu0 %v9408_v16 }
0x242c   : > { %7430 = vmatpush3.bf16.msra.mxu1 %v8028_v27 }
0x242d   : > { %7431 = vmatprep.subr.bf16.mxu1 %v9408_v16 }
0x242e   : > { %7454 = vmatpush3.bf16.msra.mxu0 %v8030_v28 }
0x242f   : > { %7455 = vmatprep.subr.bf16.mxu0 %v9408_v16 }
0x2430   : > { %7433 = vmatpush3.bf16.msra.mxu1 %v8052_v34 }
0x2431   : > { %7434 = vmatprep.subr.bf16.mxu1 %v9408_v16 }
0x2432   : > { %7457 = vmatpush3.bf16.msra.mxu0 %v8054_v36 }
0x2433   : > { %7458 = vmatprep.subr.bf16.mxu0 %v9408_v16 }
0x2434   : > { %7436 = vmatpush3.bf16.msra.mxu1 %v8076_v43 }
0x2435   : > { %7437 = vmatprep.subr.bf16.mxu1 %v9408_v16 }
0x2436   : > { %7460 = vmatpush3.bf16.msra.mxu0 %v8078_v45 }
0x2437   : > { %7461 = vmatprep.subr.bf16.mxu0 %v9408_v16 }
0x2438   : > { %7439 = vmatpush3.bf16.msra.mxu1 %v8100_v51 }
0x2439   : > { %7440 = vmatprep.subr.bf16.mxu1 %v9408_v16 }
0x243a   : > { %7463 = vmatpush3.bf16.msra.mxu0 %v8102_v53 }
0x243b   : > { %7464 = vmatprep.subr.bf16.mxu0 %v9408_v16 }
0x243c   : > { %7442 = vmatpush3.bf16.msra.mxu1 %v8124_v58 }
0x243d   : > { %7443 = vmatprep.subr.bf16.mxu1 %v9408_v16 }
0x243e   : > { %7466 = vmatpush3.bf16.msra.mxu0 %v8126_v59 }
0x243f   : > { %7467 = vmatprep.subr.bf16.mxu0 %v9408_v16 }
0x2440   : > { %7445 = vmatpush3.bf16.msra.mxu1 %v8148_v1 }
0x2441   : > { %7470 = vmatprep.subr.bf16.mxu1 %v9408_v16 }
0x2442   : > { %7469 = vmatpush3.bf16.msra.mxu0 %v9437_v52 }
0x2443   : > { %7476 = vmatprep.subr.bf16.mxu0 %v9408_v16 }
0x24f6   : > { %v4075_v11 = vpop.f32.mrb[34].mxu1 }
0x24f7   : > { %v4076_v15 = vadd.f32 %v8936_v48, %v4075_v11  ;;  %v6531_v21 = vpop.f32.mrb[35].mxu1 }
0x24f8   : > { %v4153_v22 = vpop.f32.mrb[36].mxu0 }
0x24f9   : > { %v4154_v27 = vadd.f32 %v8936_v48, %v4153_v22  ;;  %v6566_v28 = vpop.f32.mrb[37].mxu0  ;;  %v4157_v34 = vsel %vm1262_vm7, %v4076_v15, -inf }
0x24fa   : > { %4158 = vmax.xlane.f32.xlu1 %v4157_v34 }
0x24fb   : > { %v4160_v36 = vsel %vm1262_vm7, %v4154_v27, -inf }
0x24fc   : > { %4161 = vmax.xlane.f32.xlu0 %v4160_v36 }
0x250b   : > { %4319 = vrot.lane.b32.xlu1 %v3977_v44, %s9412_s27 }
0x2587   : > { %v4159_v43 = vpop.xlane.xlu1 %4158 }
0x2588   : > { %v4163_v45 = vsub.f32 %v4076_v15, %v4159_v43 }
0x2589   : > { %v4162_v51 = vpop.xlane.xlu0 %4161 }
0x258a   : > { %v4164_v53 = vsub.f32 %v4154_v27, %v4162_v51  ;;  %v4165_v59 = vmul.f32 1.442695, %v4163_v45 }
0x258b   : > { %v4320_v58 = vpop.permute.xlu1 %4319 }
0x258c   : > { %v4167_v1 = vmul.f32 1.442695, %v4164_v53  ;;  %4741 = vst.msk [vmem:[#allocation2 + $0x2] sm:$0x3] %vm1676_vm9, %v4320_v58 }
0x258e   : > { %7654 = vpow2.f32 %v4167_v1 }
0x258f   : > { %7656 = vpow2.f32 %v4165_v59 }
0x2598   : > { %v7655_v48 = vpop.eup %7654 }
0x2599   : > { %v4172_v52 = vsel %vm1262_vm7, %v7655_v48, 0.0  ;;  %v7657_v13 = vpop.eup %7656 }
0x259a   : > { %4173 = vadd.xlane.f32.xlu0 %v4172_v52  ;;  %v4169_v40 = vsel %vm1262_vm7, %v7657_v13, 0.0 }
0x259e   : > { %4170 = vadd.xlane.f32.xlu0 %v4169_v40 }
0x2627   : > { %v4174_v4 = vpop.xlane.xlu0 %4173 }
0x2628   : > { %7658 = vrcp.f32 %v4174_v4 }
0x262b   : > { %v4171_v35 = vpop.xlane.xlu0 %4170 }
0x262c   : > { %7660 = vrcp.f32 %v4171_v35 }
0x2632   : > { %v7659_v44 = vpop.eup %7658 }
0x2633   : > { %v9206_v20 = vmul.f32 %v7659_v44, %v7655_v48 }
0x2635   : > { %6635 = vmatmul.mubr.f32.vlgmr.msra.gmra.mrb[38].mxu0 %v9206_v20  ;;  %v4729_v23 = vrot.slane %v9206_v20, 7 }
0x2636   : > { %v7661_v2 = vpop.eup %7660  ;;  %7478 = vmatpush3.bf16.msra.mxu0 %v8252_v42  ;;  %6656 = vmatprep.mubr.msk.f32.mxu0 %vm7714_vm1, %v9407_v56 }
0x2637   : > { %v9213_v10 = vmul.f32 %v7661_v2, %v7657_v13  ;;  %7479 = vmatprep.subr.bf16.mxu0 %v9408_v16 }
0x2639   : > { %6600 = vmatmul.mubr.f32.vlgmr.msra.gmra.mrb[36].mxu1 %v9213_v10  ;;  %v4730_v37 = vsel %vm1502_vm8, %v4729_v23, %v9213_v10 }
0x263a   : > { %5097 = vst [vmem:[%s7840_s22 + $0x6] sm:$0x3] %v4730_v37  ;;  %7472 = vmatpush3.bf16.msra.mxu1 %v8242_v32  ;;  %6645 = vmatprep.mubr.msk.f32.mxu1 %vm7714_vm1, %v9407_v56 }
0x263b   : > { %7473 = vmatprep.subr.bf16.mxu1 %v9408_v16  ;;  %7481 = vmatpush3.bf16.msra.mxu0 %v8283_v57 }
0x263c   : > { %7488 = vmatprep.subr.bf16.mxu0 %v9408_v16 }
0x263e   : > { %7475 = vmatpush3.bf16.msra.mxu1 %v8258_v47 }
0x263f   : > { %7482 = vmatprep.subr.bf16.mxu1 %v9408_v16 }
0x2641   : > { %6646 = vmatmul.mubr.msk.f32.vlgmr.msra.gmra.mrb[38].mxu1 %vm879_vm4, %v4320_v58 }
0x2642   : > { %7484 = vmatpush3.bf16.msra.mxu1 %v8300_v26  ;;  %6667 = vmatprep.mubr.msk.f32.mxu1 %vm7714_vm1, %v9407_v56 }
0x2643   : > { %7485 = vmatprep.subr.bf16.mxu1 %v9408_v16 }
0x2646   : > { %7487 = vmatpush3.bf16.msra.mxu1 %v8306_v30 }
0x2647   : > { %7512 = vmatprep.subr.bf16.mxu1 %v9408_v16 }
0x2708   : > { %v4315_v32 = vpop.f32.mrb[38].mxu0 }
0x2709   : > { %v6636_v42 = vpop.f32.mrb[39].mxu0  ;;  %v4395_v57 = vrot.slane %v4315_v32, 7 }
0x270a   : > { %v9444_v42 = vld [vmem:[#allocation21_spill] sm:$0xff] }
0x270c   : > { %v4245_v18 = vpop.f32.mrb[36].mxu1 }
0x270d   : > { %v4396_v47 = vsel %vm1502_vm8, %v4395_v57, %v4245_v18  ;;  %v6601_v5 = vpop.f32.mrb[37].mxu1 }
0x270e   : > { %6657 = vmatmul.mubr.msk.f32.vlgmr.msra.gmra.mrb[40].mxu0 %vm879_vm4, %v4396_v47  ;;  %v9445_v47 = vld [vmem:[#allocation12_spill] sm:$0xff] }
0x270f   : > { %7490 = vmatpush3.bf16.msra.mxu0 %v8317_v41  ;;  %6702 = vmatprep.mubr.msk.f32.mxu0 %vm7714_vm1, %v9407_v56 }
0x2710   : > { %7491 = vmatprep.subr.bf16.mxu0 %v9408_v16 }
0x2713   : > { %7493 = vmatpush3.bf16.msra.mxu0 %v8326_v54 }
0x2714   : > { %v4389_v26 = vpop.f32.mrb[38].mxu1  ;;  %7494 = vmatprep.subr.bf16.mxu0 %v9408_v16 }
0x2715   : > { %v6647_v30 = vpop.f32.mrb[39].mxu1 }
0x2717   : > { %7496 = vmatpush3.bf16.msra.mxu0 %v8373_v50 }
0x2718   : > { %7497 = vmatprep.subr.bf16.mxu0 %v9408_v16 }
0x271b   : > { %7499 = vmatpush3.bf16.msra.mxu0 %v8394_v7 }
0x271c   : > { %7500 = vmatprep.subr.bf16.mxu0 %v9408_v16 }
0x271f   : > { %7502 = vmatpush3.bf16.msra.mxu0 %v8414_v33  ;;  %v9258_v33 = vld [vmem:[%s9342_s12] ss:$0 sm:$0xff] }
0x2720   : > { %7503 = vmatprep.subr.bf16.mxu0 %v9408_v16  ;;  %v2621_v11 = vadd.f32 %v9258_v33, %v9442_v17 }
0x2723   : > { %7505 = vmatpush3.bf16.msra.mxu0 %v8434_v0 }
0x2724   : > { %7506 = vmatprep.subr.bf16.mxu0 %v9408_v16 }
0x2727   : > { %7508 = vmatpush3.bf16.msra.mxu0 %v8454_v49  ;;  %v9441_v49 = vld [vmem:[#allocation20_spill] sm:$0xff] }
0x2728   : > { %7509 = vmatprep.subr.bf16.mxu0 %v9408_v16 }
0x272b   : > { %7511 = vmatpush3.bf16.msra.mxu0 %v8474_v39  ;;  %v1654_v39 = vadd.f32 %v9258_v33, %v9441_v49 }
0x27e1   : > { %v4465_v41 = vpop.f32.mrb[40].mxu0 }
0x27e2   : > { %v4466_v54 = vadd.f32 %v4465_v41, %v4389_v26  ;;  %v6658_v50 = vpop.f32.mrb[41].mxu0  ;;  %v9446_v26 = vld [vmem:[#allocation14_spill] sm:$0xff] }
0x27e4   : > { %v4469_v7 = vadd.f32 %v8998_v6, %v4466_v54  ;;  %v9447_v54 = vld [vmem:[#allocation18_spill] sm:$0xff] }
0x27e6   : > { %7662 = vtanh.f32 %v4469_v7 }
0x27f0   : > { %v7663_v3 = vpop.eup %7662 }
0x27f1   : > { %6668 = vmatmul.mubr.msk.f32.vlgmr.msra.gmra.mrb[40].mxu1 %vm879_vm4, %v7663_v3  ;;  %v4555_v0 = vmul.f32 %v9005_v63, %v7663_v3  ;;  %v1658_v63 = vsel %vm1657_vm10, %v1654_v39, -inf }
0x27f2   : > { %7514 = vmatpush3.bf16.msra.mxu1 %v8348_v14  ;;  %6737 = vmatprep.mubr.msk.f32.mxu1 %vm7714_vm1, %v9407_v56  ;;  %v3581_v14 = vadd.f32 %v9258_v33, %v9072_v31  ;;  %v2624_v56 = vsel %vm1657_vm10, %v2621_v11, -inf }
0x27f3   : > { %v4556_v6 = vsel %vm1676_vm9, %v4555_v0, 0.0  ;;  %7515 = vmatprep.subr.bf16.mxu1 %v9408_v16 }
0x27f4   : > { %4557 = vadd.xlane.f32.xlu0 %v4556_v6 }
0x27f6   : > { %7517 = vmatpush3.bf16.msra.mxu1 %v9413_v8  ;;  %v3584_v8 = vsel %vm1657_vm10, %v3581_v14, -inf }
0x27f7   : > { %7518 = vmatprep.subr.bf16.mxu1 %v9408_v16 }
0x27f8   : > { %1659 = vmax.xlane.f32.xlu0 %v1658_v63 }
0x27fa   : > { %7520 = vmatpush3.bf16.msra.mxu1 %v9414_v55 }
0x27fb   : > { %7521 = vmatprep.subr.bf16.mxu1 %v9408_v16 }
0x27fc   : > { %2625 = vmax.xlane.f32.xlu0 %v2624_v56 }
0x27fe   : > { %7523 = vmatpush3.bf16.msra.mxu1 %v9415_v60 }
0x27ff   : > { %7524 = vmatprep.subr.bf16.mxu1 %v9408_v16 }
0x2800   : > { %3585 = vmax.xlane.f32.xlu0 %v3584_v8 }
0x2802   : > { %7526 = vmatpush3.bf16.msra.mxu1 %v9416_v9 }
0x2803   : > { %7527 = vmatprep.subr.bf16.mxu1 %v9408_v16 }
0x2806   : > { %7529 = vmatpush3.bf16.msra.mxu1 %v9417_v29 }
0x2807   : > { %7530 = vmatprep.subr.bf16.mxu1 %v9408_v16 }
0x280a   : > { %7532 = vmatpush3.bf16.msra.mxu1 %v9418_v38 }
0x280b   : > { %7533 = vmatprep.subr.bf16.mxu1 %v9408_v16 }
0x280e   : > { %7535 = vmatpush3.bf16.msra.mxu1 %v9419_v19 }
0x2881   : > { %v4558_v55 = vpop.xlane.xlu0 %4557 }
0x2882   : > { %v4559_v60 = vadd.f32 %v4558_v55, %v8489_v12 }
0x2884   : > { %v4560_v31 = vmul.f32 0.5, %v4559_v60 }
0x2885   : > { %v1660_v15 = vpop.xlane.xlu0 %1659 }
0x2886   : > { %7664 = vtanh.f32 %v4560_v31  ;;  %v1661_v21 = vsub.f32 %v1654_v39, %v1660_v15 }
0x2888   : > { %v1662_v9 = vmul.f32 1.442695, %v1661_v21 }
0x2889   : > { %v2626_v22 = vpop.xlane.xlu0 %2625 }
0x288a   : > { %7666 = vpow2.f32 %v1662_v9  ;;  %v2627_v27 = vsub.f32 %v2621_v11, %v2626_v22 }
0x288c   : > { %v2628_v29 = vmul.f32 1.442695, %v2627_v27 }
0x288d   : > { %v3586_v28 = vpop.xlane.xlu0 %3585 }
0x288e   : > { %7668 = vpow2.f32 %v2628_v29  ;;  %v3587_v34 = vsub.f32 %v3581_v14, %v3586_v28 }
0x2890   : > { %v7665_v38 = vpop.eup %7664  ;;  %v3588_v36 = vmul.f32 1.442695, %v3587_v34 }
0x2891   : > { %v4562_v16 = vadd.f32 1.0, %v7665_v38 }
0x2892   : > { %7670 = vpow2.f32 %v3588_v36 }
0x2893   : > { %v9290_v19 = vmul.f32 0.5, %v4562_v16 }
0x2894   : > { %v7667_v43 = vpop.eup %7666 }
0x2895   : > { %v4564_v12 = vsub.f32 1.0, %v9290_v19  ;;  %v1664_v45 = vsel %vm1657_vm10, %v7667_v43, 0.0 }
0x2896   : > { %1665 = vadd.xlane.f32.xlu0 %v1664_v45 }
0x2897   : > { %v4569_v51 = vrot.slane %v4564_v12, %v8171_v24  ;;  %v4573_v53 = vrot.slane %v4564_v12, %v8493_v61 }
0x2898   : > { %v7669_v58 = vpop.eup %7668 }
0x2899   : > { %v2630_v59 = vsel %vm1657_vm10, %v7669_v58, 0.0  ;;  %v4576_v1 = vmul.f32 %v4569_v51, %v9213_v10  ;;  %v4577_v48 = vmul.f32 %v4573_v53, %v9206_v20  ;;  %v9443_v10 = vld [vmem:[#allocation19_spill] sm:$0xff] }
0x289a   : > { %2631 = vadd.xlane.f32.xlu0 %v2630_v59 }
0x289b   : > { %6703 = vmatmul.mubr.f32.vlgmr.msra.gmra.mrb[42].mxu0 %v4576_v1  ;;  %6738 = vmatmul.mubr.f32.vlgmr.msra.gmra.mrb[42].mxu1 %v4577_v48 }
0x289c   : > { %v7671_v52 = vpop.eup %7670 }
0x289d   : > { %v3590_v13 = vsel %vm1657_vm10, %v7671_v52, 0.0 }
0x289e   : > { %3591 = vadd.xlane.f32.xlu0 %v3590_v13 }
0x28c4   : > { %v4540_v40 = vpop.f32.mrb[40].mxu1 }
0x28c5   : > { %v4541_v4 = vadd.f32 %v9258_v33, %v4540_v40  ;;  %v6669_v24 = vpop.f32.mrb[41].mxu1 }
0x28c7   : > { %v4544_v61 = vsel %vm1657_vm10, %v4541_v4, -inf }
0x28c8   : > { %4545 = vmax.xlane.f32.xlu1 %v4544_v61 }
0x28d9   : > { %4743 = vrot.lane.b32.xlu1 %v9149_v25, %s7720_s18 }
0x2923   : > { %v1666_v35 = vpop.xlane.xlu0 %1665 }
0x2924   : > { %7672 = vrcp.f32 %v1666_v35 }
0x2927   : > { %v2632_v44 = vpop.xlane.xlu0 %2631 }
0x2928   : > { %7674 = vrcp.f32 %v2632_v44 }
0x292b   : > { %v3592_v20 = vpop.xlane.xlu0 %3591 }
0x292c   : > { %7676 = vrcp.f32 %v3592_v20 }
0x292e   : > { %v7673_v2 = vpop.eup %7672 }
0x292f   : > { %v1668_v23 = vmul.f32 %v7673_v2, %v7667_v43 }
0x2931   : > { %v1840_v37 = vmul.f32 %v9443_v10, %v1668_v23 }
0x2932   : > { %v7675_v32 = vpop.eup %7674 }
0x2933   : > { %v1846_v57 = vadd.f32 %v9444_v42, %v1840_v37  ;;  %v2634_v18 = vmul.f32 %v7675_v32, %v7669_v58 }
0x2935   : > { %1847 = vst [vmem:[%s7835_s19] sm:$0x3] %v1846_v57  ;;  %v2798_v5 = vmul.f32 %v9445_v47, %v2634_v18 }
0x2936   : > { %v7677_v25 = vpop.eup %7676 }
0x2937   : > { %v2804_v30 = vadd.f32 %v9446_v26, %v2798_v5  ;;  %v3594_v41 = vmul.f32 %v7677_v25, %v7671_v52 }
0x2939   : > { %5012 = vst [vmem:[%s7835_s19 + $0x2] sm:$0x3] %v2804_v30  ;;  %v3758_v50 = vmul.f32 %v9447_v54, %v3594_v41 }
0x293b   : > { %v3764_v7 = vadd.f32 %v9095_v46, %v3758_v50 }
0x293d   : > { %5054 = vst [vmem:[%s7835_s19 + $0x4] sm:$0x3] %v3764_v7 }
0x2955   : > { %v4546_v3 = vpop.xlane.xlu1 %4545 }
0x2956   : > { %v4547_v33 = vsub.f32 %v4541_v4, %v4546_v3 }
0x2958   : > { %v4548_v0 = vmul.f32 1.442695, %v4547_v33 }
0x2959   : > { %v4744_v49 = vpop.permute.xlu1 %4743 }
0x295a   : > { %7678 = vpow2.f32 %v4548_v0  ;;  %4746 = vst.msk [vmem:[#allocation3 + $0x2] sm:$0x3] %vm1676_vm9, %v4744_v49 }
0x2964   : > { %v7679_v39 = vpop.eup %7678 }
0x2965   : > { %v4550_v6 = vsel %vm1657_vm10, %v7679_v39, 0.0 }
0x2966   : > { %4551 = vadd.xlane.f32.xlu0 %v4550_v6 }
0x296e   : > { %v4644_v17 = vpop.f32.mrb[42].mxu0  ;;  %v4714_v11 = vpop.f32.mrb[42].mxu1 }
0x296f   : > { %v4721_v63 = vrot.slane %v4714_v11, 7  ;;  %v6704_v14 = vpop.f32.mrb[43].mxu0  ;;  %v6739_v56 = vpop.f32.mrb[43].mxu1 }
0x2971   : > { %v4722_v46 = vsel %vm1502_vm8, %v4721_v63, %v4644_v17 }
0x297c   : > { %4736 = vrot.lane.b32.xlu0 %v9101_v62, %s7720_s18 }
0x29f3   : > { %v4552_v8 = vpop.xlane.xlu0 %4551 }
0x29f4   : > { %7680 = vrcp.f32 %v4552_v8 }
0x29f7   : > { %v4737_v55 = vpop.permute.xlu0 %4736 }
0x29f8   : > { %4739 = vst.msk [vmem:[#allocation3] sm:$0x3] %vm1676_vm9, %v4737_v55 }
0x29fe   : > { %v7681_v60 = vpop.eup %7680 }
0x29ff   : > { %v4554_v31 = vmul.f32 %v7681_v60, %v7679_v39 }
0x2a01   : > { %v4718_v15 = vmul.f32 %v9290_v19, %v4554_v31 }
0x2a03   : > { %v4724_v21 = vadd.f32 %v4722_v46, %v4718_v15 }
0x2a05   : > { %5096 = vst [vmem:[%s7835_s19 + $0x6] sm:$0x3] %v4724_v21 }
0x2a06 PF: > { %s28_s25 = sadd.s32 1, %s7709_s25   ;;  %s9448_s23 = smov %s7705_s24 }
0x2a07   : > { %p25_p6 = scmp.ge.s32.totalorder %s28_s25, 4   ;;  %s9449_s24 = smov %s9451_s14 }
0x2a09   :  { %27 = sbr.rel (!%p25_p6) target bundleno = 3 (0x3), region = 146 }

</bundles_post_ra>
